<compile_context>
chip_gen: v7x
topology: tpu7x:2x2x1
jax: 0.10.0
libtpu: 0.0.40
codegen_flags: <defaults>
</compile_context>

<pallas_src>
import functools

import jax
import jax.numpy as jnp
from jax.experimental import pallas as pl
from jax.experimental.pallas import tpu as pltpu


_VMEM = pl.BlockSpec(memory_space=pltpu.MemorySpace.VMEM)


def _hardswish(x):
    return x * jnp.clip(x + 3.0, 0.0, 6.0) * (1.0 / 6.0)


# ---------------------------------------------------------------------------
# Pallas kernels
# ---------------------------------------------------------------------------
def _spatial_kernel(x_ref, w_ref, b_ref, o_ref):
    """Whole Spatial_Graph_Layer: relu(W_fused @ x + b_fused).

    x_ref : (1, Cin*V, Tt) bf16      (rows = (cin, v), cols = time tile)
    w_ref : (Cout*V, Cin*V) bf16     (conv + adjacency + BN + residual folded)
    b_ref : (Cout*V, 1)     f32
    """
    y = jnp.dot(w_ref[...], x_ref[0], preferred_element_type=jnp.float32)
    o_ref[0] = jnp.maximum(y + b_ref[...], 0.0).astype(o_ref.dtype)


def _temporal_kernel(*refs, tw, stride, pad, t_out, v):
    """Temporal (tw,1) conv as tw accumulated shifted matmuls + fused epilogue.

    refs = (x_phase_0, ..., x_phase_{stride-1}, w, b, o)
      x_phase_p : (1, C, Q*V) bf16   phase-split padded input,
                  x_phase_p[0, c, q*V + vv] = xpad[c, stride*q + p, vv]
      w         : (tw, Cout, Cin) bf16  (BN scale folded in)
      b         : (Cout, 1) f32         (BN-folded conv bias + shift)
    """
    x_refs = refs[:stride]
    w_ref, b_ref, o_ref = refs[stride], refs[stride + 1], refs[stride + 2]
    tov = t_out * v

    xv = [r[0] for r in x_refs]                       # per-phase (C, Q*V) values

    acc = None
    for dt in range(tw):
        a, ph = divmod(dt, stride)
        xd = xv[ph][:, a * v:a * v + tov]             # (Cin, T_out*V)
        y = jnp.dot(w_ref[dt], xd, preferred_element_type=jnp.float32)
        acc = y if acc is None else acc + y

    # residual: identity (stride==1) or AvgPool2d((stride,1),(stride,1))
    res = None
    for i in range(stride):
        a, ph = divmod(i + pad, stride)
        r = xv[ph][:, a * v:a * v + tov].astype(jnp.float32)
        res = r if res is None else res + r
    res = res * (1.0 / stride)

    o_ref[0] = jnp.maximum(acc + b_ref[...] + res, 0.0).astype(o_ref.dtype)


def _attention_kernel(x_ref, wf_ref, bf_ref, wt_ref, bt_ref, wv_ref, bv_ref,
                      s_ref, t_ref, o_ref):
    """ST-Joint attention + BN + residual + ReLU, one sample per grid step."""
    x = x_ref[0].astype(jnp.float32)                  # (C, T, V)
    xt = jnp.mean(x, axis=2)                          # (C, T): pool over V
    xv = jnp.mean(x, axis=1)                          # (C, V): pool over T

    wf = wf_ref[...]                                  # fcn conv (+BN folded)
    ht = _hardswish(jnp.dot(wf, xt, preferred_element_type=jnp.float32) + bf_ref[...])
    hv = _hardswish(jnp.dot(wf, xv, preferred_element_type=jnp.float32) + bf_ref[...])

    gt = jax.nn.sigmoid(jnp.dot(wt_ref[...], ht,
                                preferred_element_type=jnp.float32) + bt_ref[...])
    gv = jax.nn.sigmoid(jnp.dot(wv_ref[...], hv,
                                preferred_element_type=jnp.float32) + bv_ref[...])

    y = x * gt[:, :, None] * gv[:, None, :]           # x * att(x)
    out = s_ref[...][:, :, None] * y + t_ref[...][:, :, None] + x
    o_ref[0] = jnp.maximum(out, 0.0).astype(o_ref.dtype)


def _classifier_kernel(x_ref, w_ref, b_ref, o_ref):
    """GAP over (T,V) fused with the 1x1 fc; output (N, embedding) lane-dense."""
    gap = jnp.mean(x_ref[...].astype(jnp.float32), axis=2)         # (N, C)
    o_ref[...] = jnp.dot(gap, w_ref[...],
                         preferred_element_type=jnp.float32) + b_ref[...]


# ---------------------------------------------------------------------------
# pallas_call wrappers
# ---------------------------------------------------------------------------
def _pick_tile(t):
    for cand in (512, 384, 256, 128):
        if t % cand == 0:
            return cand
    return t


def _spatial_call(xs, m, b):
    n, cin_v, t = xs.shape
    cout_v = m.shape[0]
    tt = _pick_tile(t)
    return pl.pallas_call(
        _spatial_kernel,
        out_shape=jax.ShapeDtypeStruct((n, cout_v, t), jnp.bfloat16),
        grid=(n, t // tt),
        in_specs=[pl.BlockSpec((1, cin_v, tt), lambda i, j: (i, 0, j)),
                  pl.BlockSpec((cout_v, cin_v), lambda i, j: (0, 0)),
                  pl.BlockSpec((cout_v, 1), lambda i, j: (0, 0))],
        out_specs=pl.BlockSpec((1, cout_v, tt), lambda i, j: (i, 0, j)),
        compiler_params=pltpu.CompilerParams(
            dimension_semantics=("parallel", "parallel")),
    )(xs, m, b)


def _temporal_call(x_phases, w, b, *, tw, stride, pad, t_out, v):
    n, c, qv = x_phases[0].shape
    cout = w.shape[1]
    kernel = functools.partial(_temporal_kernel, tw=tw, stride=stride, pad=pad,
                               t_out=t_out, v=v)
    x_spec = pl.BlockSpec((1, c, qv), lambda i: (i, 0, 0))
    return pl.pallas_call(
        kernel,
        out_shape=jax.ShapeDtypeStruct((n, cout, t_out * v), jnp.bfloat16),
        grid=(n,),
        in_specs=[x_spec] * stride +
                 [pl.BlockSpec((tw, cout, c), lambda i: (0, 0, 0)),
                  pl.BlockSpec((cout, 1), lambda i: (0, 0))],
        out_specs=pl.BlockSpec((1, cout, t_out * v), lambda i: (i, 0, 0)),
        compiler_params=pltpu.CompilerParams(dimension_semantics=("parallel",)),
    )(*x_phases, w, b)


def _attention_call(x, f):
    n, c, t, v = x.shape

    def fixed(shape):
        return pl.BlockSpec(shape, lambda i: (0,) * len(shape))

    return pl.pallas_call(
        _attention_kernel,
        out_shape=jax.ShapeDtypeStruct((n, c, t, v), jnp.bfloat16),
        grid=(n,),
        in_specs=[pl.BlockSpec((1, c, t, v), lambda i: (i, 0, 0, 0)),
                  fixed(f["Wf"].shape), fixed(f["bf"].shape),
                  fixed(f["Wt"].shape), fixed(f["bt"].shape),
                  fixed(f["Wv"].shape), fixed(f["bv"].shape),
                  fixed(f["s"].shape), fixed(f["t"].shape)],
        out_specs=pl.BlockSpec((1, c, t, v), lambda i: (i, 0, 0, 0)),
        compiler_params=pltpu.CompilerParams(dimension_semantics=("parallel",)),
    )(x, f["Wf"], f["bf"], f["Wt"], f["bt"], f["Wv"], f["bv"], f["s"], f["t"])


def _classifier_call(xf, w, b):
    n = xf.shape[0]
    e = w.shape[1]
    return pl.pallas_call(
        _classifier_kernel,
        out_shape=jax.ShapeDtypeStruct((n, e), jnp.float32),
        in_specs=[_VMEM, _VMEM, _VMEM],
        out_specs=_VMEM,
    )(xf, w, b)


# ---------------------------------------------------------------------------
# layers (glue = layout reshapes / padding only)
# ---------------------------------------------------------------------------
def spatial_graph_layer(x, fold):
    """x: (N, C, T, V) bf16 -> (N, Cout, T, V) bf16."""
    n, c, t, v = x.shape
    xs = jnp.swapaxes(x, 2, 3).reshape(n, c * v, t)        # rows (c, v), cols t
    out = _spatial_call(xs, fold["M"], fold["b"])           # (N, Cout*V, T)
    cout = fold["M"].shape[0] // v
    return jnp.swapaxes(out.reshape(n, cout, v, t), 2, 3)   # back to NCTV


def temporal_basic_layer(x, fold, stride, tw):
    """x: (N, C, T, V) bf16 -> (N, C, T_out, V) bf16."""
    n, c, t, v = x.shape
    pad = (tw - 1) // 2
    t_out = (t + 2 * pad - tw) // stride + 1
    q = t_out + (tw - 1) // stride
    total = stride * q
    # NOTE: like the PyTorch module, assumes floor(t/stride) == t_out so the
    # AvgPool residual lines up (true here: tw=3, pad=1, even t).
    xpad = jnp.pad(x, ((0, 0), (0, 0), (pad, total - t - pad), (0, 0)))
    xq5 = xpad.reshape(n, c, q, stride, v)
    x_phases = [xq5[:, :, :, p, :].reshape(n, c, q * v) for p in range(stride)]
    out = _temporal_call(x_phases, fold["W"], fold["b"], tw=tw, stride=stride,
                         pad=pad, t_out=t_out, v=v)          # (N, C, T_out*V)
    return out.reshape(n, c, t_out, v)


def attention_layer(x, fold):
    return _attention_call(x, fold)


def classifier(x, fold):
    n, c, t, v = x.shape
    return _classifier_call(x.reshape(n, c, t * v), fold["W"], fold["b"])


def efficient_gcn_forward(x, folded, *, cfg, tw):
    x = x.astype(jnp.bfloat16)
    for blk, strides in zip(folded["blocks"], cfg):
        x = spatial_graph_layer(x, blk["gcn"])
        for tf, s in zip(blk["tcn"], strides):
            x = temporal_basic_layer(x, tf, s, tw)
        x = attention_layer(x, blk["attn"])
    return classifier(x, folded["fc"])


# ---------------------------------------------------------------------------
# parameter init (matches PyTorch init_param) and one-time folding
# ---------------------------------------------------------------------------
def _bn_init(c):
    return {"gamma": jnp.ones((c,), jnp.float32),
            "beta": jnp.zeros((c,), jnp.float32),
            "mean": jnp.zeros((c,), jnp.float32),
            "var": jnp.ones((c,), jnp.float32)}


def _kaiming(key, out_c, in_c, k=1):
    # kaiming_normal_(mode='fan_out', nonlinearity='leaky_relu', a=0) -> gain sqrt(2)
    fan_out = out_c * k
    std = (2.0 / fan_out) ** 0.5
    return std * jax.random.normal(key, (out_c, in_c), jnp.float32)


def init_params(key, args):
    tw, mgd = args["kernel_size"]
    k_graph = mgd + 1
    cin = args["stream_input_channel"]
    blocks = []
    for (out_c, stride, depth) in args["model_block_args"]:
        key, k1, k2 = jax.random.split(key, 3)
        gcn = {"gcn_w": _kaiming(k1, out_c * k_graph, cin),
               "gcn_b": jnp.zeros((out_c * k_graph,), jnp.float32),
               "bn": _bn_init(out_c)}
        if cin != out_c:
            gcn["res_w"] = _kaiming(k2, out_c, cin)
            gcn["res_b"] = jnp.zeros((out_c,), jnp.float32)
            gcn["res_bn"] = _bn_init(out_c)

        tcns = []
        for j in range(depth):
            key, kt = jax.random.split(key)
            std = (2.0 / (out_c * tw)) ** 0.5
            w = std * jax.random.normal(kt, (out_c, out_c, tw), jnp.float32)
            tcns.append({"w": w,
                         "b": jnp.zeros((out_c,), jnp.float32),
                         "bn": _bn_init(out_c),
                         "stride": stride if j == 0 else 1})

        inner = max(1, out_c // args["reduct_ratio"])
        key, ka, kb, kc = jax.random.split(key, 4)
        attn = {"fcn_w": _kaiming(ka, inner, out_c),
                "fcn_b": jnp.zeros((inner,), jnp.float32),
                "fcn_bn": _bn_init(inner),
                "t_w": _kaiming(kb, out_c, inner),
                "t_b": jnp.zeros((out_c,), jnp.float32),
                "v_w": _kaiming(kc, out_c, inner),
                "v_b": jnp.zeros((out_c,), jnp.float32),
                "bn": _bn_init(out_c)}
        blocks.append({"gcn": gcn, "tcn": tcns, "attn": attn})
        cin = out_c

    key, kf = jax.random.split(key)
    fc = {"fc_w": _kaiming(kf, args["stream_embedding"], cin),
          "fc_b": jnp.zeros((args["stream_embedding"],), jnp.float32)}
    return {"blocks": blocks, "fc": fc}


def _bn_scale_shift(bn):
    scale = bn["gamma"] / jnp.sqrt(bn["var"] + 1e-5)
    shift = bn["beta"] - bn["mean"] * scale
    return scale, shift


def _fold_spatial(p, adj):
    """Fold gcn conv + einsum(.,A) + BN + residual into one (CoutV,CinV) matrix.

    out[(c,w),(n,t)] = relu( M @ x[(cin,v),(n,t)] + b[(c,w)] )
    (edge parameter is init to ones so A*edge == A).
    """
    k, v, _ = adj.shape
    cin = p["gcn_w"].shape[1]
    cout = p["bn"]["gamma"].shape[0]
    s, t = _bn_scale_shift(p["bn"])

    wg = p["gcn_w"].reshape(k, cout, cin)                   # rows were k*Cout + c
    wfold = jnp.einsum("kci,kvw->cwiv", wg, adj)            # (cout, V, cin, V)
    m = s[:, None, None, None] * wfold
    bsum = jnp.einsum("kc,kw->cw", p["gcn_b"].reshape(k, cout), adj.sum(axis=1))
    brow = s[:, None] * bsum + t[:, None]

    eye_v = jnp.eye(v, dtype=jnp.float32)
    if "res_w" in p:                                        # conv1x1 + BN residual
        rs, rt = _bn_scale_shift(p["res_bn"])
        wr = rs[:, None] * p["res_w"]
        m = m + wr[:, None, :, None] * eye_v[None, :, None, :]
        brow = brow + (rs * p["res_b"] + rt)[:, None]
    else:                                                   # identity residual
        m = m + jnp.eye(cout, dtype=jnp.float32)[:, None, :, None] * eye_v[None, :, None, :]

    return {"M": m.reshape(cout * v, cin * v).astype(jnp.bfloat16),
            "b": brow.reshape(cout * v, 1).astype(jnp.float32)}


def _fold_temporal(p):
    s, t = _bn_scale_shift(p["bn"])
    w = jnp.transpose(p["w"], (2, 0, 1)) * s[None, :, None]   # (tw, Cout, Cin)
    b = (s * p["b"] + t)[:, None]
    return {"W": w.astype(jnp.bfloat16), "b": b.astype(jnp.float32)}


def _fold_attention(p):
    fs, ft = _bn_scale_shift(p["fcn_bn"])
    bs, bsh = _bn_scale_shift(p["bn"])
    return {"Wf": (fs[:, None] * p["fcn_w"]).astype(jnp.float32),
            "bf": (fs * p["fcn_b"] + ft)[:, None].astype(jnp.float32),
            "Wt": p["t_w"].astype(jnp.float32),
            "bt": p["t_b"][:, None].astype(jnp.float32),
            "Wv": p["v_w"].astype(jnp.float32),
            "bv": p["v_b"][:, None].astype(jnp.float32),
            "s": bs[:, None].astype(jnp.float32),
            "t": bsh[:, None].astype(jnp.float32)}


def fold_params(params, adj):
    blocks, cfg = [], []
    for blk in params["blocks"]:
        blocks.append({"gcn": _fold_spatial(blk["gcn"], adj),
                       "tcn": [_fold_temporal(tc) for tc in blk["tcn"]],
                       "attn": _fold_attention(blk["attn"])})
        cfg.append(tuple(int(tc["stride"]) for tc in blk["tcn"]))
    fc = {"W": params["fc"]["fc_w"].T.astype(jnp.float32),
          "b": params["fc"]["fc_b"][None, :].astype(jnp.float32)}
    return {"blocks": blocks, "fc": fc}, tuple(cfg)


# ---------------------------------------------------------------------------
# main
# ---------------------------------------------------------------------------
if __name__ == "__main__":
    args = dict(kernel_size=(3, 1),              # (temporal_window, max_graph_distance)
                stream_input_channel=4,
                model_block_args=[[8, 1, 1], [16, 2, 2]],
                stream_embedding=32,
                reduct_ratio=2,
                drop_prob=0.25,                  # dropout: inference -> identity
                num_classes=3)

    N, C, T, V = 2, 4, 16, 16
    key = jax.random.PRNGKey(0)
    kx, kp = jax.random.split(key)
    x = jax.random.normal(kx, (N, C, T, V), jnp.float32)

    # Adjacency stack Adj[k, v, w]: k=0 identity (self), k=1 normalized ring graph.
    K = args["kernel_size"][1] + 1
    eye = jnp.eye(V, dtype=jnp.float32)
    ring = (jnp.roll(eye, 1, axis=1) + jnp.roll(eye, -1, axis=1)) * 0.5
    adj = jnp.stack([eye, ring], axis=0)[:K]

    params = init_params(kp, args)
    folded, cfg = fold_params(params, adj)       # one-time weight folding (not per step)

    tw = args["kernel_size"][0]
    fwd = jax.jit(functools.partial(efficient_gcn_forward, cfg=cfg, tw=tw))
    out = jax.block_until_ready(fwd(x, folded))

    assert out.shape == (N, args["stream_embedding"]), out.shape
    assert bool(jnp.all(jnp.isfinite(out)))
    print("KERNEL_OK")
</pallas_src>

<mosaic_0001>
module attributes {stable_mosaic.version = 11 : i64} {
  func.func @_spatial_kernel(%arg0: i32, %arg1: i32, %arg2: memref<1x64x16xbf16, #tpu.memory_space<vmem>>, %arg3: memref<128x64xbf16, #tpu.memory_space<vmem>>, %arg4: memref<128x1xf32, #tpu.memory_space<vmem>>, %arg5: memref<1x128x16xbf16, #tpu.memory_space<vmem>>) attributes {dimension_semantics = [#tpu.dimension_semantics<parallel>, #tpu.dimension_semantics<parallel>], iteration_bounds = array<i64: 2, 1>, scalar_prefetch = 0 : i64, scratch_operands = 0 : i64, tpu.core_type = #tpu.core_type<tc>, window_params = [{transform_indices = @transform_0, window_bounds = array<i64: 1, 64, 16>}, {pipeline_mode = #tpu.pipeline_mode<synchronous>, transform_indices = @transform_1, window_bounds = array<i64: 128, 64>}, {pipeline_mode = #tpu.pipeline_mode<synchronous>, transform_indices = @transform_2, window_bounds = array<i64: 128, 1>}, {transform_indices = @transform_3, window_bounds = array<i64: 1, 128, 16>}]} {
    %c0 = arith.constant 0 : index
    %c0_0 = arith.constant 0 : index
    %0 = vector.load %arg3[%c0, %c0_0] : memref<128x64xbf16, #tpu.memory_space<vmem>>, vector<128x64xbf16>
    %c0_1 = arith.constant 0 : index
    %c0_2 = arith.constant 0 : index
    %c0_3 = arith.constant 0 : index
    %1 = vector.load %arg2[%c0_1, %c0_2, %c0_3] : memref<1x64x16xbf16, #tpu.memory_space<vmem>>, vector<1x64x16xbf16>
    %2 = vector.shape_cast %1 : vector<1x64x16xbf16> to vector<64x16xbf16>
    %cst = arith.constant dense<0.000000e+00> : vector<128x16xf32>
    %3 = tpu.matmul %0, %2, %cst {dimension_numbers = #tpu.dot_dimension_numbers<[1], [0], [0], [1], [0, 0, 1, 1], [], []>} : vector<128x64xbf16>, vector<64x16xbf16>, vector<128x16xf32> -> vector<128x16xf32>
    %c0_4 = arith.constant 0 : index
    %c0_5 = arith.constant 0 : index
    %4 = vector.load %arg4[%c0_4, %c0_5] : memref<128x1xf32, #tpu.memory_space<vmem>>, vector<128x1xf32>
    %5 = vector.broadcast %4 : vector<128x1xf32> to vector<128x16xf32>
    %6 = arith.addf %3, %5 : vector<128x16xf32>
    %cst_6 = arith.constant 0.000000e+00 : f32
    %7 = vector.broadcast %cst_6 : f32 to vector<128x16xf32>
    %8 = arith.maximumf %6, %7 : vector<128x16xf32>
    %9 = arith.truncf %8 : vector<128x16xf32> to vector<128x16xbf16>
    %c0_7 = arith.constant 0 : index
    %c0_8 = arith.constant 0 : index
    %c0_9 = arith.constant 0 : index
    %10 = vector.load %arg5[%c0_7, %c0_8, %c0_9] : memref<1x128x16xbf16, #tpu.memory_space<vmem>>, vector<1x128x16xbf16>
    %11 = vector.shape_cast %10 : vector<1x128x16xbf16> to vector<128x16xbf16>
    %12 = vector.shape_cast %9 : vector<128x16xbf16> to vector<1x128x16xbf16>
    tpu.vector_store %arg5[%c0_7, %c0_8, %c0_9], %12 {strides = array<i32>} : memref<1x128x16xbf16, #tpu.memory_space<vmem>>, vector<1x128x16xbf16>,
    return
  }
  func.func @transform_0(%arg0: i32, %arg1: i32) -> (i32, i32, i32) {
    %c0_i32 = arith.constant 0 : i32
    %c0_i32_0 = arith.constant 0 : i32
    return %arg0, %c0_i32, %arg1 : i32, i32, i32
  }
  func.func @transform_1(%arg0: i32, %arg1: i32) -> (i32, i32) {
    %c0_i32 = arith.constant 0 : i32
    %c0_i32_0 = arith.constant 0 : i32
    %c0_i32_1 = arith.constant 0 : i32
    return %c0_i32, %c0_i32_0 : i32, i32
  }
  func.func @transform_2(%arg0: i32, %arg1: i32) -> (i32, i32) {
    %c0_i32 = arith.constant 0 : i32
    %c0_i32_0 = arith.constant 0 : i32
    %c0_i32_1 = arith.constant 0 : i32
    return %c0_i32, %c0_i32_0 : i32, i32
  }
  func.func @transform_3(%arg0: i32, %arg1: i32) -> (i32, i32, i32) {
    %c0_i32 = arith.constant 0 : i32
    %c0_i32_0 = arith.constant 0 : i32
    return %arg0, %c0_i32, %arg1 : i32, i32, i32
  }
}

module attributes {stable_mosaic.version = 11 : i64} {
  func.func @_temporal_kernel(%arg0: i32, %arg1: memref<1x8x288xbf16, #tpu.memory_space<vmem>>, %arg2: memref<3x8x8xbf16, #tpu.memory_space<vmem>>, %arg3: memref<8x1xf32, #tpu.memory_space<vmem>>, %arg4: memref<1x8x256xbf16, #tpu.memory_space<vmem>>) attributes {dimension_semantics = [#tpu.dimension_semantics<parallel>], iteration_bounds = array<i64: 2>, scalar_prefetch = 0 : i64, scratch_operands = 0 : i64, tpu.core_type = #tpu.core_type<tc>, window_params = [{transform_indices = @transform_0, window_bounds = array<i64: 1, 8, 288>}, {pipeline_mode = #tpu.pipeline_mode<synchronous>, transform_indices = @transform_1, window_bounds = array<i64: 3, 8, 8>}, {pipeline_mode = #tpu.pipeline_mode<synchronous>, transform_indices = @transform_2, window_bounds = array<i64: 8, 1>}, {transform_indices = @transform_3, window_bounds = array<i64: 1, 8, 256>}]} {
    %c0 = arith.constant 0 : index
    %c0_0 = arith.constant 0 : index
    %c0_1 = arith.constant 0 : index
    %0 = vector.load %arg1[%c0, %c0_0, %c0_1] : memref<1x8x288xbf16, #tpu.memory_space<vmem>>, vector<1x8x288xbf16>
    %1 = vector.shape_cast %0 : vector<1x8x288xbf16> to vector<8x288xbf16>
    %2 = vector.extract_strided_slice %1 {offsets = [0, 0], sizes = [8, 256], strides = [1, 1]} : vector<8x288xbf16> to vector<8x256xbf16>
    %c0_2 = arith.constant 0 : index
    %c0_3 = arith.constant 0 : index
    %c0_4 = arith.constant 0 : index
    %3 = vector.load %arg2[%c0_2, %c0_3, %c0_4] : memref<3x8x8xbf16, #tpu.memory_space<vmem>>, vector<1x8x8xbf16>
    %4 = vector.shape_cast %3 : vector<1x8x8xbf16> to vector<8x8xbf16>
    %cst = arith.constant dense<0.000000e+00> : vector<8x256xf32>
    %5 = tpu.matmul %4, %2, %cst {dimension_numbers = #tpu.dot_dimension_numbers<[1], [0], [0], [1], [0, 0, 1, 1], [], []>} : vector<8x8xbf16>, vector<8x256xbf16>, vector<8x256xf32> -> vector<8x256xf32>
    %6 = vector.extract_strided_slice %1 {offsets = [0, 16], sizes = [8, 256], strides = [1, 1]} : vector<8x288xbf16> to vector<8x256xbf16>
    %c1 = arith.constant 1 : index
    %c0_5 = arith.constant 0 : index
    %c0_6 = arith.constant 0 : index
    %7 = vector.load %arg2[%c1, %c0_5, %c0_6] : memref<3x8x8xbf16, #tpu.memory_space<vmem>>, vector<1x8x8xbf16>
    %8 = vector.shape_cast %7 : vector<1x8x8xbf16> to vector<8x8xbf16>
    %cst_7 = arith.constant dense<0.000000e+00> : vector<8x256xf32>
    %9 = tpu.matmul %8, %6, %cst_7 {dimension_numbers = #tpu.dot_dimension_numbers<[1], [0], [0], [1], [0, 0, 1, 1], [], []>} : vector<8x8xbf16>, vector<8x256xbf16>, vector<8x256xf32> -> vector<8x256xf32>
    %10 = arith.addf %5, %9 : vector<8x256xf32>
    %11 = vector.extract_strided_slice %1 {offsets = [0, 32], sizes = [8, 256], strides = [1, 1]} : vector<8x288xbf16> to vector<8x256xbf16>
    %c2 = arith.constant 2 : index
    %c0_8 = arith.constant 0 : index
    %c0_9 = arith.constant 0 : index
    %12 = vector.load %arg2[%c2, %c0_8, %c0_9] : memref<3x8x8xbf16, #tpu.memory_space<vmem>>, vector<1x8x8xbf16>
    %13 = vector.shape_cast %12 : vector<1x8x8xbf16> to vector<8x8xbf16>
    %cst_10 = arith.constant dense<0.000000e+00> : vector<8x256xf32>
    %14 = tpu.matmul %13, %11, %cst_10 {dimension_numbers = #tpu.dot_dimension_numbers<[1], [0], [0], [1], [0, 0, 1, 1], [], []>} : vector<8x8xbf16>, vector<8x256xbf16>, vector<8x256xf32> -> vector<8x256xf32>
    %15 = arith.addf %10, %14 : vector<8x256xf32>
    %16 = vector.extract_strided_slice %1 {offsets = [0, 16], sizes = [8, 256], strides = [1, 1]} : vector<8x288xbf16> to vector<8x256xbf16>
    %17 = arith.extf %16 : vector<8x256xbf16> to vector<8x256xf32>
    %cst_11 = arith.constant 1.000000e+00 : f32
    %18 = vector.broadcast %cst_11 : f32 to vector<8x256xf32>
    %19 = arith.mulf %17, %18 : vector<8x256xf32>
    %c0_12 = arith.constant 0 : index
    %c0_13 = arith.constant 0 : index
    %20 = vector.load %arg3[%c0_12, %c0_13] : memref<8x1xf32, #tpu.memory_space<vmem>>, vector<8x1xf32>
    %21 = vector.broadcast %20 : vector<8x1xf32> to vector<8x256xf32>
    %22 = arith.addf %15, %21 : vector<8x256xf32>
    %23 = arith.addf %22, %19 : vector<8x256xf32>
    %cst_14 = arith.constant 0.000000e+00 : f32
    %24 = vector.broadcast %cst_14 : f32 to vector<8x256xf32>
    %25 = arith.maximumf %23, %24 : vector<8x256xf32>
    %26 = arith.truncf %25 : vector<8x256xf32> to vector<8x256xbf16>
    %c0_15 = arith.constant 0 : index
    %c0_16 = arith.constant 0 : index
    %c0_17 = arith.constant 0 : index
    %27 = vector.load %arg4[%c0_15, %c0_16, %c0_17] : memref<1x8x256xbf16, #tpu.memory_space<vmem>>, vector<1x8x256xbf16>
    %28 = vector.shape_cast %27 : vector<1x8x256xbf16> to vector<8x256xbf16>
    %29 = vector.shape_cast %26 : vector<8x256xbf16> to vector<1x8x256xbf16>
    tpu.vector_store %arg4[%c0_15, %c0_16, %c0_17], %29 {strides = array<i32>} : memref<1x8x256xbf16, #tpu.memory_space<vmem>>, vector<1x8x256xbf16>,
    return
  }
  func.func @transform_0(%arg0: i32) -> (i32, i32, i32) {
    %c0_i32 = arith.constant 0 : i32
    %c0_i32_0 = arith.constant 0 : i32
    %c0_i32_1 = arith.constant 0 : i32
    return %arg0, %c0_i32, %c0_i32_0 : i32, i32, i32
  }
  func.func @transform_1(%arg0: i32) -> (i32, i32, i32) {
    %c0_i32 = arith.constant 0 : i32
    %c0_i32_0 = arith.constant 0 : i32
    %c0_i32_1 = arith.constant 0 : i32
    %c0_i32_2 = arith.constant 0 : i32
    return %c0_i32, %c0_i32_0, %c0_i32_1 : i32, i32, i32
  }
  func.func @transform_2(%arg0: i32) -> (i32, i32) {
    %c0_i32 = arith.constant 0 : i32
    %c0_i32_0 = arith.constant 0 : i32
    %c0_i32_1 = arith.constant 0 : i32
    return %c0_i32, %c0_i32_0 : i32, i32
  }
  func.func @transform_3(%arg0: i32) -> (i32, i32, i32) {
    %c0_i32 = arith.constant 0 : i32
    %c0_i32_0 = arith.constant 0 : i32
    %c0_i32_1 = arith.constant 0 : i32
    return %arg0, %c0_i32, %c0_i32_0 : i32, i32, i32
  }
}

module attributes {stable_mosaic.version = 11 : i64} {
  func.func @_attention_kernel(%arg0: i32, %arg1: memref<1x8x16x16xbf16, #tpu.memory_space<vmem>>, %arg2: memref<4x8xf32, #tpu.memory_space<vmem>>, %arg3: memref<4x1xf32, #tpu.memory_space<vmem>>, %arg4: memref<8x4xf32, #tpu.memory_space<vmem>>, %arg5: memref<8x1xf32, #tpu.memory_space<vmem>>, %arg6: memref<8x4xf32, #tpu.memory_space<vmem>>, %arg7: memref<8x1xf32, #tpu.memory_space<vmem>>, %arg8: memref<8x1xf32, #tpu.memory_space<vmem>>, %arg9: memref<8x1xf32, #tpu.memory_space<vmem>>, %arg10: memref<1x8x16x16xbf16, #tpu.memory_space<vmem>>) attributes {dimension_semantics = [#tpu.dimension_semantics<parallel>], iteration_bounds = array<i64: 2>, scalar_prefetch = 0 : i64, scratch_operands = 0 : i64, tpu.core_type = #tpu.core_type<tc>, window_params = [{transform_indices = @transform_0, window_bounds = array<i64: 1, 8, 16, 16>}, {pipeline_mode = #tpu.pipeline_mode<synchronous>, transform_indices = @transform_1, window_bounds = array<i64: 4, 8>}, {pipeline_mode = #tpu.pipeline_mode<synchronous>, transform_indices = @transform_2, window_bounds = array<i64: 4, 1>}, {pipeline_mode = #tpu.pipeline_mode<synchronous>, transform_indices = @transform_3, window_bounds = array<i64: 8, 4>}, {pipeline_mode = #tpu.pipeline_mode<synchronous>, transform_indices = @transform_4, window_bounds = array<i64: 8, 1>}, {pipeline_mode = #tpu.pipeline_mode<synchronous>, transform_indices = @transform_5, window_bounds = array<i64: 8, 4>}, {pipeline_mode = #tpu.pipeline_mode<synchronous>, transform_indices = @transform_6, window_bounds = array<i64: 8, 1>}, {pipeline_mode = #tpu.pipeline_mode<synchronous>, transform_indices = @transform_7, window_bounds = array<i64: 8, 1>}, {pipeline_mode = #tpu.pipeline_mode<synchronous>, transform_indices = @transform_8, window_bounds = array<i64: 8, 1>}, {transform_indices = @transform_9, window_bounds = array<i64: 1, 8, 16, 16>}]} {
    %c0 = arith.constant 0 : index
    %c0_0 = arith.constant 0 : index
    %c0_1 = arith.constant 0 : index
    %c0_2 = arith.constant 0 : index
    %0 = vector.load %arg1[%c0, %c0_0, %c0_1, %c0_2] : memref<1x8x16x16xbf16, #tpu.memory_space<vmem>>, vector<1x8x16x16xbf16>
    %1 = vector.shape_cast %0 : vector<1x8x16x16xbf16> to vector<8x16x16xbf16>
    %2 = arith.extf %1 : vector<8x16x16xbf16> to vector<8x16x16xf32>
    %cst = arith.constant dense<0.000000e+00> : vector<8x16xf32>
    %3 = vector.multi_reduction <add>, %2, %cst [2] : vector<8x16x16xf32> to vector<8x16xf32>
    %cst_3 = arith.constant 1.600000e+01 : f32
    %4 = vector.broadcast %cst_3 : f32 to vector<8x16xf32>
    %5 = arith.divf %3, %4 : vector<8x16xf32>
    %cst_4 = arith.constant dense<0.000000e+00> : vector<8x16xf32>
    %6 = vector.multi_reduction <add>, %2, %cst_4 [1] : vector<8x16x16xf32> to vector<8x16xf32>
    %cst_5 = arith.constant 1.600000e+01 : f32
    %7 = vector.broadcast %cst_5 : f32 to vector<8x16xf32>
    %8 = arith.divf %6, %7 : vector<8x16xf32>
    %c0_6 = arith.constant 0 : index
    %c0_7 = arith.constant 0 : index
    %9 = vector.load %arg2[%c0_6, %c0_7] : memref<4x8xf32, #tpu.memory_space<vmem>>, vector<4x8xf32>
    %cst_8 = arith.constant dense<0.000000e+00> : vector<4x16xf32>
    %10 = tpu.matmul %9, %5, %cst_8 {dimension_numbers = #tpu.dot_dimension_numbers<[1], [0], [0], [1], [0, 0, 1, 1], [], []>} : vector<4x8xf32>, vector<8x16xf32>, vector<4x16xf32> -> vector<4x16xf32>
    %c0_9 = arith.constant 0 : index
    %c0_10 = arith.constant 0 : index
    %11 = vector.load %arg3[%c0_9, %c0_10] : memref<4x1xf32, #tpu.memory_space<vmem>>, vector<4x1xf32>
    %12 = vector.broadcast %11 : vector<4x1xf32> to vector<4x16xf32>
    %13 = arith.addf %10, %12 : vector<4x16xf32>
    %cst_11 = arith.constant 3.000000e+00 : f32
    %14 = vector.broadcast %cst_11 : f32 to vector<4x16xf32>
    %15 = arith.addf %13, %14 : vector<4x16xf32>
    %cst_12 = arith.constant 0.000000e+00 : f32
    %cst_13 = arith.constant 6.000000e+00 : f32
    %16 = vector.broadcast %cst_12 : f32 to vector<4x16xf32>
    %17 = arith.maximumf %16, %15 : vector<4x16xf32>
    %18 = vector.broadcast %cst_13 : f32 to vector<4x16xf32>
    %19 = arith.minimumf %18, %17 : vector<4x16xf32>
    %20 = arith.mulf %13, %19 : vector<4x16xf32>
    %cst_14 = arith.constant 0.166666672 : f32
    %21 = vector.broadcast %cst_14 : f32 to vector<4x16xf32>
    %22 = arith.mulf %20, %21 : vector<4x16xf32>
    %cst_15 = arith.constant dense<0.000000e+00> : vector<4x16xf32>
    %23 = tpu.matmul %9, %8, %cst_15 {dimension_numbers = #tpu.dot_dimension_numbers<[1], [0], [0], [1], [0, 0, 1, 1], [], []>} : vector<4x8xf32>, vector<8x16xf32>, vector<4x16xf32> -> vector<4x16xf32>
    %c0_16 = arith.constant 0 : index
    %c0_17 = arith.constant 0 : index
    %24 = vector.load %arg3[%c0_16, %c0_17] : memref<4x1xf32, #tpu.memory_space<vmem>>, vector<4x1xf32>
    %25 = vector.broadcast %24 : vector<4x1xf32> to vector<4x16xf32>
    %26 = arith.addf %23, %25 : vector<4x16xf32>
    %cst_18 = arith.constant 3.000000e+00 : f32
    %27 = vector.broadcast %cst_18 : f32 to vector<4x16xf32>
    %28 = arith.addf %26, %27 : vector<4x16xf32>
    %cst_19 = arith.constant 0.000000e+00 : f32
    %cst_20 = arith.constant 6.000000e+00 : f32
    %29 = vector.broadcast %cst_19 : f32 to vector<4x16xf32>
    %30 = arith.maximumf %29, %28 : vector<4x16xf32>
    %31 = vector.broadcast %cst_20 : f32 to vector<4x16xf32>
    %32 = arith.minimumf %31, %30 : vector<4x16xf32>
    %33 = arith.mulf %26, %32 : vector<4x16xf32>
    %cst_21 = arith.constant 0.166666672 : f32
    %34 = vector.broadcast %cst_21 : f32 to vector<4x16xf32>
    %35 = arith.mulf %33, %34 : vector<4x16xf32>
    %c0_22 = arith.constant 0 : index
    %c0_23 = arith.constant 0 : index
    %36 = vector.load %arg4[%c0_22, %c0_23] : memref<8x4xf32, #tpu.memory_space<vmem>>, vector<8x4xf32>
    %cst_24 = arith.constant dense<0.000000e+00> : vector<8x16xf32>
    %37 = tpu.matmul %36, %22, %cst_24 {dimension_numbers = #tpu.dot_dimension_numbers<[1], [0], [0], [1], [0, 0, 1, 1], [], []>} : vector<8x4xf32>, vector<4x16xf32>, vector<8x16xf32> -> vector<8x16xf32>
    %c0_25 = arith.constant 0 : index
    %c0_26 = arith.constant 0 : index
    %38 = vector.load %arg5[%c0_25, %c0_26] : memref<8x1xf32, #tpu.memory_space<vmem>>, vector<8x1xf32>
    %39 = vector.broadcast %38 : vector<8x1xf32> to vector<8x16xf32>
    %40 = arith.addf %37, %39 : vector<8x16xf32>
    %41 = arith.negf %40 : vector<8x16xf32>
    %42 = math.exp %41 : vector<8x16xf32>
    %cst_27 = arith.constant 1.000000e+00 : f32
    %43 = vector.broadcast %cst_27 : f32 to vector<8x16xf32>
    %44 = arith.addf %43, %42 : vector<8x16xf32>
    %45 = arith.divf %43, %44 : vector<8x16xf32>
    %c0_28 = arith.constant 0 : index
    %c0_29 = arith.constant 0 : index
    %46 = vector.load %arg6[%c0_28, %c0_29] : memref<8x4xf32, #tpu.memory_space<vmem>>, vector<8x4xf32>
    %cst_30 = arith.constant dense<0.000000e+00> : vector<8x16xf32>
    %47 = tpu.matmul %46, %35, %cst_30 {dimension_numbers = #tpu.dot_dimension_numbers<[1], [0], [0], [1], [0, 0, 1, 1], [], []>} : vector<8x4xf32>, vector<4x16xf32>, vector<8x16xf32> -> vector<8x16xf32>
    %c0_31 = arith.constant 0 : index
    %c0_32 = arith.constant 0 : index
    %48 = vector.load %arg7[%c0_31, %c0_32] : memref<8x1xf32, #tpu.memory_space<vmem>>, vector<8x1xf32>
    %49 = vector.broadcast %48 : vector<8x1xf32> to vector<8x16xf32>
    %50 = arith.addf %47, %49 : vector<8x16xf32>
    %51 = arith.negf %50 : vector<8x16xf32>
    %52 = math.exp %51 : vector<8x16xf32>
    %cst_33 = arith.constant 1.000000e+00 : f32
    %53 = vector.broadcast %cst_33 : f32 to vector<8x16xf32>
    %54 = arith.addf %53, %52 : vector<8x16xf32>
    %55 = arith.divf %53, %54 : vector<8x16xf32>
    %56 = vector.shape_cast %45 : vector<8x16xf32> to vector<8x16x1xf32>
    %57 = vector.broadcast %56 : vector<8x16x1xf32> to vector<8x16x16xf32>
    %58 = arith.mulf %2, %57 : vector<8x16x16xf32>
    %59 = vector.shape_cast %55 : vector<8x16xf32> to vector<8x1x16xf32>
    %60 = vector.broadcast %59 : vector<8x1x16xf32> to vector<8x16x16xf32>
    %61 = arith.mulf %58, %60 : vector<8x16x16xf32>
    %c0_34 = arith.constant 0 : index
    %c0_35 = arith.constant 0 : index
    %62 = vector.load %arg8[%c0_34, %c0_35] : memref<8x1xf32, #tpu.memory_space<vmem>>, vector<8x1xf32>
    %63 = vector.shape_cast %62 : vector<8x1xf32> to vector<8x1x1xf32>
    %64 = vector.broadcast %63 : vector<8x1x1xf32> to vector<8x16x16xf32>
    %65 = arith.mulf %64, %61 : vector<8x16x16xf32>
    %c0_36 = arith.constant 0 : index
    %c0_37 = arith.constant 0 : index
    %66 = vector.load %arg9[%c0_36, %c0_37] : memref<8x1xf32, #tpu.memory_space<vmem>>, vector<8x1xf32>
    %67 = vector.shape_cast %66 : vector<8x1xf32> to vector<8x1x1xf32>
    %68 = vector.broadcast %67 : vector<8x1x1xf32> to vector<8x16x16xf32>
    %69 = arith.addf %65, %68 : vector<8x16x16xf32>
    %70 = arith.addf %69, %2 : vector<8x16x16xf32>
    %cst_38 = arith.constant 0.000000e+00 : f32
    %71 = vector.broadcast %cst_38 : f32 to vector<8x16x16xf32>
    %72 = arith.maximumf %70, %71 : vector<8x16x16xf32>
    %73 = arith.truncf %72 : vector<8x16x16xf32> to vector<8x16x16xbf16>
    %c0_39 = arith.constant 0 : index
    %c0_40 = arith.constant 0 : index
    %c0_41 = arith.constant 0 : index
    %c0_42 = arith.constant 0 : index
    %74 = vector.load %arg10[%c0_39, %c0_40, %c0_41, %c0_42] : memref<1x8x16x16xbf16, #tpu.memory_space<vmem>>, vector<1x8x16x16xbf16>
    %75 = vector.shape_cast %74 : vector<1x8x16x16xbf16> to vector<8x16x16xbf16>
    %76 = vector.shape_cast %73 : vector<8x16x16xbf16> to vector<1x8x16x16xbf16>
    tpu.vector_store %arg10[%c0_39, %c0_40, %c0_41, %c0_42], %76 {strides = array<i32>} : memref<1x8x16x16xbf16, #tpu.memory_space<vmem>>, vector<1x8x16x16xbf16>,
    return
  }
  func.func @transform_0(%arg0: i32) -> (i32, i32, i32, i32) {
    %c0_i32 = arith.constant 0 : i32
    %c0_i32_0 = arith.constant 0 : i32
    %c0_i32_1 = arith.constant 0 : i32
    %c0_i32_2 = arith.constant 0 : i32
    return %arg0, %c0_i32, %c0_i32_0, %c0_i32_1 : i32, i32, i32, i32
  }
  func.func @transform_1(%arg0: i32) -> (i32, i32) {
    %c0_i32 = arith.constant 0 : i32
    %c0_i32_0 = arith.constant 0 : i32
    %c0_i32_1 = arith.constant 0 : i32
    return %c0_i32, %c0_i32_0 : i32, i32
  }
  func.func @transform_2(%arg0: i32) -> (i32, i32) {
    %c0_i32 = arith.constant 0 : i32
    %c0_i32_0 = arith.constant 0 : i32
    %c0_i32_1 = arith.constant 0 : i32
    return %c0_i32, %c0_i32_0 : i32, i32
  }
  func.func @transform_3(%arg0: i32) -> (i32, i32) {
    %c0_i32 = arith.constant 0 : i32
    %c0_i32_0 = arith.constant 0 : i32
    %c0_i32_1 = arith.constant 0 : i32
    return %c0_i32, %c0_i32_0 : i32, i32
  }
  func.func @transform_4(%arg0: i32) -> (i32, i32) {
    %c0_i32 = arith.constant 0 : i32
    %c0_i32_0 = arith.constant 0 : i32
    %c0_i32_1 = arith.constant 0 : i32
    return %c0_i32, %c0_i32_0 : i32, i32
  }
  func.func @transform_5(%arg0: i32) -> (i32, i32) {
    %c0_i32 = arith.constant 0 : i32
    %c0_i32_0 = arith.constant 0 : i32
    %c0_i32_1 = arith.constant 0 : i32
    return %c0_i32, %c0_i32_0 : i32, i32
  }
  func.func @transform_6(%arg0: i32) -> (i32, i32) {
    %c0_i32 = arith.constant 0 : i32
    %c0_i32_0 = arith.constant 0 : i32
    %c0_i32_1 = arith.constant 0 : i32
    return %c0_i32, %c0_i32_0 : i32, i32
  }
  func.func @transform_7(%arg0: i32) -> (i32, i32) {
    %c0_i32 = arith.constant 0 : i32
    %c0_i32_0 = arith.constant 0 : i32
    %c0_i32_1 = arith.constant 0 : i32
    return %c0_i32, %c0_i32_0 : i32, i32
  }
  func.func @transform_8(%arg0: i32) -> (i32, i32) {
    %c0_i32 = arith.constant 0 : i32
    %c0_i32_0 = arith.constant 0 : i32
    %c0_i32_1 = arith.constant 0 : i32
    return %c0_i32, %c0_i32_0 : i32, i32
  }
  func.func @transform_9(%arg0: i32) -> (i32, i32, i32, i32) {
    %c0_i32 = arith.constant 0 : i32
    %c0_i32_0 = arith.constant 0 : i32
    %c0_i32_1 = arith.constant 0 : i32
    %c0_i32_2 = arith.constant 0 : i32
    return %arg0, %c0_i32, %c0_i32_0, %c0_i32_1 : i32, i32, i32, i32
  }
}

module attributes {stable_mosaic.version = 11 : i64} {
  func.func @_spatial_kernel(%arg0: i32, %arg1: i32, %arg2: memref<1x128x16xbf16, #tpu.memory_space<vmem>>, %arg3: memref<256x128xbf16, #tpu.memory_space<vmem>>, %arg4: memref<256x1xf32, #tpu.memory_space<vmem>>, %arg5: memref<1x256x16xbf16, #tpu.memory_space<vmem>>) attributes {dimension_semantics = [#tpu.dimension_semantics<parallel>, #tpu.dimension_semantics<parallel>], iteration_bounds = array<i64: 2, 1>, scalar_prefetch = 0 : i64, scratch_operands = 0 : i64, tpu.core_type = #tpu.core_type<tc>, window_params = [{transform_indices = @transform_0, window_bounds = array<i64: 1, 128, 16>}, {pipeline_mode = #tpu.pipeline_mode<synchronous>, transform_indices = @transform_1, window_bounds = array<i64: 256, 128>}, {pipeline_mode = #tpu.pipeline_mode<synchronous>, transform_indices = @transform_2, window_bounds = array<i64: 256, 1>}, {transform_indices = @transform_3, window_bounds = array<i64: 1, 256, 16>}]} {
    %c0 = arith.constant 0 : index
    %c0_0 = arith.constant 0 : index
    %0 = vector.load %arg3[%c0, %c0_0] : memref<256x128xbf16, #tpu.memory_space<vmem>>, vector<256x128xbf16>
    %c0_1 = arith.constant 0 : index
    %c0_2 = arith.constant 0 : index
    %c0_3 = arith.constant 0 : index
    %1 = vector.load %arg2[%c0_1, %c0_2, %c0_3] : memref<1x128x16xbf16, #tpu.memory_space<vmem>>, vector<1x128x16xbf16>
    %2 = vector.shape_cast %1 : vector<1x128x16xbf16> to vector<128x16xbf16>
    %cst = arith.constant dense<0.000000e+00> : vector<256x16xf32>
    %3 = tpu.matmul %0, %2, %cst {dimension_numbers = #tpu.dot_dimension_numbers<[1], [0], [0], [1], [0, 0, 1, 1], [], []>} : vector<256x128xbf16>, vector<128x16xbf16>, vector<256x16xf32> -> vector<256x16xf32>
    %c0_4 = arith.constant 0 : index
    %c0_5 = arith.constant 0 : index
    %4 = vector.load %arg4[%c0_4, %c0_5] : memref<256x1xf32, #tpu.memory_space<vmem>>, vector<256x1xf32>
    %5 = vector.broadcast %4 : vector<256x1xf32> to vector<256x16xf32>
    %6 = arith.addf %3, %5 : vector<256x16xf32>
    %cst_6 = arith.constant 0.000000e+00 : f32
    %7 = vector.broadcast %cst_6 : f32 to vector<256x16xf32>
    %8 = arith.maximumf %6, %7 : vector<256x16xf32>
    %9 = arith.truncf %8 : vector<256x16xf32> to vector<256x16xbf16>
    %c0_7 = arith.constant 0 : index
    %c0_8 = arith.constant 0 : index
    %c0_9 = arith.constant 0 : index
    %10 = vector.load %arg5[%c0_7, %c0_8, %c0_9] : memref<1x256x16xbf16, #tpu.memory_space<vmem>>, vector<1x256x16xbf16>
    %11 = vector.shape_cast %10 : vector<1x256x16xbf16> to vector<256x16xbf16>
    %12 = vector.shape_cast %9 : vector<256x16xbf16> to vector<1x256x16xbf16>
    tpu.vector_store %arg5[%c0_7, %c0_8, %c0_9], %12 {strides = array<i32>} : memref<1x256x16xbf16, #tpu.memory_space<vmem>>, vector<1x256x16xbf16>,
    return
  }
  func.func @transform_0(%arg0: i32, %arg1: i32) -> (i32, i32, i32) {
    %c0_i32 = arith.constant 0 : i32
    %c0_i32_0 = arith.constant 0 : i32
    return %arg0, %c0_i32, %arg1 : i32, i32, i32
  }
  func.func @transform_1(%arg0: i32, %arg1: i32) -> (i32, i32) {
    %c0_i32 = arith.constant 0 : i32
    %c0_i32_0 = arith.constant 0 : i32
    %c0_i32_1 = arith.constant 0 : i32
    return %c0_i32, %c0_i32_0 : i32, i32
  }
  func.func @transform_2(%arg0: i32, %arg1: i32) -> (i32, i32) {
    %c0_i32 = arith.constant 0 : i32
    %c0_i32_0 = arith.constant 0 : i32
    %c0_i32_1 = arith.constant 0 : i32
    return %c0_i32, %c0_i32_0 : i32, i32
  }
  func.func @transform_3(%arg0: i32, %arg1: i32) -> (i32, i32, i32) {
    %c0_i32 = arith.constant 0 : i32
    %c0_i32_0 = arith.constant 0 : i32
    return %arg0, %c0_i32, %arg1 : i32, i32, i32
  }
}

module attributes {stable_mosaic.version = 11 : i64} {
  func.func @_temporal_kernel(%arg0: i32, %arg1: memref<1x16x144xbf16, #tpu.memory_space<vmem>>, %arg2: memref<1x16x144xbf16, #tpu.memory_space<vmem>>, %arg3: memref<3x16x16xbf16, #tpu.memory_space<vmem>>, %arg4: memref<16x1xf32, #tpu.memory_space<vmem>>, %arg5: memref<1x16x128xbf16, #tpu.memory_space<vmem>>) attributes {dimension_semantics = [#tpu.dimension_semantics<parallel>], iteration_bounds = array<i64: 2>, scalar_prefetch = 0 : i64, scratch_operands = 0 : i64, tpu.core_type = #tpu.core_type<tc>, window_params = [{transform_indices = @transform_0, window_bounds = array<i64: 1, 16, 144>}, {transform_indices = @transform_1, window_bounds = array<i64: 1, 16, 144>}, {pipeline_mode = #tpu.pipeline_mode<synchronous>, transform_indices = @transform_2, window_bounds = array<i64: 3, 16, 16>}, {pipeline_mode = #tpu.pipeline_mode<synchronous>, transform_indices = @transform_3, window_bounds = array<i64: 16, 1>}, {transform_indices = @transform_4, window_bounds = array<i64: 1, 16, 128>}]} {
    %c0 = arith.constant 0 : index
    %c0_0 = arith.constant 0 : index
    %c0_1 = arith.constant 0 : index
    %0 = vector.load %arg1[%c0, %c0_0, %c0_1] : memref<1x16x144xbf16, #tpu.memory_space<vmem>>, vector<1x16x144xbf16>
    %1 = vector.shape_cast %0 : vector<1x16x144xbf16> to vector<16x144xbf16>
    %c0_2 = arith.constant 0 : index
    %c0_3 = arith.constant 0 : index
    %c0_4 = arith.constant 0 : index
    %2 = vector.load %arg2[%c0_2, %c0_3, %c0_4] : memref<1x16x144xbf16, #tpu.memory_space<vmem>>, vector<1x16x144xbf16>
    %3 = vector.shape_cast %2 : vector<1x16x144xbf16> to vector<16x144xbf16>
    %4 = vector.extract_strided_slice %1 {offsets = [0, 0], sizes = [16, 128], strides = [1, 1]} : vector<16x144xbf16> to vector<16x128xbf16>
    %c0_5 = arith.constant 0 : index
    %c0_6 = arith.constant 0 : index
    %c0_7 = arith.constant 0 : index
    %5 = vector.load %arg3[%c0_5, %c0_6, %c0_7] : memref<3x16x16xbf16, #tpu.memory_space<vmem>>, vector<1x16x16xbf16>
    %6 = vector.shape_cast %5 : vector<1x16x16xbf16> to vector<16x16xbf16>
    %cst = arith.constant dense<0.000000e+00> : vector<16x128xf32>
    %7 = tpu.matmul %6, %4, %cst {dimension_numbers = #tpu.dot_dimension_numbers<[1], [0], [0], [1], [0, 0, 1, 1], [], []>} : vector<16x16xbf16>, vector<16x128xbf16>, vector<16x128xf32> -> vector<16x128xf32>
    %8 = vector.extract_strided_slice %3 {offsets = [0, 0], sizes = [16, 128], strides = [1, 1]} : vector<16x144xbf16> to vector<16x128xbf16>
    %c1 = arith.constant 1 : index
    %c0_8 = arith.constant 0 : index
    %c0_9 = arith.constant 0 : index
    %9 = vector.load %arg3[%c1, %c0_8, %c0_9] : memref<3x16x16xbf16, #tpu.memory_space<vmem>>, vector<1x16x16xbf16>
    %10 = vector.shape_cast %9 : vector<1x16x16xbf16> to vector<16x16xbf16>
    %cst_10 = arith.constant dense<0.000000e+00> : vector<16x128xf32>
    %11 = tpu.matmul %10, %8, %cst_10 {dimension_numbers = #tpu.dot_dimension_numbers<[1], [0], [0], [1], [0, 0, 1, 1], [], []>} : vector<16x16xbf16>, vector<16x128xbf16>, vector<16x128xf32> -> vector<16x128xf32>
    %12 = arith.addf %7, %11 : vector<16x128xf32>
    %13 = vector.extract_strided_slice %1 {offsets = [0, 16], sizes = [16, 128], strides = [1, 1]} : vector<16x144xbf16> to vector<16x128xbf16>
    %c2 = arith.constant 2 : index
    %c0_11 = arith.constant 0 : index
    %c0_12 = arith.constant 0 : index
    %14 = vector.load %arg3[%c2, %c0_11, %c0_12] : memref<3x16x16xbf16, #tpu.memory_space<vmem>>, vector<1x16x16xbf16>
    %15 = vector.shape_cast %14 : vector<1x16x16xbf16> to vector<16x16xbf16>
    %cst_13 = arith.constant dense<0.000000e+00> : vector<16x128xf32>
    %16 = tpu.matmul %15, %13, %cst_13 {dimension_numbers = #tpu.dot_dimension_numbers<[1], [0], [0], [1], [0, 0, 1, 1], [], []>} : vector<16x16xbf16>, vector<16x128xbf16>, vector<16x128xf32> -> vector<16x128xf32>
    %17 = arith.addf %12, %16 : vector<16x128xf32>
    %18 = vector.extract_strided_slice %3 {offsets = [0, 0], sizes = [16, 128], strides = [1, 1]} : vector<16x144xbf16> to vector<16x128xbf16>
    %19 = arith.extf %18 : vector<16x128xbf16> to vector<16x128xf32>
    %20 = vector.extract_strided_slice %1 {offsets = [0, 16], sizes = [16, 128], strides = [1, 1]} : vector<16x144xbf16> to vector<16x128xbf16>
    %21 = arith.extf %20 : vector<16x128xbf16> to vector<16x128xf32>
    %22 = arith.addf %19, %21 : vector<16x128xf32>
    %cst_14 = arith.constant 5.000000e-01 : f32
    %23 = vector.broadcast %cst_14 : f32 to vector<16x128xf32>
    %24 = arith.mulf %22, %23 : vector<16x128xf32>
    %c0_15 = arith.constant 0 : index
    %c0_16 = arith.constant 0 : index
    %25 = vector.load %arg4[%c0_15, %c0_16] : memref<16x1xf32, #tpu.memory_space<vmem>>, vector<16x1xf32>
    %26 = vector.broadcast %25 : vector<16x1xf32> to vector<16x128xf32>
    %27 = arith.addf %17, %26 : vector<16x128xf32>
    %28 = arith.addf %27, %24 : vector<16x128xf32>
    %cst_17 = arith.constant 0.000000e+00 : f32
    %29 = vector.broadcast %cst_17 : f32 to vector<16x128xf32>
    %30 = arith.maximumf %28, %29 : vector<16x128xf32>
    %31 = arith.truncf %30 : vector<16x128xf32> to vector<16x128xbf16>
    %c0_18 = arith.constant 0 : index
    %c0_19 = arith.constant 0 : index
    %c0_20 = arith.constant 0 : index
    %32 = vector.load %arg5[%c0_18, %c0_19, %c0_20] : memref<1x16x128xbf16, #tpu.memory_space<vmem>>, vector<1x16x128xbf16>
    %33 = vector.shape_cast %32 : vector<1x16x128xbf16> to vector<16x128xbf16>
    %34 = vector.shape_cast %31 : vector<16x128xbf16> to vector<1x16x128xbf16>
    tpu.vector_store %arg5[%c0_18, %c0_19, %c0_20], %34 {strides = array<i32>} : memref<1x16x128xbf16, #tpu.memory_space<vmem>>, vector<1x16x128xbf16>,
    return
  }
  func.func @transform_0(%arg0: i32) -> (i32, i32, i32) {
    %c0_i32 = arith.constant 0 : i32
    %c0_i32_0 = arith.constant 0 : i32
    %c0_i32_1 = arith.constant 0 : i32
    return %arg0, %c0_i32, %c0_i32_0 : i32, i32, i32
  }
  func.func @transform_1(%arg0: i32) -> (i32, i32, i32) {
    %c0_i32 = arith.constant 0 : i32
    %c0_i32_0 = arith.constant 0 : i32
    %c0_i32_1 = arith.constant 0 : i32
    return %arg0, %c0_i32, %c0_i32_0 : i32, i32, i32
  }
  func.func @transform_2(%arg0: i32) -> (i32, i32, i32) {
    %c0_i32 = arith.constant 0 : i32
    %c0_i32_0 = arith.constant 0 : i32
    %c0_i32_1 = arith.constant 0 : i32
    %c0_i32_2 = arith.constant 0 : i32
    return %c0_i32, %c0_i32_0, %c0_i32_1 : i32, i32, i32
  }
  func.func @transform_3(%arg0: i32) -> (i32, i32) {
    %c0_i32 = arith.constant 0 : i32
    %c0_i32_0 = arith.constant 0 : i32
    %c0_i32_1 = arith.constant 0 : i32
    return %c0_i32, %c0_i32_0 : i32, i32
  }
  func.func @transform_4(%arg0: i32) -> (i32, i32, i32) {
    %c0_i32 = arith.constant 0 : i32
    %c0_i32_0 = arith.constant 0 : i32
    %c0_i32_1 = arith.constant 0 : i32
    return %arg0, %c0_i32, %c0_i32_0 : i32, i32, i32
  }
}

module attributes {stable_mosaic.version = 11 : i64} {
  func.func @_temporal_kernel(%arg0: i32, %arg1: memref<1x16x160xbf16, #tpu.memory_space<vmem>>, %arg2: memref<3x16x16xbf16, #tpu.memory_space<vmem>>, %arg3: memref<16x1xf32, #tpu.memory_space<vmem>>, %arg4: memref<1x16x128xbf16, #tpu.memory_space<vmem>>) attributes {dimension_semantics = [#tpu.dimension_semantics<parallel>], iteration_bounds = array<i64: 2>, scalar_prefetch = 0 : i64, scratch_operands = 0 : i64, tpu.core_type = #tpu.core_type<tc>, window_params = [{transform_indices = @transform_0, window_bounds = array<i64: 1, 16, 160>}, {pipeline_mode = #tpu.pipeline_mode<synchronous>, transform_indices = @transform_1, window_bounds = array<i64: 3, 16, 16>}, {pipeline_mode = #tpu.pipeline_mode<synchronous>, transform_indices = @transform_2, window_bounds = array<i64: 16, 1>}, {transform_indices = @transform_3, window_bounds = array<i64: 1, 16, 128>}]} {
    %c0 = arith.constant 0 : index
    %c0_0 = arith.constant 0 : index
    %c0_1 = arith.constant 0 : index
    %0 = vector.load %arg1[%c0, %c0_0, %c0_1] : memref<1x16x160xbf16, #tpu.memory_space<vmem>>, vector<1x16x160xbf16>
    %1 = vector.shape_cast %0 : vector<1x16x160xbf16> to vector<16x160xbf16>
    %2 = vector.extract_strided_slice %1 {offsets = [0, 0], sizes = [16, 128], strides = [1, 1]} : vector<16x160xbf16> to vector<16x128xbf16>
    %c0_2 = arith.constant 0 : index
    %c0_3 = arith.constant 0 : index
    %c0_4 = arith.constant 0 : index
    %3 = vector.load %arg2[%c0_2, %c0_3, %c0_4] : memref<3x16x16xbf16, #tpu.memory_space<vmem>>, vector<1x16x16xbf16>
    %4 = vector.shape_cast %3 : vector<1x16x16xbf16> to vector<16x16xbf16>
    %cst = arith.constant dense<0.000000e+00> : vector<16x128xf32>
    %5 = tpu.matmul %4, %2, %cst {dimension_numbers = #tpu.dot_dimension_numbers<[1], [0], [0], [1], [0, 0, 1, 1], [], []>} : vector<16x16xbf16>, vector<16x128xbf16>, vector<16x128xf32> -> vector<16x128xf32>
    %6 = vector.extract_strided_slice %1 {offsets = [0, 16], sizes = [16, 128], strides = [1, 1]} : vector<16x160xbf16> to vector<16x128xbf16>
    %c1 = arith.constant 1 : index
    %c0_5 = arith.constant 0 : index
    %c0_6 = arith.constant 0 : index
    %7 = vector.load %arg2[%c1, %c0_5, %c0_6] : memref<3x16x16xbf16, #tpu.memory_space<vmem>>, vector<1x16x16xbf16>
    %8 = vector.shape_cast %7 : vector<1x16x16xbf16> to vector<16x16xbf16>
    %cst_7 = arith.constant dense<0.000000e+00> : vector<16x128xf32>
    %9 = tpu.matmul %8, %6, %cst_7 {dimension_numbers = #tpu.dot_dimension_numbers<[1], [0], [0], [1], [0, 0, 1, 1], [], []>} : vector<16x16xbf16>, vector<16x128xbf16>, vector<16x128xf32> -> vector<16x128xf32>
    %10 = arith.addf %5, %9 : vector<16x128xf32>
    %11 = vector.extract_strided_slice %1 {offsets = [0, 32], sizes = [16, 128], strides = [1, 1]} : vector<16x160xbf16> to vector<16x128xbf16>
    %c2 = arith.constant 2 : index
    %c0_8 = arith.constant 0 : index
    %c0_9 = arith.constant 0 : index
    %12 = vector.load %arg2[%c2, %c0_8, %c0_9] : memref<3x16x16xbf16, #tpu.memory_space<vmem>>, vector<1x16x16xbf16>
    %13 = vector.shape_cast %12 : vector<1x16x16xbf16> to vector<16x16xbf16>
    %cst_10 = arith.constant dense<0.000000e+00> : vector<16x128xf32>
    %14 = tpu.matmul %13, %11, %cst_10 {dimension_numbers = #tpu.dot_dimension_numbers<[1], [0], [0], [1], [0, 0, 1, 1], [], []>} : vector<16x16xbf16>, vector<16x128xbf16>, vector<16x128xf32> -> vector<16x128xf32>
    %15 = arith.addf %10, %14 : vector<16x128xf32>
    %16 = vector.extract_strided_slice %1 {offsets = [0, 16], sizes = [16, 128], strides = [1, 1]} : vector<16x160xbf16> to vector<16x128xbf16>
    %17 = arith.extf %16 : vector<16x128xbf16> to vector<16x128xf32>
    %cst_11 = arith.constant 1.000000e+00 : f32
    %18 = vector.broadcast %cst_11 : f32 to vector<16x128xf32>
    %19 = arith.mulf %17, %18 : vector<16x128xf32>
    %c0_12 = arith.constant 0 : index
    %c0_13 = arith.constant 0 : index
    %20 = vector.load %arg3[%c0_12, %c0_13] : memref<16x1xf32, #tpu.memory_space<vmem>>, vector<16x1xf32>
    %21 = vector.broadcast %20 : vector<16x1xf32> to vector<16x128xf32>
    %22 = arith.addf %15, %21 : vector<16x128xf32>
    %23 = arith.addf %22, %19 : vector<16x128xf32>
    %cst_14 = arith.constant 0.000000e+00 : f32
    %24 = vector.broadcast %cst_14 : f32 to vector<16x128xf32>
    %25 = arith.maximumf %23, %24 : vector<16x128xf32>
    %26 = arith.truncf %25 : vector<16x128xf32> to vector<16x128xbf16>
    %c0_15 = arith.constant 0 : index
    %c0_16 = arith.constant 0 : index
    %c0_17 = arith.constant 0 : index
    %27 = vector.load %arg4[%c0_15, %c0_16, %c0_17] : memref<1x16x128xbf16, #tpu.memory_space<vmem>>, vector<1x16x128xbf16>
    %28 = vector.shape_cast %27 : vector<1x16x128xbf16> to vector<16x128xbf16>
    %29 = vector.shape_cast %26 : vector<16x128xbf16> to vector<1x16x128xbf16>
    tpu.vector_store %arg4[%c0_15, %c0_16, %c0_17], %29 {strides = array<i32>} : memref<1x16x128xbf16, #tpu.memory_space<vmem>>, vector<1x16x128xbf16>,
    return
  }
  func.func @transform_0(%arg0: i32) -> (i32, i32, i32) {
    %c0_i32 = arith.constant 0 : i32
    %c0_i32_0 = arith.constant 0 : i32
    %c0_i32_1 = arith.constant 0 : i32
    return %arg0, %c0_i32, %c0_i32_0 : i32, i32, i32
  }
  func.func @transform_1(%arg0: i32) -> (i32, i32, i32) {
    %c0_i32 = arith.constant 0 : i32
    %c0_i32_0 = arith.constant 0 : i32
    %c0_i32_1 = arith.constant 0 : i32
    %c0_i32_2 = arith.constant 0 : i32
    return %c0_i32, %c0_i32_0, %c0_i32_1 : i32, i32, i32
  }
  func.func @transform_2(%arg0: i32) -> (i32, i32) {
    %c0_i32 = arith.constant 0 : i32
    %c0_i32_0 = arith.constant 0 : i32
    %c0_i32_1 = arith.constant 0 : i32
    return %c0_i32, %c0_i32_0 : i32, i32
  }
  func.func @transform_3(%arg0: i32) -> (i32, i32, i32) {
    %c0_i32 = arith.constant 0 : i32
    %c0_i32_0 = arith.constant 0 : i32
    %c0_i32_1 = arith.constant 0 : i32
    return %arg0, %c0_i32, %c0_i32_0 : i32, i32, i32
  }
}

module attributes {stable_mosaic.version = 11 : i64} {
  func.func @_attention_kernel(%arg0: i32, %arg1: memref<1x16x8x16xbf16, #tpu.memory_space<vmem>>, %arg2: memref<8x16xf32, #tpu.memory_space<vmem>>, %arg3: memref<8x1xf32, #tpu.memory_space<vmem>>, %arg4: memref<16x8xf32, #tpu.memory_space<vmem>>, %arg5: memref<16x1xf32, #tpu.memory_space<vmem>>, %arg6: memref<16x8xf32, #tpu.memory_space<vmem>>, %arg7: memref<16x1xf32, #tpu.memory_space<vmem>>, %arg8: memref<16x1xf32, #tpu.memory_space<vmem>>, %arg9: memref<16x1xf32, #tpu.memory_space<vmem>>, %arg10: memref<1x16x8x16xbf16, #tpu.memory_space<vmem>>) attributes {dimension_semantics = [#tpu.dimension_semantics<parallel>], iteration_bounds = array<i64: 2>, scalar_prefetch = 0 : i64, scratch_operands = 0 : i64, tpu.core_type = #tpu.core_type<tc>, window_params = [{transform_indices = @transform_0, window_bounds = array<i64: 1, 16, 8, 16>}, {pipeline_mode = #tpu.pipeline_mode<synchronous>, transform_indices = @transform_1, window_bounds = array<i64: 8, 16>}, {pipeline_mode = #tpu.pipeline_mode<synchronous>, transform_indices = @transform_2, window_bounds = array<i64: 8, 1>}, {pipeline_mode = #tpu.pipeline_mode<synchronous>, transform_indices = @transform_3, window_bounds = array<i64: 16, 8>}, {pipeline_mode = #tpu.pipeline_mode<synchronous>, transform_indices = @transform_4, window_bounds = array<i64: 16, 1>}, {pipeline_mode = #tpu.pipeline_mode<synchronous>, transform_indices = @transform_5, window_bounds = array<i64: 16, 8>}, {pipeline_mode = #tpu.pipeline_mode<synchronous>, transform_indices = @transform_6, window_bounds = array<i64: 16, 1>}, {pipeline_mode = #tpu.pipeline_mode<synchronous>, transform_indices = @transform_7, window_bounds = array<i64: 16, 1>}, {pipeline_mode = #tpu.pipeline_mode<synchronous>, transform_indices = @transform_8, window_bounds = array<i64: 16, 1>}, {transform_indices = @transform_9, window_bounds = array<i64: 1, 16, 8, 16>}]} {
    %c0 = arith.constant 0 : index
    %c0_0 = arith.constant 0 : index
    %c0_1 = arith.constant 0 : index
    %c0_2 = arith.constant 0 : index
    %0 = vector.load %arg1[%c0, %c0_0, %c0_1, %c0_2] : memref<1x16x8x16xbf16, #tpu.memory_space<vmem>>, vector<1x16x8x16xbf16>
    %1 = vector.shape_cast %0 : vector<1x16x8x16xbf16> to vector<16x8x16xbf16>
    %2 = arith.extf %1 : vector<16x8x16xbf16> to vector<16x8x16xf32>
    %cst = arith.constant dense<0.000000e+00> : vector<16x8xf32>
    %3 = vector.multi_reduction <add>, %2, %cst [2] : vector<16x8x16xf32> to vector<16x8xf32>
    %cst_3 = arith.constant 1.600000e+01 : f32
    %4 = vector.broadcast %cst_3 : f32 to vector<16x8xf32>
    %5 = arith.divf %3, %4 : vector<16x8xf32>
    %cst_4 = arith.constant dense<0.000000e+00> : vector<16x16xf32>
    %6 = vector.multi_reduction <add>, %2, %cst_4 [1] : vector<16x8x16xf32> to vector<16x16xf32>
    %cst_5 = arith.constant 8.000000e+00 : f32
    %7 = vector.broadcast %cst_5 : f32 to vector<16x16xf32>
    %8 = arith.divf %6, %7 : vector<16x16xf32>
    %c0_6 = arith.constant 0 : index
    %c0_7 = arith.constant 0 : index
    %9 = vector.load %arg2[%c0_6, %c0_7] : memref<8x16xf32, #tpu.memory_space<vmem>>, vector<8x16xf32>
    %cst_8 = arith.constant dense<0.000000e+00> : vector<8x8xf32>
    %10 = tpu.matmul %9, %5, %cst_8 {dimension_numbers = #tpu.dot_dimension_numbers<[1], [0], [0], [1], [0, 0, 1, 1], [], []>} : vector<8x16xf32>, vector<16x8xf32>, vector<8x8xf32> -> vector<8x8xf32>
    %c0_9 = arith.constant 0 : index
    %c0_10 = arith.constant 0 : index
    %11 = vector.load %arg3[%c0_9, %c0_10] : memref<8x1xf32, #tpu.memory_space<vmem>>, vector<8x1xf32>
    %12 = vector.broadcast %11 : vector<8x1xf32> to vector<8x8xf32>
    %13 = arith.addf %10, %12 : vector<8x8xf32>
    %cst_11 = arith.constant 3.000000e+00 : f32
    %14 = vector.broadcast %cst_11 : f32 to vector<8x8xf32>
    %15 = arith.addf %13, %14 : vector<8x8xf32>
    %cst_12 = arith.constant 0.000000e+00 : f32
    %cst_13 = arith.constant 6.000000e+00 : f32
    %16 = vector.broadcast %cst_12 : f32 to vector<8x8xf32>
    %17 = arith.maximumf %16, %15 : vector<8x8xf32>
    %18 = vector.broadcast %cst_13 : f32 to vector<8x8xf32>
    %19 = arith.minimumf %18, %17 : vector<8x8xf32>
    %20 = arith.mulf %13, %19 : vector<8x8xf32>
    %cst_14 = arith.constant 0.166666672 : f32
    %21 = vector.broadcast %cst_14 : f32 to vector<8x8xf32>
    %22 = arith.mulf %20, %21 : vector<8x8xf32>
    %cst_15 = arith.constant dense<0.000000e+00> : vector<8x16xf32>
    %23 = tpu.matmul %9, %8, %cst_15 {dimension_numbers = #tpu.dot_dimension_numbers<[1], [0], [0], [1], [0, 0, 1, 1], [], []>} : vector<8x16xf32>, vector<16x16xf32>, vector<8x16xf32> -> vector<8x16xf32>
    %c0_16 = arith.constant 0 : index
    %c0_17 = arith.constant 0 : index
    %24 = vector.load %arg3[%c0_16, %c0_17] : memref<8x1xf32, #tpu.memory_space<vmem>>, vector<8x1xf32>
    %25 = vector.broadcast %24 : vector<8x1xf32> to vector<8x16xf32>
    %26 = arith.addf %23, %25 : vector<8x16xf32>
    %cst_18 = arith.constant 3.000000e+00 : f32
    %27 = vector.broadcast %cst_18 : f32 to vector<8x16xf32>
    %28 = arith.addf %26, %27 : vector<8x16xf32>
    %cst_19 = arith.constant 0.000000e+00 : f32
    %cst_20 = arith.constant 6.000000e+00 : f32
    %29 = vector.broadcast %cst_19 : f32 to vector<8x16xf32>
    %30 = arith.maximumf %29, %28 : vector<8x16xf32>
    %31 = vector.broadcast %cst_20 : f32 to vector<8x16xf32>
    %32 = arith.minimumf %31, %30 : vector<8x16xf32>
    %33 = arith.mulf %26, %32 : vector<8x16xf32>
    %cst_21 = arith.constant 0.166666672 : f32
    %34 = vector.broadcast %cst_21 : f32 to vector<8x16xf32>
    %35 = arith.mulf %33, %34 : vector<8x16xf32>
    %c0_22 = arith.constant 0 : index
    %c0_23 = arith.constant 0 : index
    %36 = vector.load %arg4[%c0_22, %c0_23] : memref<16x8xf32, #tpu.memory_space<vmem>>, vector<16x8xf32>
    %cst_24 = arith.constant dense<0.000000e+00> : vector<16x8xf32>
    %37 = tpu.matmul %36, %22, %cst_24 {dimension_numbers = #tpu.dot_dimension_numbers<[1], [0], [0], [1], [0, 0, 1, 1], [], []>} : vector<16x8xf32>, vector<8x8xf32>, vector<16x8xf32> -> vector<16x8xf32>
    %c0_25 = arith.constant 0 : index
    %c0_26 = arith.constant 0 : index
    %38 = vector.load %arg5[%c0_25, %c0_26] : memref<16x1xf32, #tpu.memory_space<vmem>>, vector<16x1xf32>
    %39 = vector.broadcast %38 : vector<16x1xf32> to vector<16x8xf32>
    %40 = arith.addf %37, %39 : vector<16x8xf32>
    %41 = arith.negf %40 : vector<16x8xf32>
    %42 = math.exp %41 : vector<16x8xf32>
    %cst_27 = arith.constant 1.000000e+00 : f32
    %43 = vector.broadcast %cst_27 : f32 to vector<16x8xf32>
    %44 = arith.addf %43, %42 : vector<16x8xf32>
    %45 = arith.divf %43, %44 : vector<16x8xf32>
    %c0_28 = arith.constant 0 : index
    %c0_29 = arith.constant 0 : index
    %46 = vector.load %arg6[%c0_28, %c0_29] : memref<16x8xf32, #tpu.memory_space<vmem>>, vector<16x8xf32>
    %cst_30 = arith.constant dense<0.000000e+00> : vector<16x16xf32>
    %47 = tpu.matmul %46, %35, %cst_30 {dimension_numbers = #tpu.dot_dimension_numbers<[1], [0], [0], [1], [0, 0, 1, 1], [], []>} : vector<16x8xf32>, vector<8x16xf32>, vector<16x16xf32> -> vector<16x16xf32>
    %c0_31 = arith.constant 0 : index
    %c0_32 = arith.constant 0 : index
    %48 = vector.load %arg7[%c0_31, %c0_32] : memref<16x1xf32, #tpu.memory_space<vmem>>, vector<16x1xf32>
    %49 = vector.broadcast %48 : vector<16x1xf32> to vector<16x16xf32>
    %50 = arith.addf %47, %49 : vector<16x16xf32>
    %51 = arith.negf %50 : vector<16x16xf32>
    %52 = math.exp %51 : vector<16x16xf32>
    %cst_33 = arith.constant 1.000000e+00 : f32
    %53 = vector.broadcast %cst_33 : f32 to vector<16x16xf32>
    %54 = arith.addf %53, %52 : vector<16x16xf32>
    %55 = arith.divf %53, %54 : vector<16x16xf32>
    %56 = vector.shape_cast %45 : vector<16x8xf32> to vector<16x8x1xf32>
    %57 = vector.broadcast %56 : vector<16x8x1xf32> to vector<16x8x16xf32>
    %58 = arith.mulf %2, %57 : vector<16x8x16xf32>
    %59 = vector.shape_cast %55 : vector<16x16xf32> to vector<16x1x16xf32>
    %60 = vector.broadcast %59 : vector<16x1x16xf32> to vector<16x8x16xf32>
    %61 = arith.mulf %58, %60 : vector<16x8x16xf32>
    %c0_34 = arith.constant 0 : index
    %c0_35 = arith.constant 0 : index
    %62 = vector.load %arg8[%c0_34, %c0_35] : memref<16x1xf32, #tpu.memory_space<vmem>>, vector<16x1xf32>
    %63 = vector.shape_cast %62 : vector<16x1xf32> to vector<16x1x1xf32>
    %64 = vector.broadcast %63 : vector<16x1x1xf32> to vector<16x8x16xf32>
    %65 = arith.mulf %64, %61 : vector<16x8x16xf32>
    %c0_36 = arith.constant 0 : index
    %c0_37 = arith.constant 0 : index
    %66 = vector.load %arg9[%c0_36, %c0_37] : memref<16x1xf32, #tpu.memory_space<vmem>>, vector<16x1xf32>
    %67 = vector.shape_cast %66 : vector<16x1xf32> to vector<16x1x1xf32>
    %68 = vector.broadcast %67 : vector<16x1x1xf32> to vector<16x8x16xf32>
    %69 = arith.addf %65, %68 : vector<16x8x16xf32>
    %70 = arith.addf %69, %2 : vector<16x8x16xf32>
    %cst_38 = arith.constant 0.000000e+00 : f32
    %71 = vector.broadcast %cst_38 : f32 to vector<16x8x16xf32>
    %72 = arith.maximumf %70, %71 : vector<16x8x16xf32>
    %73 = arith.truncf %72 : vector<16x8x16xf32> to vector<16x8x16xbf16>
    %c0_39 = arith.constant 0 : index
    %c0_40 = arith.constant 0 : index
    %c0_41 = arith.constant 0 : index
    %c0_42 = arith.constant 0 : index
    %74 = vector.load %arg10[%c0_39, %c0_40, %c0_41, %c0_42] : memref<1x16x8x16xbf16, #tpu.memory_space<vmem>>, vector<1x16x8x16xbf16>
    %75 = vector.shape_cast %74 : vector<1x16x8x16xbf16> to vector<16x8x16xbf16>
    %76 = vector.shape_cast %73 : vector<16x8x16xbf16> to vector<1x16x8x16xbf16>
    tpu.vector_store %arg10[%c0_39, %c0_40, %c0_41, %c0_42], %76 {strides = array<i32>} : memref<1x16x8x16xbf16, #tpu.memory_space<vmem>>, vector<1x16x8x16xbf16>,
    return
  }
  func.func @transform_0(%arg0: i32) -> (i32, i32, i32, i32) {
    %c0_i32 = arith.constant 0 : i32
    %c0_i32_0 = arith.constant 0 : i32
    %c0_i32_1 = arith.constant 0 : i32
    %c0_i32_2 = arith.constant 0 : i32
    return %arg0, %c0_i32, %c0_i32_0, %c0_i32_1 : i32, i32, i32, i32
  }
  func.func @transform_1(%arg0: i32) -> (i32, i32) {
    %c0_i32 = arith.constant 0 : i32
    %c0_i32_0 = arith.constant 0 : i32
    %c0_i32_1 = arith.constant 0 : i32
    return %c0_i32, %c0_i32_0 : i32, i32
  }
  func.func @transform_2(%arg0: i32) -> (i32, i32) {
    %c0_i32 = arith.constant 0 : i32
    %c0_i32_0 = arith.constant 0 : i32
    %c0_i32_1 = arith.constant 0 : i32
    return %c0_i32, %c0_i32_0 : i32, i32
  }
  func.func @transform_3(%arg0: i32) -> (i32, i32) {
    %c0_i32 = arith.constant 0 : i32
    %c0_i32_0 = arith.constant 0 : i32
    %c0_i32_1 = arith.constant 0 : i32
    return %c0_i32, %c0_i32_0 : i32, i32
  }
  func.func @transform_4(%arg0: i32) -> (i32, i32) {
    %c0_i32 = arith.constant 0 : i32
    %c0_i32_0 = arith.constant 0 : i32
    %c0_i32_1 = arith.constant 0 : i32
    return %c0_i32, %c0_i32_0 : i32, i32
  }
  func.func @transform_5(%arg0: i32) -> (i32, i32) {
    %c0_i32 = arith.constant 0 : i32
    %c0_i32_0 = arith.constant 0 : i32
    %c0_i32_1 = arith.constant 0 : i32
    return %c0_i32, %c0_i32_0 : i32, i32
  }
  func.func @transform_6(%arg0: i32) -> (i32, i32) {
    %c0_i32 = arith.constant 0 : i32
    %c0_i32_0 = arith.constant 0 : i32
    %c0_i32_1 = arith.constant 0 : i32
    return %c0_i32, %c0_i32_0 : i32, i32
  }
  func.func @transform_7(%arg0: i32) -> (i32, i32) {
    %c0_i32 = arith.constant 0 : i32
    %c0_i32_0 = arith.constant 0 : i32
    %c0_i32_1 = arith.constant 0 : i32
    return %c0_i32, %c0_i32_0 : i32, i32
  }
  func.func @transform_8(%arg0: i32) -> (i32, i32) {
    %c0_i32 = arith.constant 0 : i32
    %c0_i32_0 = arith.constant 0 : i32
    %c0_i32_1 = arith.constant 0 : i32
    return %c0_i32, %c0_i32_0 : i32, i32
  }
  func.func @transform_9(%arg0: i32) -> (i32, i32, i32, i32) {
    %c0_i32 = arith.constant 0 : i32
    %c0_i32_0 = arith.constant 0 : i32
    %c0_i32_1 = arith.constant 0 : i32
    %c0_i32_2 = arith.constant 0 : i32
    return %arg0, %c0_i32, %c0_i32_0, %c0_i32_1 : i32, i32, i32, i32
  }
}

module attributes {stable_mosaic.version = 11 : i64} {
  func.func @_classifier_kernel(%arg0: memref<2x16x128xbf16, #tpu.memory_space<vmem>>, %arg1: memref<16x32xf32, #tpu.memory_space<vmem>>, %arg2: memref<1x32xf32, #tpu.memory_space<vmem>>, %arg3: memref<2x32xf32, #tpu.memory_space<vmem>>) attributes {dimension_semantics = [], scalar_prefetch = 0 : i64, scratch_operands = 0 : i64, tpu.core_type = #tpu.core_type<tc>} {
    %c0 = arith.constant 0 : index
    %c0_0 = arith.constant 0 : index
    %c0_1 = arith.constant 0 : index
    %0 = vector.load %arg0[%c0, %c0_0, %c0_1] : memref<2x16x128xbf16, #tpu.memory_space<vmem>>, vector<2x16x128xbf16>
    %1 = arith.extf %0 : vector<2x16x128xbf16> to vector<2x16x128xf32>
    %cst = arith.constant dense<0.000000e+00> : vector<2x16xf32>
    %2 = vector.multi_reduction <add>, %1, %cst [2] : vector<2x16x128xf32> to vector<2x16xf32>
    %cst_2 = arith.constant 1.280000e+02 : f32
    %3 = vector.broadcast %cst_2 : f32 to vector<2x16xf32>
    %4 = arith.divf %2, %3 : vector<2x16xf32>
    %c0_3 = arith.constant 0 : index
    %c0_4 = arith.constant 0 : index
    %5 = vector.load %arg1[%c0_3, %c0_4] : memref<16x32xf32, #tpu.memory_space<vmem>>, vector<16x32xf32>
    %cst_5 = arith.constant dense<0.000000e+00> : vector<2x32xf32>
    %6 = tpu.matmul %4, %5, %cst_5 {dimension_numbers = #tpu.dot_dimension_numbers<[1], [0], [0], [1], [0, 0, 1, 1], [], []>} : vector<2x16xf32>, vector<16x32xf32>, vector<2x32xf32> -> vector<2x32xf32>
    %c0_6 = arith.constant 0 : index
    %c0_7 = arith.constant 0 : index
    %7 = vector.load %arg2[%c0_6, %c0_7] : memref<1x32xf32, #tpu.memory_space<vmem>>, vector<1x32xf32>
    %8 = vector.broadcast %7 : vector<1x32xf32> to vector<2x32xf32>
    %9 = arith.addf %6, %8 : vector<2x32xf32>
    %c0_8 = arith.constant 0 : index
    %c0_9 = arith.constant 0 : index
    %10 = vector.load %arg3[%c0_8, %c0_9] : memref<2x32xf32, #tpu.memory_space<vmem>>, vector<2x32xf32>
    tpu.vector_store %arg3[%c0_8, %c0_9], %9 {strides = array<i32>} : memref<2x32xf32, #tpu.memory_space<vmem>>, vector<2x32xf32>,
    return
  }
}

</mosaic_0001>

<bundles_post_ra>
// kernel: efficient_gcn_forward.9
= control target key start
LH: loop header
LB: loop body
LE: loop exit
PB: predicated region body
PF: predicated region fallthrough
CT: control target
= control target key end

     0   :  { %s528_s12 = smov 0   ;;  %s574_s0 = inlined_call_operand.vmem [shape: bf16[2,8,288], index: 0, kind: input, shape index: {}]   ;;  %s575_s1 = inlined_call_operand.vmem [shape: bf16[3,8,8], index: 1, kind: input, shape index: {}]   ;;  %s576_s2 = inlined_call_operand.vmem [shape: f32[8,1], index: 2, kind: input, shape index: {}]   ;;  %s577_s3 = inlined_call_operand.vmem [shape: bf16[2,8,256], index: 3, kind: output, shape index: {}]  }
   0x1 LB: > { %s452_s13 = sadd.s32 4294967295, %s503_s12   ;;  %p456_p0 = scmp.ge.s32.totalorder %s503_s12, 1  ;;  %s503_s12 = sphi %s528_s12, %s13_s12  }
   0x2   : > { %p137_p1 = scmp.lt.s32.totalorder %s503_s12, 3 }
   0x4   : > { %p138_p2 = pnand %p456_p0, %p137_p1 }
   0x5   : > { %p161_p3 = scmp.lt.s32.totalorder (!%p138_p2), %s452_s13, 1  ;;  %v505_v0 = vmov (!%p138_p2), 0   ;;  %vm198_vm0 = vcmask (!%p138_p2), 1043456   ;;  %s506_s18 = smov (!%p138_p2), 112   ;;  %vm194_vm1 = vcmask (!%p138_p2), 64512   ;;  %v362_v11 = vld [vmem:[%s576_s2] sm:$0xff] (!%p138_p2) }
   0x6   : > { %141 = sbr.rel (%p138_p2) target bundleno = 376 (0x178), region = 32  ;;  %237 = vmatprep.mubr.bf16.mxu0 (!%p138_p2), %v505_v0  ;;  %287 = vmatprep.mubr.bf16.mxu1 (!%p138_p2), %v505_v0  ;;  %v174_v7 = vld [vmem:[%s575_s1] sm:$0xf] (!%p138_p2)  ;;  %s507_s21 = smov (!%p138_p2), 96   ;;  %vm191_vm2 = vcmask (!%p138_p2), 916480   ;;  %vm304_vm3 = vcmask (!%p138_p2), 785408  }
   0x7   : > { %488 = vset.pattern.permute.xlu0 (!%p138_p2), %v505_v0  ;;  %v460_v20 = vld [vmem:[%s575_s1 + $0x4] sm:$0xf] (!%p138_p2)  ;;  %v468_v26 = vld [vmem:[%s575_s1 + $0x8] sm:$0xf] (!%p138_p2) }
   0xd   : > { %s579_s13 = smov (!%p161_p3, %s452_s13), 1 }
   0xe   : > { %s476_s14 = smul.u32 12, %s579_s13  ;;  %s474_s28 = sshll.u32 %s579_s13, 3 }
   0xf   : > { %s170_s4 = scalar_lea.vmem %s577_s3, %s474_s28 }
  0x10   : > { %s165_s17 = scalar_lea.vmem %s574_s0, %s476_s14 }
  0x11   : > { %v173_v1 = vld [vmem:[%s165_s17 + $0x8] sm:$0xf]  ;;  %v172_v2 = vld [vmem:[%s165_s17] sm:$0xff] }
  0x12   : > { %v463_v3 = vcombine.low %v173_v1, %v173_v1  ;;  %v461_v4 = vcombine.low %v172_v2, %v172_v2  ;;  %v462_v5 = vcombine.high %v172_v2, %v172_v2  ;;  %v359_v8 = vunpack.c.l.bf16 %v172_v2 }
  0x13   : > { %v360_v9 = vunpack.c.h.bf16 %v172_v2  ;;  %v361_v12 = vunpack.c.l.bf16 %v173_v1 }
  0x14   : > { %189 = vrot.lane.b32.xlu1 %v463_v3, %s506_s18  ;;  %185 = vrot.lane.b32.xlu0 %v461_v4, %s506_s18  ;;  %v250_v6 = vsel %vm198_vm0, %v461_v4, 0 }
  0x15   : > { %466 = vmatprep.subr.msk.bf16.mxu1 %vm198_vm0, %v462_v5  ;;  %v489_v10 = vpack.i.bf16 %v360_v9, %v359_v8 }
  0x16   : > { %256 = vmatpush1.bf16.msra.mxu1 %v250_v6 }
  0x18   : > { %298 = vrot.lane.b32.xlu1 %v461_v4, %s507_s21  ;;  %187 = vrot.lane.b32.xlu0 %v462_v5, %s506_s18 }
  0x19   : > { %467 = vmatmul.mubr.msk.bf16.vlgmr.msra.gmra.mrb[0].mxu1 %vm194_vm1, %v174_v7 }
  0x1c   : > { %302 = vrot.lane.b32.xlu1 %v463_v3, %s507_s21  ;;  %300 = vrot.lane.b32.xlu0 %v462_v5, %s507_s21 }
  0x20   : > { %365 = vperm.xlu0 %488, %v362_v11   ;;  %490 = vrot.lane.b32.xlu1 %v489_v10, %s506_s18 }
  0x24   : > { %377 = vrot.lane.b32.xlu1 %v361_v12, %s506_s18 }
  0x86   : > { %v190_v13 = vpop.permute.xlu1 %189  ;;  %v186_v14 = vpop.permute.xlu0 %185 }
  0x8a   : > { %v299_v15 = vpop.permute.xlu1 %298  ;;  %v188_v16 = vpop.permute.xlu0 %187 }
  0x8b   : > { %v193_v17 = vsel %vm191_vm2, %v188_v16, %v190_v13  ;;  %v192_v18 = vsel %vm191_vm2, %v186_v14, %v188_v16 }
  0x8c   : > { %464 = vmatprep.subr.msk.bf16.mxu0 %vm198_vm0, %v193_v17  ;;  %v200_v19 = vsel %vm198_vm0, %v192_v18, 0 }
  0x8d   : > { %206 = vmatpush1.bf16.msra.mxu0 %v200_v19 }
  0x8e   : > { %v303_v21 = vpop.permute.xlu1 %302  ;;  %v301_v22 = vpop.permute.xlu0 %300 }
  0x8f   : > { %v305_v23 = vsel %vm304_vm3, %v299_v15, %v301_v22  ;;  %v306_v24 = vsel %vm304_vm3, %v301_v22, %v303_v21 }
  0x90   : > { %v311_v25 = vsel %vm198_vm0, %v305_v23, 0  ;;  %465 = vmatmul.mubr.msk.bf16.vlgmr.msra.gmra.mrb[0].mxu0 %vm194_vm1, %v460_v20  ;;  %469 = vmatprep.subr.msk.bf16.mxu0 %vm198_vm0, %v306_v24 }
  0x91   : > { %317 = vmatpush1.bf16.msra.mxu0 %v311_v25  ;;  %348 = vmatprep.mubr.bf16.mxu0 %v505_v0 }
  0x92   : > { %v491_v37 = vpop.permute.xlu1 %490 }
  0x93   : > { %v493_v38 = vunpack.i.h.bf16 %v491_v37  ;;  %v492_v39 = vunpack.i.l.bf16 %v491_v37 }
  0x95   : > { %v380_v46 = vsel %vm191_vm2, %v492_v39, %v493_v38 }
  0x96   : > { %v378_v47 = vpop.permute.xlu1 %377 }
  0x97   : > { %v381_v52 = vsel %vm191_vm2, %v493_v38, %v378_v47 }
  0x98   : > { %470 = vmatmul.mubr.msk.bf16.vlgmr.msra.gmra.mrb[4].mxu0 %vm194_vm1, %v468_v26 }
  0x9f   : > { %v366_v41 = vpop.permute.xlu0 %365 }
  0xec   : > { %v289_v27 = vpop.f32.mrb[0].mxu1 }
  0xed   : > { %v291_v28 = vpop.f32.mrb[1].mxu1 }
  0xee   : > { %v293_v29 = vpop.f32.mrb[2].mxu1 }
  0xef   : > { %v294_v30 = vpop.f32.mrb[3].mxu1 }
 0x163   : > { %v239_v31 = vpop.f32.mrb[0].mxu0 }
 0x164   : > { %v290_v32 = vadd.f32 %v289_v27, %v239_v31  ;;  %v241_v33 = vpop.f32.mrb[1].mxu0 }
 0x165   : > { %v292_v34 = vadd.f32 %v291_v28, %v241_v33  ;;  %v243_v35 = vpop.f32.mrb[2].mxu0 }
 0x166   : > { %v244_v36 = vpop.f32.mrb[3].mxu0 }
 0x16b   : > { %v350_v40 = vpop.f32.mrb[4].mxu0 }
 0x16c   : > { %v357_v42 = vadd.f32 %v350_v40, %v290_v32  ;;  %v352_v43 = vpop.f32.mrb[5].mxu0 }
 0x16d   : > { %v358_v44 = vadd.f32 %v352_v43, %v292_v34  ;;  %v354_v45 = vpop.f32.mrb[6].mxu0 }
 0x16e   : > { %v368_v48 = vadd.f32 %v366_v41, %v357_v42  ;;  %v355_v49 = vpop.f32.mrb[7].mxu0 }
 0x16f   : > { %v369_v50 = vadd.f32 %v366_v41, %v358_v44 }
 0x170   : > { %v384_v51 = vadd.f32 %v380_v46, %v368_v48 }
 0x171   : > { %v385_v53 = vadd.f32 %v381_v52, %v369_v50 }
 0x172   : > { %v386_v54 = vmax.f32 %v384_v51, 0.0 }
 0x173   : > { %v387_v55 = vmax.f32 %v385_v53, 0.0 }
 0x175   : > { %v475_v56 = vpack.c.bf16 %v387_v55, %v386_v54 }
 0x177   : > { %396 = vst [vmem:[%s170_s4] sm:$0xff] %v475_v56 }
 0x178 PF: > { %s13_s12 = sadd.s32 1, %s503_s12  }
 0x179   : > { %p10_p4 = scmp.ge.s32.totalorder %s13_s12, 4  }
 0x17b   :  { %12 = sbr.rel (!%p10_p4) target bundleno = 1 (0x1), region = 64 }

// kernel: efficient_gcn_forward.8
= control target key start
LH: loop header
LB: loop body
LE: loop exit
PB: predicated region body
PF: predicated region fallthrough
CT: control target
= control target key end

     0   :  { %s882_s12 = smov 0   ;;  %s884_s13 = smov 0   ;;  %s1042_s0 = inlined_call_operand.vmem [shape: bf16[2,64,16], index: 0, kind: input, shape index: {}]   ;;  %s1043_s1 = inlined_call_operand.vmem [shape: bf16[128,64], index: 1, kind: input, shape index: {}]   ;;  %s1044_s2 = inlined_call_operand.vmem [shape: f32[128,1], index: 2, kind: input, shape index: {}]   ;;  %s1045_s3 = inlined_call_operand.vmem [shape: bf16[2,128,16], index: 3, kind: output, shape index: {}]  }
   0x1   :  { %s886_s14 = smov 0  }
   0x2 LB: > { %s25_s15 = sadd.s32 1, %s855_s13  ;;  %p693_p0 = scmp.ge.s32.totalorder %s859_s14, 1  ;;  %s859_s14 = sphi %s886_s14, %s13_s14   ;;  %s855_s13 = sphi %s884_s13, %s1047_s13   ;;  %s851_s12 = sphi %s882_s12, %s1046_s12  }
   0x3   : > { %p27_p1 = scmp.ge.s32.totalorder %s25_s15, 2  ;;  %p156_p2 = scmp.lt.s32.totalorder %s859_s14, 3 }
   0x5   : > { %s1049_s15 = smov (%p27_p1, %s25_s15), 0  ;;  %p157_p3 = pnand %p693_p0, %p156_p2 }
   0x6   : > { %p186_p4 = scmp.lt.s32.totalorder (!%p157_p3), %s851_s12, 1  ;;  %v829_v0 = vld [vmem:[%s1043_s1] sm:$0xff] (!%p157_p3)   ;;  %vm387_vm0 = vcmask (!%p157_p3), 523264   ;;  %v861_v2 = vmov (!%p157_p3), 0   ;;  %v229_v6 = vld [vmem:[%s1044_s2 + $0x10] sm:$0xff] (!%p157_p3)  ;;  %v230_v9 = vld [vmem:[%s1044_s2 + $0x18] sm:$0xff] (!%p157_p3) }
   0x7   : > { %160 = sbr.rel (%p157_p3) target bundleno = 264 (0x108), region = 32  ;;  %v830_v1 = vld [vmem:[%s1043_s1 + $0x20] sm:$0xff] (!%p157_p3)   ;;  %774 = vmatprep.mubr.msk.bf16.mxu0 (!%p157_p3), %vm387_vm0, %v829_v0  ;;  %824 = vset.pattern.permute.xlu1 (!%p157_p3), %v861_v2  ;;  %v228_v10 = vld [vmem:[%s1044_s2 + $0x8] sm:$0xff] (!%p157_p3)  ;;  %v833_v15 = vld [vmem:[%s1043_s1 + $0x10] sm:$0xff] (!%p157_p3)   ;;  %vm589_vm1 = vcmask (!%p157_p3), 125952  }
   0x8   : > { %782 = vmatprep.mubr.msk.bf16.mxu1 (!%p157_p3), %vm387_vm0, %v830_v1  ;;  %823 = vset.pattern.permute.xlu0 (!%p157_p3), %v861_v2  ;;  %v227_v7 = vld [vmem:[%s1044_s2] sm:$0xff] (!%p157_p3)  ;;  %v831_v11 = vld [vmem:[%s1043_s1 + $0x8] sm:$0xff] (!%p157_p3)   ;;  %v834_v16 = vld [vmem:[%s1043_s1 + $0x30] sm:$0xff] (!%p157_p3)  }
   0x9   : > { %255 = vperm.xlu1 (!%p157_p3), %824, %v229_v6   ;;  %245 = vperm.xlu0 (!%p157_p3), %823, %v227_v7   ;;  %v832_v12 = vld [vmem:[%s1043_s1 + $0x28] sm:$0xff] (!%p157_p3)   ;;  %v231_v14 = vld [vmem:[%s1044_s2 + $0x20] sm:$0xff] (!%p157_p3)  ;;  %v234_v17 = vld [vmem:[%s1044_s2 + $0x38] sm:$0xff] (!%p157_p3) }
   0xa   : > { %v232_v13 = vld [vmem:[%s1044_s2 + $0x28] sm:$0xff] (!%p157_p3)  ;;  %v233_v18 = vld [vmem:[%s1044_s2 + $0x30] sm:$0xff] (!%p157_p3)  ;;  %v835_v19 = vld [vmem:[%s1043_s1 + $0x18] sm:$0xff] (!%p157_p3)  }
   0xb   : > { %v836_v20 = vld [vmem:[%s1043_s1 + $0x38] sm:$0xff] (!%p157_p3)   ;;  %v236_v21 = vld [vmem:[%s1044_s2 + $0x48] sm:$0xff] (!%p157_p3)  ;;  %v235_v22 = vld [vmem:[%s1044_s2 + $0x40] sm:$0xff] (!%p157_p3) }
   0xc   : > { %v238_v23 = vld [vmem:[%s1044_s2 + $0x58] sm:$0xff] (!%p157_p3)  ;;  %v237_v24 = vld [vmem:[%s1044_s2 + $0x50] sm:$0xff] (!%p157_p3)  ;;  %v240_v25 = vld [vmem:[%s1044_s2 + $0x68] sm:$0xff] (!%p157_p3) }
   0xd   : > { %260 = vperm.xlu1 (!%p157_p3), %824, %v230_v9   ;;  %250 = vperm.xlu0 (!%p157_p3), %823, %v228_v10   ;;  %v239_v26 = vld [vmem:[%s1044_s2 + $0x60] sm:$0xff] (!%p157_p3)  ;;  %v242_v27 = vld [vmem:[%s1044_s2 + $0x78] sm:$0xff] (!%p157_p3)  ;;  %v241_v28 = vld [vmem:[%s1044_s2 + $0x70] sm:$0xff] (!%p157_p3) }
   0xe   : > { %s1051_s12 = smov (!%p186_p4, %s851_s12), 1 }
   0xf   : > { %s736_s20 = sshll.u32 %s1051_s12, 5  ;;  %s737_s22 = sshll.u32 %s1051_s12, 6 }
  0x10   : > { %s193_s23 = scalar_lea.vmem %s1042_s0, %s736_s20  ;;  %s996_s25 = scalar_lea.vmem %s1045_s3, %s737_s22 }
  0x11   : > { %v825_v3 = vld [vmem:[%s193_s23] sm:$0xff]   ;;  %v826_v4 = vld [vmem:[%s193_s23 + $0x8] sm:$0xff]   ;;  %v827_v5 = vld [vmem:[%s193_s23 + $0x10] sm:$0xff]   ;;  %270 = vperm.xlu1 %824, %v232_v13   ;;  %265 = vperm.xlu0 %823, %v231_v14  }
  0x12   : > { %766 = vmatprep.subr.bf16.mxu0 %v825_v3  ;;  %790 = vmatprep.subr.bf16.mxu1 %v825_v3  ;;  %v828_v8 = vld [vmem:[%s193_s23 + $0x18] sm:$0xff]  }
  0x13   : > { %767 = vmatpush3.bf16.msra.mxu0 %v825_v3  ;;  %794 = vmatpush3.bf16.msra.mxu1 %v825_v3 }
  0x14   : > { %768 = vmatprep.subr.bf16.mxu0 %v826_v4  ;;  %791 = vmatprep.subr.bf16.mxu1 %v826_v4 }
  0x15   : > { %280 = vperm.xlu1 %824, %v234_v17   ;;  %275 = vperm.xlu0 %823, %v233_v18  }
  0x17   : > { %769 = vmatpush3.bf16.msra.mxu0 %v826_v4  ;;  %795 = vmatpush3.bf16.msra.mxu1 %v826_v4 }
  0x18   : > { %770 = vmatprep.subr.bf16.mxu0 %v827_v5  ;;  %792 = vmatprep.subr.bf16.mxu1 %v827_v5 }
  0x19   : > { %290 = vperm.xlu1 %824, %v236_v21   ;;  %285 = vperm.xlu0 %823, %v235_v22  }
  0x1b   : > { %771 = vmatpush3.bf16.msra.mxu0 %v827_v5  ;;  %796 = vmatpush3.bf16.msra.mxu1 %v827_v5 }
  0x1c   : > { %772 = vmatprep.subr.bf16.mxu0 %v828_v8  ;;  %793 = vmatprep.subr.bf16.mxu1 %v828_v8 }
  0x1d   : > { %300 = vperm.xlu1 %824, %v238_v23   ;;  %295 = vperm.xlu0 %823, %v237_v24  }
  0x1f   : > { %773 = vmatpush3.bf16.msra.mxu0 %v828_v8  ;;  %797 = vmatpush3.bf16.msra.mxu1 %v828_v8 }
  0x21   : > { %310 = vperm.xlu1 %824, %v240_v25   ;;  %305 = vperm.xlu0 %823, %v239_v26  }
  0x22   : > { %775 = vmatmul.mubr.msk.bf16.vlgmr.msra.gmra.mrb[0].mxu0 %vm387_vm0, %v831_v11  ;;  %783 = vmatmul.mubr.msk.bf16.vlgmr.msra.gmra.mrb[0].mxu1 %vm387_vm0, %v832_v12 }
  0x23   : > { %778 = vmatprep.mubr.msk.bf16.mxu0 %vm387_vm0, %v833_v15  ;;  %786 = vmatprep.mubr.msk.bf16.mxu1 %vm387_vm0, %v834_v16 }
  0x25   : > { %320 = vperm.xlu1 %824, %v242_v27   ;;  %315 = vperm.xlu0 %823, %v241_v28  }
  0x2a   : > { %779 = vmatmul.mubr.msk.bf16.gmra.mrb[4].mxu0 %vm387_vm0, %v835_v19  ;;  %787 = vmatmul.mubr.msk.bf16.gmra.mrb[4].mxu1 %vm387_vm0, %v836_v20 }
  0x88   : > { %v256_v29 = vpop.permute.xlu1 %255  ;;  %v246_v30 = vpop.permute.xlu0 %245 }
  0x8c   : > { %v261_v31 = vpop.permute.xlu1 %260  ;;  %v251_v32 = vpop.permute.xlu0 %250 }
  0x90   : > { %v986_v33 = vpop.permute.xlu1 %270  ;;  %v266_v34 = vpop.permute.xlu0 %265 }
  0x94   : > { %v988_v35 = vpop.permute.xlu1 %280  ;;  %v276_v36 = vpop.permute.xlu0 %275 }
  0x98   : > { %v291_v37 = vpop.permute.xlu1 %290  ;;  %v286_v38 = vpop.permute.xlu0 %285 }
  0x9c   : > { %v301_v39 = vpop.permute.xlu1 %300  ;;  %v296_v40 = vpop.permute.xlu0 %295 }
  0xa0   : > { %v990_v41 = vpop.permute.xlu1 %310  ;;  %v306_v42 = vpop.permute.xlu0 %305 }
  0xa4   : > { %v321_v7 = vpop.permute.xlu1 %320  ;;  %v316_v8 = vpop.permute.xlu0 %315 }
  0xf5   : > { %v776_v43 = vpop.f32.mrb[0].mxu0  ;;  %v784_v44 = vpop.f32.mrb[0].mxu1 }
  0xf6   : > { %v455_v45 = vadd.f32 %v776_v43, %v256_v29  ;;  %v487_v46 = vadd.f32 %v784_v44, %v296_v40  ;;  %v446_v47 = vpop.f32.mrb[1].mxu0  ;;  %v478_v48 = vpop.f32.mrb[1].mxu1 }
  0xf7   : > { %v447_v49 = vadd.f32 %v446_v47, %v246_v30  ;;  %v479_v50 = vadd.f32 %v478_v48, %v286_v38  ;;  %v777_v51 = vpop.f32.mrb[2].mxu0  ;;  %v785_v52 = vpop.f32.mrb[2].mxu1 }
  0xf8   : > { %v511_v53 = vmax.f32 %v455_v45, 0.0  ;;  %v519_v54 = vmax.f32 %v487_v46, 0.0  ;;  %v458_v55 = vadd.f32 %v777_v51, %v261_v31  ;;  %v490_v56 = vadd.f32 %v785_v52, %v301_v39  ;;  %v449_v57 = vpop.f32.mrb[3].mxu0  ;;  %v481_v58 = vpop.f32.mrb[3].mxu1 }
  0xf9   : > { %v509_v59 = vmax.f32 %v447_v49, 0.0  ;;  %v517_v60 = vmax.f32 %v479_v50, 0.0  ;;  %v450_v61 = vadd.f32 %v449_v57, %v251_v32  ;;  %v482_v62 = vadd.f32 %v481_v58, %v291_v37 }
  0xfa   : > { %v740_v63 = vpack.c.bf16 %v511_v53, %v511_v53  ;;  %v748_v0 = vpack.c.bf16 %v519_v54, %v519_v54  ;;  %v512_v1 = vmax.f32 %v458_v55, 0.0  ;;  %v520_v2 = vmax.f32 %v490_v56, 0.0 }
  0xfb   : > { %v738_v3 = vpack.c.bf16 %v509_v59, %v509_v59  ;;  %v746_v4 = vpack.c.bf16 %v517_v60, %v517_v60  ;;  %v510_v5 = vmax.f32 %v450_v61, 0.0  ;;  %v518_v6 = vmax.f32 %v482_v62, 0.0 }
  0xfc   : > { %592 = vst.msk [vmem:[%s996_s25 + $0x8] sm:$0xf] %vm589_vm1, %v740_v63  ;;  %600 = vst.msk [vmem:[%s996_s25 + $0x28] sm:$0xf] %vm589_vm1, %v748_v0  ;;  %v741_v9 = vpack.c.bf16 %v512_v1, %v512_v1  ;;  %v749_v10 = vpack.c.bf16 %v520_v2, %v520_v2 }
  0xfd   : > { %590 = vst.msk [vmem:[%s996_s25] sm:$0xf] %vm589_vm1, %v738_v3  ;;  %598 = vst.msk [vmem:[%s996_s25 + $0x20] sm:$0xf] %vm589_vm1, %v746_v4  ;;  %v739_v11 = vpack.c.bf16 %v510_v5, %v510_v5  ;;  %v747_v12 = vpack.c.bf16 %v518_v6, %v518_v6  ;;  %v780_v13 = vpop.f32.mrb[4].mxu0  ;;  %v788_v14 = vpop.f32.mrb[4].mxu1 }
  0xfe   : > { %593 = vst.msk [vmem:[%s996_s25 + $0xc] sm:$0xf] %vm589_vm1, %v741_v9  ;;  %601 = vst.msk [vmem:[%s996_s25 + $0x2c] sm:$0xf] %vm589_vm1, %v749_v10  ;;  %v471_v15 = vadd.f32 %v780_v13, %v276_v36  ;;  %v503_v16 = vadd.f32 %v788_v14, %v316_v8  ;;  %v462_v17 = vpop.f32.mrb[5].mxu0  ;;  %v494_v18 = vpop.f32.mrb[5].mxu1 }
  0xff   : > { %591 = vst.msk [vmem:[%s996_s25 + $0x4] sm:$0xf] %vm589_vm1, %v739_v11  ;;  %599 = vst.msk [vmem:[%s996_s25 + $0x24] sm:$0xf] %vm589_vm1, %v747_v12  ;;  %v463_v19 = vadd.f32 %v462_v17, %v266_v34  ;;  %v495_v20 = vadd.f32 %v494_v18, %v306_v42  ;;  %v781_v21 = vpop.f32.mrb[6].mxu0  ;;  %v789_v22 = vpop.f32.mrb[6].mxu1 }
 0x100   : > { %v515_v23 = vmax.f32 %v471_v15, 0.0  ;;  %v523_v24 = vmax.f32 %v503_v16, 0.0  ;;  %v474_v25 = vadd.f32 %v781_v21, %v988_v35  ;;  %v506_v26 = vadd.f32 %v789_v22, %v321_v7  ;;  %v465_v27 = vpop.f32.mrb[7].mxu0  ;;  %v497_v28 = vpop.f32.mrb[7].mxu1 }
 0x101   : > { %v513_v29 = vmax.f32 %v463_v19, 0.0  ;;  %v521_v30 = vmax.f32 %v495_v20, 0.0  ;;  %v466_v31 = vadd.f32 %v465_v27, %v986_v33  ;;  %v498_v32 = vadd.f32 %v497_v28, %v990_v41 }
 0x102   : > { %v744_v34 = vpack.c.bf16 %v515_v23, %v515_v23  ;;  %v752_v36 = vpack.c.bf16 %v523_v24, %v523_v24  ;;  %v516_v37 = vmax.f32 %v474_v25, 0.0  ;;  %v524_v35 = vmax.f32 %v506_v26, 0.0 }
 0x103   : > { %v742_v38 = vpack.c.bf16 %v513_v29, %v513_v29  ;;  %v750_v39 = vpack.c.bf16 %v521_v30, %v521_v30  ;;  %v514_v40 = vmax.f32 %v466_v31, 0.0  ;;  %v522_v42 = vmax.f32 %v498_v32, 0.0 }
 0x104   : > { %596 = vst.msk [vmem:[%s996_s25 + $0x18] sm:$0xf] %vm589_vm1, %v744_v34  ;;  %604 = vst.msk [vmem:[%s996_s25 + $0x38] sm:$0xf] %vm589_vm1, %v752_v36  ;;  %v745_v43 = vpack.c.bf16 %v516_v37, %v516_v37  ;;  %v753_v33 = vpack.c.bf16 %v524_v35, %v524_v35 }
 0x105   : > { %594 = vst.msk [vmem:[%s996_s25 + $0x10] sm:$0xf] %vm589_vm1, %v742_v38  ;;  %602 = vst.msk [vmem:[%s996_s25 + $0x30] sm:$0xf] %vm589_vm1, %v750_v39  ;;  %v743_v41 = vpack.c.bf16 %v514_v40, %v514_v40  ;;  %v751_v44 = vpack.c.bf16 %v522_v42, %v522_v42 }
 0x106   : > { %597 = vst.msk [vmem:[%s996_s25 + $0x1c] sm:$0xf] %vm589_vm1, %v745_v43  ;;  %605 = vst.msk [vmem:[%s996_s25 + $0x3c] sm:$0xf] %vm589_vm1, %v753_v33 }
 0x107   : > { %595 = vst.msk [vmem:[%s996_s25 + $0x14] sm:$0xf] %vm589_vm1, %v743_v41  ;;  %603 = vst.msk [vmem:[%s996_s25 + $0x34] sm:$0xf] %vm589_vm1, %v751_v44 }
 0x108 PF: > { %s13_s14 = sadd.s32 1, %s859_s14   ;;  %s1046_s12 = smov %s855_s13 }
 0x109   : > { %p10_p5 = scmp.ge.s32.totalorder %s13_s14, 4   ;;  %s1047_s13 = smov %s1049_s15 }
 0x10b   :  { %12 = sbr.rel (!%p10_p5) target bundleno = 2 (0x2), region = 62 }

// kernel: efficient_gcn_forward.10
= control target key start
LH: loop header
LB: loop body
LE: loop exit
PB: predicated region body
PF: predicated region fallthrough
CT: control target
= control target key end

     0   :  { %s1805_s30 = smov 0   ;;  %s2195_s0 = inlined_call_operand.vmem [shape: bf16[2,8,16,16], index: 0, kind: input, shape index: {}]   ;;  %s2196_s1 = inlined_call_operand.vmem [shape: f32[4,8], index: 1, kind: input, shape index: {}]   ;;  %s2197_s2 = inlined_call_operand.vmem [shape: f32[4,1], index: 2, kind: input, shape index: {}]   ;;  %s2198_s3 = inlined_call_operand.vmem [shape: f32[8,4], index: 3, kind: input, shape index: {}]   ;;  %s2199_s4 = inlined_call_operand.vmem [shape: f32[8,1], index: 4, kind: input, shape index: {}]   ;;  %s2200_s5 = inlined_call_operand.vmem [shape: f32[8,4], index: 5, kind: input, shape index: {}]   ;;  %s2201_s6 = inlined_call_operand.vmem [shape: f32[8,1], index: 6, kind: input, shape index: {}]   ;;  %s2202_s7 = inlined_call_operand.vmem [shape: f32[8,1], index: 7, kind: input, shape index: {}]   ;;  %s2203_s8 = inlined_call_operand.vmem [shape: f32[8,1], index: 8, kind: input, shape index: {}]   ;;  %s2204_s9 = inlined_call_operand.vmem [shape: bf16[2,8,16,16], index: 9, kind: output, shape index: {}]  }
   0x1 LB: > { %s1599_s10 = sadd.s32 4294967295, %s1749_s30   ;;  %p1603_p0 = scmp.ge.s32.totalorder %s1749_s30, 1  ;;  %s1749_s30 = sphi %s1805_s30, %s19_s30  }
   0x2   : > { %p287_p1 = scmp.lt.s32.totalorder %s1749_s30, 3 }
   0x4   : > { %p288_p2 = pnand %p1603_p0, %p287_p1 }
   0x5   : > { %p323_p3 = scmp.lt.s32.totalorder (!%p288_p2), %s1599_s10, 1  ;;  %vm365_vm0 = vcmask (!%p288_p2), 130048   ;;  %vm594_vm1 = vcmask (!%p288_p2), 1041409   ;;  %vm596_vm2 = vcmask (!%p288_p2), 1042434   ;;  %vm598_vm3 = vcmask (!%p288_p2), 1043459  }
   0x6   : > { %291 = sbr.rel (%p288_p2) target bundleno = 834 (0x342), region = 56  ;;  %vm600_vm4 = vcmask (!%p288_p2), 1044484   ;;  %vm602_vm5 = vcmask (!%p288_p2), 1045509   ;;  %vm604_vm6 = vcmask (!%p288_p2), 1046534   ;;  %vm606_vm7 = vcmask (!%p288_p2), 1047559  }
   0x7   : > { %vm1753_vm8 = vmmov (!%p288_p2), 0   ;;  %vm609_vm9 = vcmask (!%p288_p2), 64512   ;;  %vm529_vm10 = vcmask (!%p288_p2), 130112   ;;  %vm790_vm11 = vcmask (!%p288_p2), 1043456  }
   0x8   : > { %vm786_vm12 = vcmask (!%p288_p2), 31744   ;;  %vm1527_vm13 = vcmask (!%p288_p2), 125952  }
   0xd   : > { %s2206_s10 = smov (!%p323_p3, %s1599_s10), 1 }
   0xe   : > { %s1634_s11 = sshll.u32 %s2206_s10, 6 }
   0xf   : > { %s1821_s14 = scalar_lea.vmem %s2195_s0, %s1634_s11  ;;  %s2095_s15 = scalar_lea.vmem %s2204_s9, %s1634_s11 }
  0x10   : > { %v1684_v0 = vld [vmem:[%s1821_s14 + $0x8] sm:$0xff]   ;;  %v1653_v1 = vld [vmem:[%s1821_s14] sm:$0xff]   ;;  %v1685_v2 = vld [vmem:[%s1821_s14 + $0x10] sm:$0xff]  }
  0x11   : > { %v1826_v3 = vunpack.c.l.bf16 %v1684_v0  ;;  %v1828_v4 = vunpack.c.l.bf16 %v1653_v1  ;;  %v1830_v5 = vunpack.c.h.bf16 %v1684_v0  ;;  %v1832_v6 = vunpack.c.h.bf16 %v1653_v1  ;;  %v1686_v7 = vld [vmem:[%s1821_s14 + $0x18] sm:$0xff]   ;;  %v1687_v9 = vld [vmem:[%s1821_s14 + $0x20] sm:$0xff]   ;;  %v1688_v18 = vld [vmem:[%s1821_s14 + $0x28] sm:$0xff]  }
  0x12   : > { %v1835_v8 = vunpack.c.h.bf16 %v1685_v2  ;;  %v1844_v13 = vunpack.c.l.bf16 %v1685_v2  ;;  %v1848_v16 = vunpack.c.h.bf16 %v1686_v7  ;;  %v1850_v17 = vunpack.c.l.bf16 %v1686_v7  ;;  %v1689_v30 = vld [vmem:[%s1821_s14 + $0x30] sm:$0xff]   ;;  %v1690_v48 = vld [vmem:[%s1821_s14 + $0x38] sm:$0xff]  }
  0x13   : > { %v372_v10 = vsel %vm365_vm0, %v1826_v3, 0.0  ;;  %v366_v11 = vsel %vm365_vm0, %v1828_v4, 0.0  ;;  %v375_v12 = vsel %vm365_vm0, %v1830_v5, 0.0  ;;  %v369_v15 = vsel %vm365_vm0, %v1832_v6, 0.0 }
  0x14   : > { %373 = vadd.xlane.f32.xlu1 %v372_v10  ;;  %367 = vadd.xlane.f32.xlu0 %v366_v11  ;;  %v438_v14 = vadd.f32 %v375_v12, %v372_v10  ;;  %v431_v19 = vadd.f32 %v369_v15, %v366_v11  ;;  %v1853_v20 = vunpack.c.h.bf16 %v1687_v9  ;;  %v1855_v21 = vunpack.c.l.bf16 %v1687_v9 }
  0x15   : > { %v381_v22 = vsel %vm365_vm0, %v1835_v8, 0.0  ;;  %v378_v23 = vsel %vm365_vm0, %v1844_v13, 0.0  ;;  %v1861_v24 = vunpack.c.h.bf16 %v1688_v18  ;;  %v1863_v25 = vunpack.c.l.bf16 %v1688_v18 }
  0x16   : > { %v439_v26 = vrot.slane %v438_v14, 4  ;;  %v445_v27 = vadd.f32 %v381_v22, %v378_v23  ;;  %v387_v28 = vsel %vm365_vm0, %v1848_v16, 0.0  ;;  %v384_v29 = vsel %vm365_vm0, %v1850_v17, 0.0 }
  0x17   : > { %v432_v31 = vrot.slane %v431_v19, 4  ;;  %v452_v32 = vadd.f32 %v387_v28, %v384_v29  ;;  %v393_v33 = vsel %vm365_vm0, %v1853_v20, 0.0  ;;  %v390_v34 = vsel %vm365_vm0, %v1855_v21, 0.0 }
  0x18   : > { %376 = vadd.xlane.f32.xlu1 %v375_v12  ;;  %370 = vadd.xlane.f32.xlu0 %v369_v15  ;;  %v459_v35 = vadd.f32 %v393_v33, %v390_v34  ;;  %v399_v36 = vsel %vm365_vm0, %v1861_v24, 0.0  ;;  %v396_v37 = vsel %vm365_vm0, %v1863_v25, 0.0  ;;  %v1878_v39 = vunpack.c.h.bf16 %v1689_v30 }
  0x19   : > { %v466_v38 = vadd.f32 %v399_v36, %v396_v37  ;;  %v1880_v40 = vunpack.c.l.bf16 %v1689_v30  ;;  %v440_v41 = vadd.f32 %v439_v26, %v438_v14  ;;  %v446_v42 = vrot.slane %v445_v27, 4 }
  0x1a   : > { %v433_v43 = vadd.f32 %v432_v31, %v431_v19  ;;  %v453_v44 = vrot.slane %v452_v32, 4  ;;  %v460_v45 = vrot.slane %v459_v35, 4  ;;  %v405_v46 = vsel %vm365_vm0, %v1878_v39, 0.0 }
  0x1b   : > { %v402_v47 = vsel %vm365_vm0, %v1880_v40, 0.0  ;;  %v467_v49 = vrot.slane %v466_v38, 4  ;;  %v441_v51 = vrot.slane %v440_v41, 2  ;;  %v447_v52 = vadd.f32 %v446_v42, %v445_v27 }
  0x1c   : > { %382 = vadd.xlane.f32.xlu1 %v381_v22  ;;  %379 = vadd.xlane.f32.xlu0 %v378_v23  ;;  %v473_v50 = vadd.f32 %v405_v46, %v402_v47  ;;  %v434_v53 = vrot.slane %v433_v43, 2  ;;  %v454_v54 = vadd.f32 %v453_v44, %v452_v32  ;;  %v1887_v55 = vunpack.c.h.bf16 %v1690_v48 }
  0x1d   : > { %v461_v56 = vadd.f32 %v460_v45, %v459_v35  ;;  %v468_v58 = vadd.f32 %v467_v49, %v466_v38  ;;  %v1889_v59 = vunpack.c.l.bf16 %v1690_v48  ;;  %v442_v60 = vadd.f32 %v441_v51, %v440_v41 }
  0x1e   : > { %v474_v57 = vrot.slane %v473_v50, 4  ;;  %v448_v61 = vrot.slane %v447_v52, 2  ;;  %v435_v62 = vadd.f32 %v434_v53, %v433_v43  ;;  %v455_v63 = vrot.slane %v454_v54, 2 }
  0x1f   : > { %v411_v0 = vsel %vm365_vm0, %v1887_v55, 0.0  ;;  %v408_v1 = vsel %vm365_vm0, %v1889_v59, 0.0  ;;  %v462_v2 = vrot.slane %v461_v56, 2  ;;  %v469_v10 = vrot.slane %v468_v58, 2 }
  0x20   : > { %388 = vadd.xlane.f32.xlu1 %v387_v28  ;;  %385 = vadd.xlane.f32.xlu0 %v384_v29  ;;  %v475_v7 = vadd.f32 %v474_v57, %v473_v50  ;;  %v480_v9 = vadd.f32 %v411_v0, %v408_v1  ;;  %v449_v11 = vadd.f32 %v448_v61, %v447_v52  ;;  %v443_v14 = vrot.slane %v442_v60, 1 }
  0x21   : > { %v436_v15 = vrot.slane %v435_v62, 1  ;;  %v456_v18 = vadd.f32 %v455_v63, %v454_v54  ;;  %v463_v19 = vadd.f32 %v462_v2, %v461_v56  ;;  %v470_v23 = vadd.f32 %v469_v10, %v468_v58 }
  0x22   : > { %v481_v12 = vrot.slane %v480_v9, 4  ;;  %v476_v22 = vrot.slane %v475_v7, 2  ;;  %v450_v27 = vrot.slane %v449_v11, 1  ;;  %v444_v28 = vadd.f32 %v443_v14, %v442_v60  ;;  %v1169_v14 = vld [vmem:[%s2202_s7] sm:$0xff] }
  0x23   : > { %v437_v29 = vadd.f32 %v436_v15, %v435_v62  ;;  %v457_v30 = vrot.slane %v456_v18, 1  ;;  %v464_v31 = vrot.slane %v463_v19, 1  ;;  %v1751_v56 = vmov 1966171168  }
  0x24   : > { %394 = vadd.xlane.f32.xlu1 %v393_v33  ;;  %391 = vadd.xlane.f32.xlu0 %v390_v34  ;;  %v482_v26 = vadd.f32 %v481_v12, %v480_v9  ;;  %v477_v32 = vadd.f32 %v476_v22, %v475_v7  ;;  %v471_v33 = vrot.slane %v470_v23, 1  ;;  %v451_v35 = vadd.f32 %v450_v27, %v449_v11  ;;  %v1909_v9 = vld [vmem:[%s2196_s1] sm:$0xf] }
  0x25   : > { %v458_v38 = vadd.f32 %v457_v30, %v456_v18  ;;  %v465_v41 = vadd.f32 %v464_v31, %v463_v19  ;;  %v1066_v57 = vunpack.c.l.s4 %v1751_v56  ;;  %v518_v63 = vlaneseq  ;;  %v496_v12 = vld [vmem:[%s2197_s2] sm:$0xf] }
  0x26   : > { %v483_v34 = vrot.slane %v482_v26, 2  ;;  %v478_v42 = vrot.slane %v477_v32, 1  ;;  %v472_v43 = vadd.f32 %v471_v33, %v470_v23  ;;  %v489_v45 = vmul.f32 0.0625, %v451_v35 }
  0x27   : > { %v491_v48 = vmul.f32 0.0625, %v465_v41  ;;  %v1067_v7 = vunpack.c.0.s8 %v1066_v57  ;;  %v1916_v10 = vshrl.u32 %v518_v63, 7  ;;  %v1754_v15 = vmov 0  }
  0x28   : > { %400 = vadd.xlane.f32.xlu1 %v399_v36  ;;  %397 = vadd.xlane.f32.xlu0 %v396_v37  ;;  %v488_v36 = vmul.f32 0.0625, %v444_v28  ;;  %v487_v37 = vmul.f32 0.0625, %v437_v29  ;;  %v484_v44 = vadd.f32 %v483_v34, %v482_v26  ;;  %v479_v49 = vadd.f32 %v478_v42, %v477_v32  ;;  %v1300_v29 = vld [vmem:[%s2203_s8] sm:$0xff] }
  0x29   : > { %v492_v50 = vmul.f32 0.0625, %v472_v43  ;;  %v1922_v11 = vsub.s32 %v1067_v7, %v1916_v10  ;;  %1731 = vset.pattern.permute.xlu0 %v1754_v15  ;;  %v1171_v19 = vcombine.high %v1169_v14, %v1169_v14  ;;  %1732 = vset.pattern.permute.xlu1 %v1754_v15  ;;  %v1934_v22 = vsub.s32 0, %v1916_v10 }
  0x2a   : > { %v485_v51 = vrot.slane %v484_v44, 1  ;;  %v493_v58 = vmul.f32 0.0625, %v479_v49 }
  0x2b   : > { %v1931_v18 = vrot.slane %v1169_v14, %v1922_v11  ;;  %v1939_v26 = vrot.slane %v1171_v19, %v1922_v11  ;;  %v1951_v34 = vrot.slane %v1300_v29, %v1922_v11 }
  0x2c   : > { %406 = vadd.xlane.f32.xlu1 %v405_v46  ;;  %403 = vadd.xlane.f32.xlu0 %v402_v47  ;;  %v490_v46 = vmul.f32 0.0625, %v458_v38  ;;  %v696_v47 = vsel %vm594_vm1, %v488_v36, %v487_v37  ;;  %v486_v53 = vadd.f32 %v485_v51, %v484_v44  ;;  %v1302_v38 = vcombine.high %v1300_v29, %v1300_v29 }
  0x2d   : > { %v697_v52 = vsel %vm596_vm2, %v489_v45, %v696_v47  ;;  %v1186_v23 = vcombine.high %v1931_v18, %v1931_v18  ;;  %v1187_v28 = vcombine.high %v1939_v26, %v1939_v26  ;;  %v1317_v37 = vcombine.high %v1951_v34, %v1951_v34 }
  0x2e   : > { %v698_v54 = vsel %vm598_vm3, %v490_v46, %v697_v52  ;;  %v494_v61 = vmul.f32 0.0625, %v486_v53  ;;  %v1959_v43 = vrot.slane %v1302_v38, %v1922_v11 }
  0x2f   : > { %v699_v60 = vsel %vm600_vm4, %v491_v48, %v698_v54  ;;  %v1208_v27 = vrot.slane %v1186_v23, %v1922_v11  ;;  %v1215_v33 = vrot.slane %v1187_v28, %v1922_v11  ;;  %v1339_v42 = vrot.slane %v1317_v37, %v1922_v11 }
  0x30   : > { %412 = vadd.xlane.f32.xlu1 %v411_v0  ;;  %409 = vadd.xlane.f32.xlu0 %v408_v1  ;;  %v700_v62 = vsel %vm602_vm5, %v492_v50, %v699_v60  ;;  %v1752_v1 = vmov 0.0   ;;  %v1318_v46 = vcombine.high %v1959_v43, %v1959_v43  ;;  %v519_v60 = vand.u32 127, %v518_v63 }
  0x31   : > { %v701_v0 = vsel %vm604_vm6, %v493_v58, %v700_v62  ;;  %1704 = vmatprep.subr.mxu1 %v1752_v1  ;;  %1699 = vmatprep.subr.mxu0 %v1752_v1  ;;  %v1227_v30 = vrot.slane %v1208_v27, %v1934_v22  ;;  %v1218_v31 = vcombine.high %v1208_v27, %v1208_v27 }
  0x32   : > { %v702_v2 = vsel %vm606_vm7, %v494_v61, %v701_v0  ;;  %1706 = vmatprep.mubr.msk.f32.mxu1 %vm1753_vm8, %v1752_v1  ;;  %1701 = vmatprep.mubr.msk.f32.mxu0 %vm1753_vm8, %v1752_v1  ;;  %v1243_v35 = vrot.slane %v1215_v33, %v1934_v22  ;;  %v1219_v36 = vcombine.high %v1215_v33, %v1215_v33  ;;  %v524_v61 = vadd.s32 4294967288, %v519_v60 }
  0x33   : > { %1705 = vmatpush3.msra.mxu1 %v702_v2  ;;  %v1235_v32 = vrot.slane %v1218_v31, %v1934_v22  ;;  %v1358_v44 = vrot.slane %v1339_v42, %v1934_v22  ;;  %v1349_v45 = vcombine.high %v1339_v42, %v1339_v42  ;;  %v1346_v48 = vrot.slane %v1318_v46, %v1922_v11 }
  0x34   : > { %1707 = vmatmul.mubr.msk.f32.vlgmr.msra.gmra.mrb[0].mxu1 %vm609_vm9, %v1909_v9  ;;  %1714 = vmatprep.subr.mxu1 %v1752_v1  ;;  %v1251_v41 = vrot.slane %v1219_v36, %v1934_v22  ;;  %v527_v2 = vsub.s32 %v524_v61, %v1916_v10  ;;  %v522_v19 = vsub.s32 %v519_v60, %v1916_v10 }
  0x35   : > { %1716 = vmatprep.mubr.msk.f32.mxu1 %vm1753_vm8, %v1752_v1  ;;  %v1366_v47 = vrot.slane %v1349_v45, %v1934_v22  ;;  %v1374_v49 = vrot.slane %v1346_v48, %v1934_v22  ;;  %v1350_v50 = vcombine.high %v1346_v48, %v1346_v48 }
  0x37   : > { %v1382_v51 = vrot.slane %v1350_v50, %v1934_v22 }
  0x46   : > { %499 = vperm.xlu0 %1731, %v496_v12  }
  0x4a   : > { %1257 = vperm.xlu0 %1731, %v1227_v30  }
  0x4e   : > { %1265 = vperm.xlu0 %1731, %v1235_v32  }
  0x52   : > { %1273 = vperm.xlu0 %1731, %v1243_v35  }
  0x56   : > { %1281 = vperm.xlu0 %1731, %v1251_v41  }
  0x5a   : > { %1388 = vperm.xlu0 %1731, %v1358_v44  }
  0x5e   : > { %1396 = vperm.xlu0 %1731, %v1366_v47  }
  0x62   : > { %1404 = vperm.xlu0 %1731, %v1374_v49  }
  0x66   : > { %1412 = vperm.xlu0 %1731, %v1382_v51  }
  0xa1   : > { %v374_v52 = vpop.xlane.xlu1 %373  ;;  %v368_v53 = vpop.xlane.xlu0 %367 }
  0xa2   : > { %v417_v23 = vmul.f32 0.0625, %v374_v52  ;;  %v415_v27 = vmul.f32 0.0625, %v368_v53 }
  0xa4   : > { %v534_v42 = vrot.slane %v417_v23, %v522_v19  ;;  %v523_v44 = vrot.slane %v415_v27, %v522_v19 }
  0xa5   : > { %v377_v54 = vpop.xlane.xlu1 %376  ;;  %v371_v56 = vpop.xlane.xlu0 %370 }
  0xa6   : > { %v418_v7 = vmul.f32 0.0625, %v377_v54  ;;  %v416_v12 = vmul.f32 0.0625, %v371_v56 }
  0xa8   : > { %v538_v32 = vrot.slane %v418_v7, %v527_v2  ;;  %v528_v33 = vrot.slane %v416_v12, %v527_v2 }
  0xa9   : > { %v383_v57 = vpop.xlane.xlu1 %382  ;;  %v380_v58 = vpop.xlane.xlu0 %379 }
  0xaa   : > { %v420_v28 = vmul.f32 0.0625, %v383_v57  ;;  %v419_v29 = vmul.f32 0.0625, %v380_v58  ;;  %v539_v49 = vsel %vm529_vm10, %v538_v32, %v534_v42  ;;  %v530_v50 = vsel %vm529_vm10, %v528_v33, %v523_v44 }
  0xab   : > { %v595_v12 = vsel %vm594_vm1, %v539_v49, %v530_v50  ;;  %v1194_v50 = vrot.slane %v1931_v18, %v1922_v11 }
  0xac   : > { %v547_v45 = vrot.slane %v420_v28, %v527_v2  ;;  %v543_v46 = vrot.slane %v419_v29, %v522_v19 }
  0xad   : > { %v389_v62 = vpop.xlane.xlu1 %388  ;;  %v386_v0 = vpop.xlane.xlu0 %385 }
  0xae   : > { %v422_v30 = vmul.f32 0.0625, %v389_v62  ;;  %v421_v31 = vmul.f32 0.0625, %v386_v0  ;;  %v548_v61 = vsel %vm529_vm10, %v547_v45, %v543_v46 }
  0xaf   : > { %v597_v27 = vsel %vm596_vm2, %v548_v61, %v595_v12 }
  0xb0   : > { %v556_v47 = vrot.slane %v422_v30, %v527_v2  ;;  %v552_v48 = vrot.slane %v421_v31, %v522_v19 }
  0xb1   : > { %v395_v14 = vpop.xlane.xlu1 %394  ;;  %v392_v15 = vpop.xlane.xlu0 %391 }
  0xb2   : > { %v424_v63 = vmul.f32 0.0625, %v395_v14  ;;  %v423_v35 = vmul.f32 0.0625, %v392_v15  ;;  %v557_v62 = vsel %vm529_vm10, %v556_v47, %v552_v48 }
  0xb3   : > { %v599_v31 = vsel %vm598_vm3, %v557_v62, %v597_v27 }
  0xb4   : > { %v565_v51 = vrot.slane %v424_v63, %v527_v2  ;;  %v561_v52 = vrot.slane %v423_v35, %v522_v19 }
  0xb5   : > { %v401_v36 = vpop.xlane.xlu1 %400  ;;  %v398_v37 = vpop.xlane.xlu0 %397 }
  0xb6   : > { %v426_v38 = vmul.f32 0.0625, %v401_v36  ;;  %v425_v41 = vmul.f32 0.0625, %v398_v37  ;;  %v566_v14 = vsel %vm529_vm10, %v565_v51, %v561_v52  ;;  %v871_v51 = vld [vmem:[%s2201_s6] sm:$0xff]  ;;  %v1223_v52 = vrot.slane %v1194_v50, %v1934_v22 }
  0xb7   : > { %v601_v35 = vsel %vm600_vm4, %v566_v14, %v599_v31 }
  0xb8   : > { %v574_v56 = vrot.slane %v426_v38, %v527_v2  ;;  %v570_v57 = vrot.slane %v425_v41, %v522_v19 }
  0xb9   : > { %v407_v53 = vpop.xlane.xlu1 %406  ;;  %v404_v54 = vpop.xlane.xlu0 %403 }
  0xba   : > { %v428_v58 = vmul.f32 0.0625, %v407_v53  ;;  %v427_v60 = vmul.f32 0.0625, %v404_v54  ;;  %v575_v28 = vsel %vm529_vm10, %v574_v56, %v570_v57  ;;  %v1216_v53 = vcombine.high %v1194_v50, %v1194_v50 }
  0xbb   : > { %v603_v36 = vsel %vm602_vm5, %v575_v28, %v601_v35  ;;  %v1201_v56 = vrot.slane %v1939_v26, %v1922_v11  ;;  %v1332_v26 = vrot.slane %v1959_v43, %v1922_v11  ;;  %v779_v43 = vld [vmem:[%s2198_s3] sm:$0xff]  ;;  %v1027_v50 = vsub.s32 6, %v1916_v10 }
  0xbc   : > { %v583_v0 = vrot.slane %v428_v58, %v527_v2  ;;  %v579_v7 = vrot.slane %v427_v60, %v522_v19  ;;  %v1231_v54 = vrot.slane %v1216_v53, %v1934_v22  ;;  %v1325_v60 = vrot.slane %v1951_v34, %v1922_v11 }
  0xbd   : > { %v413_v15 = vpop.xlane.xlu1 %412  ;;  %v410_v23 = vpop.xlane.xlu0 %409  ;;  %v1239_v57 = vrot.slane %v1201_v56, %v1934_v22  ;;  %v1217_v58 = vcombine.high %v1201_v56, %v1201_v56  ;;  %v1348_v12 = vcombine.high %v1332_v26, %v1332_v26  ;;  %v983_v53 = vsub.s32 2, %v1916_v10 }
  0xbe   : > { %v430_v29 = vmul.f32 0.0625, %v413_v15  ;;  %v429_v30 = vmul.f32 0.0625, %v410_v23  ;;  %v584_v32 = vsel %vm529_vm10, %v583_v0, %v579_v7  ;;  %v1354_v61 = vrot.slane %v1325_v60, %v1934_v22 }
  0xbf   : > { %v605_v38 = vsel %vm604_vm6, %v584_v32, %v603_v36  ;;  %v1247_v18 = vrot.slane %v1217_v58, %v1934_v22  ;;  %v1347_v62 = vcombine.high %v1325_v60, %v1325_v60  ;;  %v1370_v7 = vrot.slane %v1332_v26, %v1934_v22 }
  0xc0   : > { %v592_v33 = vrot.slane %v430_v29, %v527_v2  ;;  %v588_v63 = vrot.slane %v429_v30, %v522_v19  ;;  %v1378_v14 = vrot.slane %v1348_v12, %v1934_v22 }
  0xc1   : > { %v1362_v0 = vrot.slane %v1347_v62, %v1934_v22 }
  0xc2   : > { %v593_v37 = vsel %vm529_vm10, %v592_v33, %v588_v63 }
  0xc3   : > { %v607_v41 = vsel %vm606_vm7, %v593_v37, %v605_v38 }
  0xc4   : > { %1700 = vmatpush3.msra.mxu0 %v607_v41 }
  0xc5   : > { %1702 = vmatmul.mubr.msk.f32.vlgmr.msra.gmra.mrb[0].mxu0 %vm609_vm9, %v1909_v9  ;;  %1709 = vmatprep.subr.mxu0 %v1752_v1  ;;  %v500_v2 = vpop.permute.xlu0 %499  ;;  %v870_v9 = vld [vmem:[%s2200_s5] sm:$0xff] }
  0xc6   : > { %1711 = vmatprep.mubr.msk.f32.mxu0 %vm1753_vm8, %v1752_v1  ;;  %v780_v1 = vld [vmem:[%s2199_s4] sm:$0xff] }
  0xc7   : > { %783 = vperm.xlu1 %1732, %v780_v1  }
  0xc9   : > { %v2031_v60 = vpop.permute.xlu0 %1257 }
  0xcb   : > { %874 = vperm.xlu1 %1732, %v871_v51  }
  0xcf   : > { %1253 = vperm.xlu1 %1732, %v1223_v52   ;;  %v1038_v52 = vsub.s32 7, %v1916_v10 }
  0xd3   : > { %1261 = vperm.xlu1 %1732, %v1231_v54  }
  0xd7   : > { %1269 = vperm.xlu1 %1732, %v1239_v57  }
  0xdb   : > { %1277 = vperm.xlu1 %1732, %v1247_v18  }
  0xdf   : > { %1384 = vperm.xlu1 %1732, %v1354_v61  }
  0xe3   : > { %1392 = vperm.xlu1 %1732, %v1362_v0  }
  0xe7   : > { %1400 = vperm.xlu1 %1732, %v1370_v7  }
  0xeb   : > { %1408 = vperm.xlu1 %1732, %v1378_v14  }
 0x107   : > { %v770_v19 = vpop.f32.mrb[0].mxu1 }
 0x108   : > { %v771_v42 = vadd.f32 %v770_v19, %v500_v2  ;;  %v1708_v44 = vpop.f32.mrb[1].mxu1  ;;  %v994_v19 = vsub.s32 3, %v1916_v10 }
 0x10a   : > { %v774_v45 = vadd.f32 3.0, %v771_v42 }
 0x10c   : > { %v775_v46 = vmax.f32 %v774_v45, 0.0 }
 0x10e   : > { %v776_v47 = vmin.f32 %v775_v46, 6.0  ;;  %v1005_v46 = vsub.s32 4, %v1916_v10 }
 0x110   : > { %v777_v48 = vmul.f32 %v776_v47, %v771_v42 }
 0x112   : > { %v778_v49 = vmul.f32 0.16666667, %v777_v48  ;;  %v1016_v48 = vsub.s32 5, %v1916_v10 }
 0x114   : > { %1715 = vmatpush3.msk.msra.mxu1 %vm790_vm11, %v778_v49  ;;  %v972_v49 = vsub.s32 1, %v1916_v10  ;;  %v2033_v10 = vpop.permute.xlu0 %1265 }
 0x115   : > { %1717 = vmatmul.mubr.msk.f32.vlgmr.msra.gmra.mrb[2].mxu1 %vm786_vm12, %v870_v9 }
 0x118   : > { %v2037_v26 = vpop.permute.xlu0 %1273 }
 0x11c   : > { %v2041_v14 = vpop.permute.xlu0 %1281 }
 0x146   : > { %v784_v63 = vpop.permute.xlu1 %783 }
 0x14a   : > { %v875_v57 = vpop.permute.xlu1 %874 }
 0x14e   : > { %v1254_v61 = vpop.permute.xlu1 %1253 }
 0x152   : > { %v2035_v62 = vpop.permute.xlu1 %1261 }
 0x156   : > { %v2039_v7 = vpop.permute.xlu1 %1269 }
 0x198   : > { %v679_v15 = vpop.f32.mrb[0].mxu0 }
 0x199   : > { %v680_v34 = vadd.f32 %v679_v15, %v500_v2  ;;  %v1703_v23 = vpop.f32.mrb[1].mxu0  ;;  %v2043_v15 = vpop.permute.xlu1 %1277 }
 0x19b   : > { %v683_v27 = vadd.f32 3.0, %v680_v34 }
 0x19d   : > { %v684_v28 = vmax.f32 %v683_v27, 0.0  ;;  %v1385_v23 = vpop.permute.xlu1 %1384 }
 0x19f   : > { %v685_v29 = vmin.f32 %v684_v28, 6.0 }
 0x1a1   : > { %v686_v30 = vmul.f32 %v685_v29, %v680_v34  ;;  %v2045_v34 = vpop.permute.xlu0 %1388  ;;  %v2049_v29 = vpop.permute.xlu1 %1392 }
 0x1a3   : > { %v687_v31 = vmul.f32 0.16666667, %v686_v30 }
 0x1a5   : > { %1710 = vmatpush3.msk.msra.mxu0 %vm790_vm11, %v687_v31  ;;  %v2047_v28 = vpop.permute.xlu0 %1396 }
 0x1a6   : > { %1712 = vmatmul.mubr.msk.f32.vlgmr.msra.gmra.mrb[2].mxu0 %vm786_vm12, %v779_v43 }
 0x1a9   : > { %v2052_v43 = vpop.permute.xlu0 %1404 }
 0x1e8   : > { %v949_v32 = vpop.f32.mrb[2].mxu1 }
 0x1e9   : > { %v1718_v33 = vpop.f32.mrb[3].mxu1  ;;  %v950_v58 = vadd.f32 %v949_v32, %v875_v57  ;;  %v2054_v32 = vpop.permute.xlu1 %1400 }
 0x1eb   : > { %v1615_v18 = vmul.f32 -1.442695, %v950_v58 }
 0x279   : > { %v860_v35 = vpop.f32.mrb[2].mxu0 }
 0x27a   : > { %v861_v36 = vadd.f32 %v860_v35, %v784_v63  ;;  %v1713_v37 = vpop.f32.mrb[3].mxu0  ;;  %v2057_v35 = vpop.permute.xlu0 %1412 }
 0x27c   : > { %v1612_v38 = vmul.f32 -1.442695, %v861_v36  ;;  %v2059_v36 = vpop.permute.xlu1 %1408 }
 0x27e   : > { %1735 = vpow2.f32 %v1612_v38 }
 0x288   : > { %v1736_v41 = vpop.eup %1735 }
 0x289   : > { %v867_v2 = vadd.f32 1.0, %v1736_v41 }
 0x28b   : > { %1737 = vrcp.f32 %v867_v2 }
 0x28c   : > { %1739 = vpow2.f32 %v1615_v18 }
 0x295   : > { %v1738_v42 = vpop.eup %1737 }
 0x296   : > { %v995_v44 = vrot.slane %v1738_v42, %v994_v19  ;;  %v962_v45 = vrot.slane %v1738_v42, %v1934_v22  ;;  %v1006_v47 = vrot.slane %v1738_v42, %v1005_v46  ;;  %v1017_v9 = vrot.slane %v1738_v42, %v1016_v48  ;;  %v1740_v0 = vpop.eup %1739 }
 0x297   : > { %v973_v1 = vrot.slane %v1738_v42, %v972_v49  ;;  %v1028_v51 = vrot.slane %v1738_v42, %v1027_v50  ;;  %v1039_v54 = vrot.slane %v1738_v42, %v1038_v52  ;;  %v984_v56 = vrot.slane %v1738_v42, %v983_v53 }
 0x298   : > { %997 = vbcast.lane.b32.xlu0 %v995_v44, 256  ;;  %964 = vbcast.lane.b32.xlu1 %v962_v45, 256  ;;  %v956_v12 = vadd.f32 1.0, %v1740_v0 }
 0x29a   : > { %1741 = vrcp.f32 %v956_v12 }
 0x29c   : > { %1008 = vbcast.lane.b32.xlu0 %v1006_v47, 256  ;;  %968 = vbcast.lane.b32.xlu1 %v962_v45, 264 }
 0x2a0   : > { %1019 = vbcast.lane.b32.xlu0 %v1017_v9, 256  ;;  %975 = vbcast.lane.b32.xlu1 %v973_v1, 256 }
 0x2a4   : > { %1030 = vbcast.lane.b32.xlu0 %v1028_v51, 256  ;;  %979 = vbcast.lane.b32.xlu1 %v973_v1, 264  ;;  %v1742_v27 = vpop.eup %1741 }
 0x2a5   : > { %v1071_v30 = vrot.slane %v1742_v27, %v1922_v11  ;;  %v1064_v33 = vcombine.high %v1742_v27, %v1742_v27 }
 0x2a7   : > { %v1079_v31 = vcombine.high %v1071_v30, %v1071_v30  ;;  %v1078_v37 = vrot.slane %v1064_v33, %v1922_v11  ;;  %v1087_v38 = vrot.slane %v1071_v30, %v1922_v11 }
 0x2a8   : > { %1041 = vbcast.lane.b32.xlu0 %v1039_v54, 256  ;;  %986 = vbcast.lane.b32.xlu1 %v984_v56, 256 }
 0x2a9   : > { %v1101_v63 = vrot.slane %v1079_v31, %v1922_v11  ;;  %v1094_v42 = vrot.slane %v1078_v37, %v1922_v11  ;;  %v1116_v45 = vrot.slane %v1087_v38, %v1934_v22  ;;  %v1080_v48 = vcombine.high %v1078_v37, %v1078_v37 }
 0x2aa   : > { %v1109_v37 = vcombine.high %v1087_v38, %v1087_v38 }
 0x2ab   : > { %v1111_v41 = vcombine.high %v1101_v63, %v1101_v63  ;;  %v1108_v57 = vrot.slane %v1080_v48, %v1922_v11  ;;  %v1120_v30 = vrot.slane %v1101_v63, %v1934_v22  ;;  %v1110_v33 = vcombine.high %v1094_v42, %v1094_v42 }
 0x2ac   : > { %990 = vbcast.lane.b32.xlu1 %v984_v56, 264 }
 0x2ad   : > { %v1112_v48 = vcombine.high %v1108_v57, %v1108_v57 }
 0x2b0   : > { %1001 = vbcast.lane.b32.xlu1 %v995_v44, 264 }
 0x2b4   : > { %1012 = vbcast.lane.b32.xlu1 %v1006_v47, 264  ;;  %v2068_v47 = vrot.slane %v1111_v41, %v1934_v22 }
 0x2b8   : > { %1023 = vbcast.lane.b32.xlu1 %v1017_v9, 264 }
 0x2bc   : > { %1034 = vbcast.lane.b32.xlu1 %v1028_v51, 264  ;;  %v2072_v51 = vrot.slane %v1094_v42, %v1934_v22 }
 0x2c0   : > { %1045 = vbcast.lane.b32.xlu1 %v1039_v54, 264 }
 0x30a   : > { %v965_v2 = vpop.permute.xlu1 %964  ;;  %v998_v19 = vpop.permute.xlu0 %997 }
 0x30b   : > { %v1047_v44 = vmul.f32 %v1828_v4, %v965_v2  ;;  %v1053_v46 = vmul.f32 %v1850_v17, %v998_v19 }
 0x30d   : > { %v1153_v49 = vmul.f32 %v1116_v45, %v1047_v44  ;;  %v1159_v9 = vmul.f32 %v2068_v47, %v1053_v46  ;;  %v2087_v46 = vrot.slane %v1108_v57, %v1934_v22 }
 0x30e   : > { %v969_v1 = vpop.permute.xlu1 %968  ;;  %v1009_v50 = vpop.permute.xlu0 %1008 }
 0x30f   : > { %v1284_v52 = vmul.f32 %v1254_v61, %v1153_v49  ;;  %v1290_v53 = vmul.f32 %v2033_v10, %v1159_v9  ;;  %v1048_v54 = vmul.f32 %v1832_v6, %v969_v1  ;;  %v1055_v56 = vmul.f32 %v1855_v21, %v1009_v50 }
 0x310   : > { %v2099_v1 = vrot.slane %v1110_v33, %v1934_v22 }
 0x311   : > { %v1415_v58 = vadd.f32 %v1385_v23, %v1284_v52  ;;  %v1421_v18 = vadd.f32 %v2047_v28, %v1290_v53  ;;  %v1154_v0 = vmul.f32 %v1116_v45, %v1048_v54  ;;  %v1161_v12 = vmul.f32 %v2072_v51, %v1055_v56 }
 0x312   : > { %v976_v27 = vpop.permute.xlu1 %975  ;;  %v1020_v31 = vpop.permute.xlu0 %1019 }
 0x313   : > { %v1431_v41 = vadd.f32 %v1828_v4, %v1415_v58  ;;  %v1437_v2 = vadd.f32 %v1850_v17, %v1421_v18  ;;  %v1285_v19 = vmul.f32 %v1254_v61, %v1154_v0  ;;  %v1292_v11 = vmul.f32 %v2039_v7, %v1161_v12 }
 0x314   : > { %v1049_v44 = vmul.f32 %v1826_v3, %v976_v27  ;;  %v1057_v45 = vmul.f32 %v1863_v25, %v1020_v31  ;;  %v1124_v12 = vrot.slane %v1109_v37, %v1934_v22 }
 0x315   : > { %v1447_v63 = vmax.f32 %v1431_v41, 0.0  ;;  %v1453_v49 = vmax.f32 %v1437_v2, 0.0  ;;  %v1416_v9 = vadd.f32 %v1385_v23, %v1285_v19  ;;  %v1423_v38 = vadd.f32 %v2054_v32, %v1292_v11 }
 0x316   : > { %v1155_v4 = vmul.f32 %v1120_v30, %v1049_v44  ;;  %v1163_v17 = vmul.f32 %v2087_v46, %v1057_v45  ;;  %v980_v61 = vpop.permute.xlu1 %979  ;;  %v1031_v42 = vpop.permute.xlu0 %1030 }
 0x317   : > { %v1636_v23 = vpack.c.bf16 %v1447_v63, %v1447_v63  ;;  %v1642_v50 = vpack.c.bf16 %v1453_v49, %v1453_v49  ;;  %v1432_v52 = vadd.f32 %v1832_v6, %v1416_v9  ;;  %v1439_v53 = vadd.f32 %v1855_v21, %v1423_v38 }
 0x318   : > { %v1286_v54 = vmul.f32 %v2031_v60, %v1155_v4  ;;  %v1294_v56 = vmul.f32 %v2037_v26, %v1163_v17  ;;  %v1050_v57 = vmul.f32 %v1830_v5, %v980_v61  ;;  %v1059_v58 = vmul.f32 %v1880_v40, %v1031_v42 }
 0x319   : > { %1528 = vst.msk [vmem:[%s2095_s15] sm:$0xf] %vm1527_vm13, %v1636_v23  ;;  %1534 = vst.msk [vmem:[%s2095_s15 + $0x18] sm:$0xf] %vm1527_vm13, %v1642_v50  ;;  %v1448_v18 = vmax.f32 %v1432_v52, 0.0  ;;  %v1455_v0 = vmax.f32 %v1439_v53, 0.0  ;;  %v2113_v6 = vrot.slane %v1112_v48, %v1934_v22 }
 0x31a   : > { %v1417_v21 = vadd.f32 %v2045_v34, %v1286_v54  ;;  %v1425_v27 = vadd.f32 %v2052_v43, %v1294_v56  ;;  %v1156_v31 = vmul.f32 %v1120_v30, %v1050_v57  ;;  %v1165_v33 = vmul.f32 %v2099_v1, %v1059_v58  ;;  %v987_v41 = vpop.permute.xlu1 %986  ;;  %v1042_v2 = vpop.permute.xlu0 %1041 }
 0x31b   : > { %v1637_v19 = vpack.c.bf16 %v1448_v18, %v1448_v18  ;;  %v1644_v11 = vpack.c.bf16 %v1455_v0, %v1455_v0  ;;  %v1051_v44 = vmul.f32 %v1844_v13, %v987_v41  ;;  %v1061_v37 = vmul.f32 %v1889_v59, %v1042_v2 }
 0x31c   : > { %v1433_v45 = vadd.f32 %v1826_v3, %v1417_v21  ;;  %v1441_v22 = vadd.f32 %v1863_v25, %v1425_v27  ;;  %v1287_v48 = vmul.f32 %v2031_v60, %v1156_v31  ;;  %v1296_v63 = vmul.f32 %v2043_v15, %v1165_v33 }
 0x31d   : > { %1529 = vst.msk [vmem:[%s2095_s15 + $0x4] sm:$0xf] %vm1527_vm13, %v1637_v19  ;;  %1536 = vst.msk [vmem:[%s2095_s15 + $0x20] sm:$0xf] %vm1527_vm13, %v1644_v11  ;;  %v1157_v30 = vmul.f32 %v1124_v12, %v1051_v44  ;;  %v1167_v49 = vmul.f32 %v2113_v6, %v1061_v37 }
 0x31e   : > { %v1449_v9 = vmax.f32 %v1433_v45, 0.0  ;;  %v1457_v38 = vmax.f32 %v1441_v22, 0.0  ;;  %v1418_v4 = vadd.f32 %v2045_v34, %v1287_v48  ;;  %v1427_v3 = vadd.f32 %v2059_v36, %v1296_v63  ;;  %v991_v25 = vpop.permute.xlu1 %990 }
 0x31f   : > { %v1288_v60 = vmul.f32 %v2035_v62, %v1157_v30  ;;  %v1298_v17 = vmul.f32 %v2041_v14, %v1167_v49  ;;  %v1052_v61 = vmul.f32 %v1835_v8, %v991_v25 }
 0x320   : > { %v1638_v42 = vpack.c.bf16 %v1449_v9, %v1449_v9  ;;  %v1646_v23 = vpack.c.bf16 %v1457_v38, %v1457_v38  ;;  %v1434_v50 = vadd.f32 %v1830_v5, %v1418_v4  ;;  %v1443_v52 = vadd.f32 %v1880_v40, %v1427_v3 }
 0x321   : > { %v1419_v53 = vadd.f32 %v2049_v29, %v1288_v60  ;;  %v1429_v54 = vadd.f32 %v2057_v35, %v1298_v17  ;;  %v1158_v34 = vmul.f32 %v1124_v12, %v1052_v61 }
 0x322   : > { %1530 = vst.msk [vmem:[%s2095_s15 + $0x8] sm:$0xf] %vm1527_vm13, %v1638_v42  ;;  %1538 = vst.msk [vmem:[%s2095_s15 + $0x28] sm:$0xf] %vm1527_vm13, %v1646_v23  ;;  %v1450_v56 = vmax.f32 %v1434_v50, 0.0  ;;  %v1459_v57 = vmax.f32 %v1443_v52, 0.0  ;;  %v1002_v58 = vpop.permute.xlu1 %1001 }
 0x323   : > { %v1435_v18 = vadd.f32 %v1844_v13, %v1419_v53  ;;  %v1445_v5 = vadd.f32 %v1889_v59, %v1429_v54  ;;  %v1289_v40 = vmul.f32 %v2035_v62, %v1158_v34  ;;  %v1054_v0 = vmul.f32 %v1848_v16, %v1002_v58 }
 0x324   : > { %v1639_v12 = vpack.c.bf16 %v1450_v56, %v1450_v56  ;;  %v1648_v21 = vpack.c.bf16 %v1459_v57, %v1459_v57 }
 0x325   : > { %v1451_v27 = vmax.f32 %v1435_v18, 0.0  ;;  %v1461_v31 = vmax.f32 %v1445_v5, 0.0  ;;  %v1420_v33 = vadd.f32 %v2049_v29, %v1289_v40  ;;  %v1160_v41 = vmul.f32 %v2068_v47, %v1054_v0 }
 0x326   : > { %1531 = vst.msk [vmem:[%s2095_s15 + $0xc] sm:$0xf] %vm1527_vm13, %v1639_v12  ;;  %1540 = vst.msk [vmem:[%s2095_s15 + $0x30] sm:$0xf] %vm1527_vm13, %v1648_v21  ;;  %v1013_v13 = vpop.permute.xlu1 %1012 }
 0x327   : > { %v1640_v59 = vpack.c.bf16 %v1451_v27, %v1451_v27  ;;  %v1650_v62 = vpack.c.bf16 %v1461_v31, %v1461_v31  ;;  %v1436_v2 = vadd.f32 %v1835_v8, %v1420_v33  ;;  %v1291_v19 = vmul.f32 %v2033_v10, %v1160_v41 }
 0x328   : > { %v1056_v11 = vmul.f32 %v1853_v20, %v1013_v13 }
 0x329   : > { %1532 = vst.msk [vmem:[%s2095_s15 + $0x10] sm:$0xf] %vm1527_vm13, %v1640_v59  ;;  %1542 = vst.msk [vmem:[%s2095_s15 + $0x38] sm:$0xf] %vm1527_vm13, %v1650_v62  ;;  %v1452_v29 = vmax.f32 %v1436_v2, 0.0  ;;  %v1422_v47 = vadd.f32 %v2047_v28, %v1291_v19 }
 0x32a   : > { %v1162_v44 = vmul.f32 %v2072_v51, %v1056_v11  ;;  %v1024_v37 = vpop.permute.xlu1 %1023 }
 0x32b   : > { %v1641_v45 = vpack.c.bf16 %v1452_v29, %v1452_v29  ;;  %v1438_v22 = vadd.f32 %v1848_v16, %v1422_v47  ;;  %v1058_v8 = vmul.f32 %v1861_v24, %v1024_v37 }
 0x32c   : > { %v1293_v10 = vmul.f32 %v2039_v7, %v1162_v44 }
 0x32d   : > { %1533 = vst.msk [vmem:[%s2095_s15 + $0x14] sm:$0xf] %vm1527_vm13, %v1641_v45  ;;  %v1454_v48 = vmax.f32 %v1438_v22, 0.0  ;;  %v1164_v63 = vmul.f32 %v2087_v46, %v1058_v8 }
 0x32e   : > { %v1424_v30 = vadd.f32 %v2054_v32, %v1293_v10  ;;  %v1035_v49 = vpop.permute.xlu1 %1034 }
 0x32f   : > { %v1643_v28 = vpack.c.bf16 %v1454_v48, %v1454_v48  ;;  %v1295_v51 = vmul.f32 %v2037_v26, %v1164_v63  ;;  %v1060_v9 = vmul.f32 %v1878_v39, %v1035_v49 }
 0x330   : > { %v1440_v16 = vadd.f32 %v1853_v20, %v1424_v30 }
 0x331   : > { %1535 = vst.msk [vmem:[%s2095_s15 + $0x1c] sm:$0xf] %vm1527_vm13, %v1643_v28  ;;  %v1426_v7 = vadd.f32 %v2052_v43, %v1295_v51  ;;  %v1166_v38 = vmul.f32 %v2099_v1, %v1060_v9 }
 0x332   : > { %v1456_v4 = vmax.f32 %v1440_v16, 0.0  ;;  %v1046_v46 = vpop.permute.xlu1 %1045 }
 0x333   : > { %v1442_v32 = vadd.f32 %v1861_v24, %v1426_v7  ;;  %v1297_v3 = vmul.f32 %v2043_v15, %v1166_v38  ;;  %v1062_v26 = vmul.f32 %v1887_v55, %v1046_v46 }
 0x334   : > { %v1645_v25 = vpack.c.bf16 %v1456_v4, %v1456_v4 }
 0x335   : > { %v1458_v60 = vmax.f32 %v1442_v32, 0.0  ;;  %v1428_v20 = vadd.f32 %v2059_v36, %v1297_v3  ;;  %v1168_v17 = vmul.f32 %v2113_v6, %v1062_v26 }
 0x336   : > { %1537 = vst.msk [vmem:[%s2095_s15 + $0x24] sm:$0xf] %vm1527_vm13, %v1645_v25 }
 0x337   : > { %v1647_v43 = vpack.c.bf16 %v1458_v60, %v1458_v60  ;;  %v1444_v1 = vadd.f32 %v1878_v39, %v1428_v20  ;;  %v1299_v61 = vmul.f32 %v2041_v14, %v1168_v17 }
 0x339   : > { %1539 = vst.msk [vmem:[%s2095_s15 + $0x2c] sm:$0xf] %vm1527_vm13, %v1647_v43  ;;  %v1460_v24 = vmax.f32 %v1444_v1, 0.0  ;;  %v1430_v15 = vadd.f32 %v2057_v35, %v1299_v61 }
 0x33b   : > { %v1649_v42 = vpack.c.bf16 %v1460_v24, %v1460_v24  ;;  %v1446_v23 = vadd.f32 %v1887_v55, %v1430_v15 }
 0x33d   : > { %1541 = vst.msk [vmem:[%s2095_s15 + $0x34] sm:$0xf] %vm1527_vm13, %v1649_v42  ;;  %v1462_v36 = vmax.f32 %v1446_v23, 0.0 }
 0x33f   : > { %v1651_v50 = vpack.c.bf16 %v1462_v36, %v1462_v36 }
 0x341   : > { %1543 = vst.msk [vmem:[%s2095_s15 + $0x3c] sm:$0xf] %vm1527_vm13, %v1651_v50 }
 0x342 PF: > { %s19_s30 = sadd.s32 1, %s1749_s30  }
 0x343   : > { %p16_p4 = scmp.ge.s32.totalorder %s19_s30, 4  }
 0x345   :  { %18 = sbr.rel (!%p16_p4) target bundleno = 1 (0x1), region = 86 }

// kernel: efficient_gcn_forward.11
= control target key start
LH: loop header
LB: loop body
LE: loop exit
PB: predicated region body
PF: predicated region fallthrough
CT: control target
= control target key end

     0   :  { %s1309_s12 = smov 0   ;;  %s1311_s13 = smov 0   ;;  %s1617_s0 = inlined_call_operand.vmem [shape: bf16[2,128,16], index: 0, kind: input, shape index: {}]   ;;  %s1618_s1 = inlined_call_operand.vmem [shape: bf16[256,128], index: 1, kind: input, shape index: {}]   ;;  %s1619_s2 = inlined_call_operand.vmem [shape: f32[256,1], index: 2, kind: input, shape index: {}]   ;;  %s1620_s3 = inlined_call_operand.vmem [shape: bf16[2,256,16], index: 3, kind: output, shape index: {}]  }
   0x1   :  { %s1313_s14 = smov 0  }
   0x2 LB: > { %s25_s15 = sadd.s32 1, %s1282_s13  ;;  %p1028_p0 = scmp.ge.s32.totalorder %s1286_s14, 1  ;;  %s1286_s14 = sphi %s1313_s14, %s13_s14   ;;  %s1282_s13 = sphi %s1311_s13, %s1622_s13   ;;  %s1278_s12 = sphi %s1309_s12, %s1621_s12  }
   0x3   : > { %p27_p1 = scmp.ge.s32.totalorder %s25_s15, 2  ;;  %p156_p2 = scmp.lt.s32.totalorder %s1286_s14, 3 }
   0x5   : > { %s1624_s15 = smov (%p27_p1, %s25_s15), 0  ;;  %p157_p3 = pnand %p1028_p0, %p156_p2 }
   0x6   : > { %p186_p4 = scmp.lt.s32.totalorder (!%p157_p3), %s1278_s12, 1  ;;  %v253_v0 = vld [vmem:[%s1619_s2 + $0x10] sm:$0xff] (!%p157_p3)  ;;  %v251_v1 = vld [vmem:[%s1619_s2] sm:$0xff] (!%p157_p3)  ;;  %v1288_v2 = vmov (!%p157_p3), 0   ;;  %v254_v3 = vld [vmem:[%s1619_s2 + $0x18] sm:$0xff] (!%p157_p3)  ;;  %vm908_vm0 = vcmask (!%p157_p3), 125952  }
   0x7   : > { %160 = sbr.rel (%p157_p3) target bundleno = 296 (0x128), region = 32  ;;  %1239 = vset.pattern.permute.xlu1 (!%p157_p3), %v1288_v2  ;;  %1238 = vset.pattern.permute.xlu0 (!%p157_p3), %v1288_v2  ;;  %v252_v4 = vld [vmem:[%s1619_s2 + $0x8] sm:$0xff] (!%p157_p3)  ;;  %v1248_v5 = vld [vmem:[%s1618_s1] sm:$0xff] (!%p157_p3)   ;;  %v258_v13 = vld [vmem:[%s1619_s2 + $0x38] sm:$0xff] (!%p157_p3) }
   0x8   : > { %295 = vperm.xlu1 (!%p157_p3), %1239, %v253_v0   ;;  %285 = vperm.xlu0 (!%p157_p3), %1238, %v251_v1   ;;  %v1249_v6 = vld [vmem:[%s1618_s1 + $0x40] sm:$0xff] (!%p157_p3)   ;;  %v256_v8 = vld [vmem:[%s1619_s2 + $0x28] sm:$0xff] (!%p157_p3)  ;;  %v257_v14 = vld [vmem:[%s1619_s2 + $0x30] sm:$0xff] (!%p157_p3) }
   0x9   : > { %1165 = vmatprep.mubr.bf16.mxu0 (!%p157_p3), %v1248_v5  ;;  %1181 = vmatprep.mubr.bf16.mxu1 (!%p157_p3), %v1249_v6  ;;  %v255_v10 = vld [vmem:[%s1619_s2 + $0x20] sm:$0xff] (!%p157_p3)  ;;  %v260_v15 = vld [vmem:[%s1619_s2 + $0x48] sm:$0xff] (!%p157_p3)  ;;  %v262_v18 = vld [vmem:[%s1619_s2 + $0x58] sm:$0xff] (!%p157_p3) }
   0xa   : > { %v259_v16 = vld [vmem:[%s1619_s2 + $0x40] sm:$0xff] (!%p157_p3)  ;;  %v261_v19 = vld [vmem:[%s1619_s2 + $0x50] sm:$0xff] (!%p157_p3)  ;;  %v264_v21 = vld [vmem:[%s1619_s2 + $0x68] sm:$0xff] (!%p157_p3) }
   0xb   : > { %v263_v22 = vld [vmem:[%s1619_s2 + $0x60] sm:$0xff] (!%p157_p3)  ;;  %v266_v24 = vld [vmem:[%s1619_s2 + $0x78] sm:$0xff] (!%p157_p3)  ;;  %v265_v25 = vld [vmem:[%s1619_s2 + $0x70] sm:$0xff] (!%p157_p3) }
   0xc   : > { %300 = vperm.xlu1 (!%p157_p3), %1239, %v254_v3   ;;  %290 = vperm.xlu0 (!%p157_p3), %1238, %v252_v4   ;;  %v268_v27 = vld [vmem:[%s1619_s2 + $0x88] sm:$0xff] (!%p157_p3)  ;;  %v267_v28 = vld [vmem:[%s1619_s2 + $0x80] sm:$0xff] (!%p157_p3)  ;;  %v270_v31 = vld [vmem:[%s1619_s2 + $0x98] sm:$0xff] (!%p157_p3) }
   0xd   : > { %v1250_v29 = vld [vmem:[%s1618_s1 + $0x8] sm:$0xff] (!%p157_p3)   ;;  %v269_v32 = vld [vmem:[%s1619_s2 + $0x90] sm:$0xff] (!%p157_p3)  ;;  %v271_v36 = vld [vmem:[%s1619_s2 + $0xa0] sm:$0xff] (!%p157_p3) }
   0xe   : > { %s1626_s12 = smov (!%p186_p4, %s1278_s12), 1  ;;  %v1251_v30 = vld [vmem:[%s1618_s1 + $0x48] sm:$0xff]   ;;  %v1252_v33 = vld [vmem:[%s1618_s1 + $0x10] sm:$0xff]   ;;  %v1254_v37 = vld [vmem:[%s1618_s1 + $0x18] sm:$0xff]  }
   0xf   : > { %s1091_s28 = sshll.u32 %s1626_s12, 6  ;;  %v1253_v34 = vld [vmem:[%s1618_s1 + $0x50] sm:$0xff]   ;;  %v272_v35 = vld [vmem:[%s1619_s2 + $0xa8] sm:$0xff]  ;;  %v1255_v38 = vld [vmem:[%s1618_s1 + $0x58] sm:$0xff]   ;;  %s1092_s24 = sshll.u32 %s1626_s12, 7 }
  0x10   : > { %s1351_s4 = scalar_lea.vmem %s1617_s0, %s1091_s28  ;;  %310 = vperm.xlu1 %1239, %v256_v8   ;;  %305 = vperm.xlu0 %1238, %v255_v10   ;;  %v274_v39 = vld [vmem:[%s1619_s2 + $0xb8] sm:$0xff]  ;;  %v273_v40 = vld [vmem:[%s1619_s2 + $0xb0] sm:$0xff]  ;;  %v1256_v41 = vld [vmem:[%s1618_s1 + $0x20] sm:$0xff]   ;;  %s1521_s27 = scalar_lea.vmem %s1620_s3, %s1092_s24 }
  0x11   : > { %v1240_v7 = vld [vmem:[%s1351_s4] sm:$0xff]   ;;  %v1241_v9 = vld [vmem:[%s1351_s4 + $0x8] sm:$0xff]   ;;  %v1242_v11 = vld [vmem:[%s1351_s4 + $0x10] sm:$0xff]  }
  0x12   : > { %1149 = vmatprep.subr.bf16.mxu0 %v1240_v7  ;;  %1197 = vmatprep.subr.bf16.mxu1 %v1240_v7  ;;  %v1243_v12 = vld [vmem:[%s1351_s4 + $0x18] sm:$0xff]   ;;  %v1244_v17 = vld [vmem:[%s1351_s4 + $0x20] sm:$0xff]   ;;  %v1245_v20 = vld [vmem:[%s1351_s4 + $0x28] sm:$0xff]  }
  0x13   : > { %1150 = vmatpush3.bf16.msra.mxu0 %v1240_v7  ;;  %1205 = vmatpush3.bf16.msra.mxu1 %v1240_v7  ;;  %v1246_v23 = vld [vmem:[%s1351_s4 + $0x30] sm:$0xff]   ;;  %v1247_v26 = vld [vmem:[%s1351_s4 + $0x38] sm:$0xff]   ;;  %v1257_v42 = vld [vmem:[%s1618_s1 + $0x60] sm:$0xff]  }
  0x14   : > { %1151 = vmatprep.subr.bf16.mxu0 %v1241_v9  ;;  %1198 = vmatprep.subr.bf16.mxu1 %v1241_v9  ;;  %v276_v43 = vld [vmem:[%s1619_s2 + $0xc8] sm:$0xff]  ;;  %v275_v44 = vld [vmem:[%s1619_s2 + $0xc0] sm:$0xff]  ;;  %v278_v47 = vld [vmem:[%s1619_s2 + $0xd8] sm:$0xff] }
  0x15   : > { %320 = vperm.xlu1 %1239, %v258_v13   ;;  %315 = vperm.xlu0 %1238, %v257_v14   ;;  %v1258_v45 = vld [vmem:[%s1618_s1 + $0x28] sm:$0xff]   ;;  %v277_v48 = vld [vmem:[%s1619_s2 + $0xd0] sm:$0xff]  ;;  %v279_v52 = vld [vmem:[%s1619_s2 + $0xe0] sm:$0xff] }
  0x16   : > { %v1259_v46 = vld [vmem:[%s1618_s1 + $0x68] sm:$0xff]   ;;  %v1260_v49 = vld [vmem:[%s1618_s1 + $0x30] sm:$0xff]   ;;  %v1262_v53 = vld [vmem:[%s1618_s1 + $0x38] sm:$0xff]  }
  0x17   : > { %1152 = vmatpush3.bf16.msra.mxu0 %v1241_v9  ;;  %1206 = vmatpush3.bf16.msra.mxu1 %v1241_v9  ;;  %v1261_v50 = vld [vmem:[%s1618_s1 + $0x70] sm:$0xff]   ;;  %v280_v51 = vld [vmem:[%s1619_s2 + $0xe8] sm:$0xff]  ;;  %v1263_v54 = vld [vmem:[%s1618_s1 + $0x78] sm:$0xff]  }
  0x18   : > { %1153 = vmatprep.subr.bf16.mxu0 %v1242_v11  ;;  %1199 = vmatprep.subr.bf16.mxu1 %v1242_v11  ;;  %v282_v55 = vld [vmem:[%s1619_s2 + $0xf8] sm:$0xff]  ;;  %v281_v56 = vld [vmem:[%s1619_s2 + $0xf0] sm:$0xff] }
  0x19   : > { %330 = vperm.xlu1 %1239, %v260_v15   ;;  %325 = vperm.xlu0 %1238, %v259_v16  }
  0x1b   : > { %1154 = vmatpush3.bf16.msra.mxu0 %v1242_v11  ;;  %1207 = vmatpush3.bf16.msra.mxu1 %v1242_v11 }
  0x1c   : > { %1155 = vmatprep.subr.bf16.mxu0 %v1243_v12  ;;  %1200 = vmatprep.subr.bf16.mxu1 %v1243_v12 }
  0x1d   : > { %340 = vperm.xlu1 %1239, %v262_v18   ;;  %335 = vperm.xlu0 %1238, %v261_v19  }
  0x1f   : > { %1156 = vmatpush3.bf16.msra.mxu0 %v1243_v12  ;;  %1208 = vmatpush3.bf16.msra.mxu1 %v1243_v12 }
  0x20   : > { %1157 = vmatprep.subr.bf16.mxu0 %v1244_v17  ;;  %1201 = vmatprep.subr.bf16.mxu1 %v1244_v17 }
  0x21   : > { %350 = vperm.xlu1 %1239, %v264_v21   ;;  %345 = vperm.xlu0 %1238, %v263_v22  }
  0x23   : > { %1158 = vmatpush3.bf16.msra.mxu0 %v1244_v17  ;;  %1209 = vmatpush3.bf16.msra.mxu1 %v1244_v17 }
  0x24   : > { %1159 = vmatprep.subr.bf16.mxu0 %v1245_v20  ;;  %1202 = vmatprep.subr.bf16.mxu1 %v1245_v20 }
  0x25   : > { %360 = vperm.xlu1 %1239, %v266_v24   ;;  %355 = vperm.xlu0 %1238, %v265_v25  }
  0x27   : > { %1160 = vmatpush3.bf16.msra.mxu0 %v1245_v20  ;;  %1210 = vmatpush3.bf16.msra.mxu1 %v1245_v20 }
  0x28   : > { %1161 = vmatprep.subr.bf16.mxu0 %v1246_v23  ;;  %1203 = vmatprep.subr.bf16.mxu1 %v1246_v23 }
  0x29   : > { %370 = vperm.xlu1 %1239, %v268_v27   ;;  %365 = vperm.xlu0 %1238, %v267_v28  }
  0x2b   : > { %1162 = vmatpush3.bf16.msra.mxu0 %v1246_v23  ;;  %1211 = vmatpush3.bf16.msra.mxu1 %v1246_v23 }
  0x2c   : > { %1163 = vmatprep.subr.bf16.mxu0 %v1247_v26  ;;  %1204 = vmatprep.subr.bf16.mxu1 %v1247_v26 }
  0x2d   : > { %380 = vperm.xlu1 %1239, %v270_v31   ;;  %375 = vperm.xlu0 %1238, %v269_v32  }
  0x2f   : > { %1164 = vmatpush3.bf16.msra.mxu0 %v1247_v26  ;;  %1212 = vmatpush3.bf16.msra.mxu1 %v1247_v26 }
  0x31   : > { %390 = vperm.xlu1 %1239, %v272_v35   ;;  %385 = vperm.xlu0 %1238, %v271_v36  }
  0x32   : > { %1166 = vmatmul.mubr.bf16.vlgmr.msra.gmra.mrb[0].mxu0 %v1250_v29  ;;  %1182 = vmatmul.mubr.bf16.vlgmr.msra.gmra.mrb[0].mxu1 %v1251_v30 }
  0x33   : > { %1169 = vmatprep.mubr.bf16.mxu0 %v1252_v33  ;;  %1185 = vmatprep.mubr.bf16.mxu1 %v1253_v34 }
  0x35   : > { %400 = vperm.xlu1 %1239, %v274_v39   ;;  %395 = vperm.xlu0 %1238, %v273_v40  }
  0x39   : > { %410 = vperm.xlu1 %1239, %v276_v43   ;;  %405 = vperm.xlu0 %1238, %v275_v44  }
  0x3a   : > { %1170 = vmatmul.mubr.bf16.gmra.mrb[4].mxu0 %v1254_v37  ;;  %1186 = vmatmul.mubr.bf16.gmra.mrb[4].mxu1 %v1255_v38 }
  0x3b   : > { %1173 = vmatprep.mubr.bf16.mxu0 %v1256_v41  ;;  %1189 = vmatprep.mubr.bf16.mxu1 %v1257_v42 }
  0x3d   : > { %420 = vperm.xlu1 %1239, %v278_v47   ;;  %415 = vperm.xlu0 %1238, %v277_v48  }
  0x41   : > { %430 = vperm.xlu1 %1239, %v280_v51   ;;  %425 = vperm.xlu0 %1238, %v279_v52  }
  0x42   : > { %1174 = vmatmul.mubr.bf16.gmra.mrb[8].mxu0 %v1258_v45  ;;  %1190 = vmatmul.mubr.bf16.gmra.mrb[8].mxu1 %v1259_v46 }
  0x43   : > { %1177 = vmatprep.mubr.bf16.mxu0 %v1260_v49  ;;  %1193 = vmatprep.mubr.bf16.mxu1 %v1261_v50 }
  0x45   : > { %440 = vperm.xlu1 %1239, %v282_v55   ;;  %435 = vperm.xlu0 %1238, %v281_v56  }
  0x4a   : > { %1178 = vmatmul.mubr.bf16.gmra.mrb[12].mxu0 %v1262_v53  ;;  %1194 = vmatmul.mubr.bf16.gmra.mrb[12].mxu1 %v1263_v54 }
  0x87   : > { %v296_v57 = vpop.permute.xlu1 %295  ;;  %v286_v58 = vpop.permute.xlu0 %285 }
  0x8b   : > { %v301_v59 = vpop.permute.xlu1 %300  ;;  %v291_v60 = vpop.permute.xlu0 %290 }
  0x8f   : > { %v1487_v61 = vpop.permute.xlu1 %310  ;;  %v1489_v62 = vpop.permute.xlu0 %305 }
  0x94   : > { %v1491_v63 = vpop.permute.xlu1 %320  ;;  %v1493_v0 = vpop.permute.xlu0 %315 }
  0x98   : > { %v1495_v1 = vpop.permute.xlu1 %330  ;;  %v1497_v2 = vpop.permute.xlu0 %325 }
  0x9c   : > { %v1499_v3 = vpop.permute.xlu1 %340  ;;  %v1501_v4 = vpop.permute.xlu0 %335 }
  0xa0   : > { %v1503_v5 = vpop.permute.xlu1 %350  ;;  %v1505_v6 = vpop.permute.xlu0 %345 }
  0xa4   : > { %v1507_v7 = vpop.permute.xlu1 %360  ;;  %v1509_v8 = vpop.permute.xlu0 %355 }
  0xa8   : > { %v371_v9 = vpop.permute.xlu1 %370  ;;  %v366_v10 = vpop.permute.xlu0 %365 }
  0xac   : > { %v381_v11 = vpop.permute.xlu1 %380  ;;  %v376_v12 = vpop.permute.xlu0 %375 }
  0xb0   : > { %v1511_v13 = vpop.permute.xlu1 %390  ;;  %v386_v14 = vpop.permute.xlu0 %385 }
  0xb4   : > { %v401_v15 = vpop.permute.xlu1 %400  ;;  %v396_v16 = vpop.permute.xlu0 %395 }
  0xb8   : > { %v1513_v17 = vpop.permute.xlu1 %410  ;;  %v1515_v18 = vpop.permute.xlu0 %405 }
  0xbc   : > { %v1523_v47 = vpop.permute.xlu1 %420  ;;  %v416_v48 = vpop.permute.xlu0 %415 }
 0x105   : > { %v1167_v19 = vpop.f32.mrb[0].mxu0  ;;  %v1183_v20 = vpop.f32.mrb[0].mxu1 }
 0x106   : > { %v630_v21 = vadd.f32 %v1167_v19, %v296_v57  ;;  %v694_v22 = vadd.f32 %v1183_v20, %v376_v12  ;;  %v621_v23 = vpop.f32.mrb[1].mxu0  ;;  %v685_v24 = vpop.f32.mrb[1].mxu1 }
 0x107   : > { %v622_v25 = vadd.f32 %v621_v23, %v286_v58  ;;  %v686_v26 = vadd.f32 %v685_v24, %v366_v10  ;;  %v1168_v27 = vpop.f32.mrb[2].mxu0  ;;  %v1184_v28 = vpop.f32.mrb[2].mxu1 }
 0x108   : > { %v750_v29 = vmax.f32 %v630_v21, 0.0  ;;  %v766_v30 = vmax.f32 %v694_v22, 0.0  ;;  %v633_v31 = vadd.f32 %v1168_v27, %v301_v59  ;;  %v697_v32 = vadd.f32 %v1184_v28, %v381_v11  ;;  %v624_v33 = vpop.f32.mrb[3].mxu0  ;;  %v688_v34 = vpop.f32.mrb[3].mxu1 }
 0x109   : > { %v748_v35 = vmax.f32 %v622_v25, 0.0  ;;  %v764_v36 = vmax.f32 %v686_v26, 0.0  ;;  %v625_v37 = vadd.f32 %v624_v33, %v291_v60  ;;  %v689_v38 = vadd.f32 %v688_v34, %v371_v9 }
 0x10a   : > { %v1095_v39 = vpack.c.bf16 %v750_v29, %v750_v29  ;;  %v1111_v40 = vpack.c.bf16 %v766_v30, %v766_v30  ;;  %v751_v41 = vmax.f32 %v633_v31, 0.0  ;;  %v767_v42 = vmax.f32 %v697_v32, 0.0  ;;  %v1546_v29 = vpop.permute.xlu1 %430  ;;  %v426_v30 = vpop.permute.xlu0 %425 }
 0x10b   : > { %v1093_v43 = vpack.c.bf16 %v748_v35, %v748_v35  ;;  %v1109_v44 = vpack.c.bf16 %v764_v36, %v764_v36  ;;  %v749_v45 = vmax.f32 %v625_v37, 0.0  ;;  %v765_v46 = vmax.f32 %v689_v38, 0.0 }
 0x10c   : > { %911 = vst.msk [vmem:[%s1521_s27 + $0x8] sm:$0xf] %vm908_vm0, %v1095_v39  ;;  %927 = vst.msk [vmem:[%s1521_s27 + $0x48] sm:$0xf] %vm908_vm0, %v1111_v40  ;;  %v1096_v49 = vpack.c.bf16 %v751_v41, %v751_v41  ;;  %v1112_v50 = vpack.c.bf16 %v767_v42, %v767_v42 }
 0x10d   : > { %909 = vst.msk [vmem:[%s1521_s27] sm:$0xf] %vm908_vm0, %v1093_v43  ;;  %925 = vst.msk [vmem:[%s1521_s27 + $0x40] sm:$0xf] %vm908_vm0, %v1109_v44  ;;  %v1094_v51 = vpack.c.bf16 %v749_v45, %v749_v45  ;;  %v1110_v52 = vpack.c.bf16 %v765_v46, %v765_v46  ;;  %v1171_v53 = vpop.f32.mrb[4].mxu0  ;;  %v1187_v54 = vpop.f32.mrb[4].mxu1 }
 0x10e   : > { %912 = vst.msk [vmem:[%s1521_s27 + $0xc] sm:$0xf] %vm908_vm0, %v1096_v49  ;;  %928 = vst.msk [vmem:[%s1521_s27 + $0x4c] sm:$0xf] %vm908_vm0, %v1112_v50  ;;  %v646_v55 = vadd.f32 %v1171_v53, %v1493_v0  ;;  %v710_v56 = vadd.f32 %v1187_v54, %v396_v16  ;;  %v637_v57 = vpop.f32.mrb[5].mxu0  ;;  %v701_v58 = vpop.f32.mrb[5].mxu1 }
 0x10f   : > { %910 = vst.msk [vmem:[%s1521_s27 + $0x4] sm:$0xf] %vm908_vm0, %v1094_v51  ;;  %926 = vst.msk [vmem:[%s1521_s27 + $0x44] sm:$0xf] %vm908_vm0, %v1110_v52  ;;  %v638_v59 = vadd.f32 %v637_v57, %v1489_v62  ;;  %v702_v60 = vadd.f32 %v701_v58, %v386_v14  ;;  %v1172_v9 = vpop.f32.mrb[6].mxu0  ;;  %v1188_v10 = vpop.f32.mrb[6].mxu1 }
 0x110   : > { %v754_v11 = vmax.f32 %v646_v55, 0.0  ;;  %v770_v12 = vmax.f32 %v710_v56, 0.0  ;;  %v649_v19 = vadd.f32 %v1172_v9, %v1491_v63  ;;  %v713_v20 = vadd.f32 %v1188_v10, %v401_v15  ;;  %v640_v21 = vpop.f32.mrb[7].mxu0  ;;  %v704_v0 = vpop.f32.mrb[7].mxu1 }
 0x111   : > { %v752_v16 = vmax.f32 %v638_v59, 0.0  ;;  %v768_v22 = vmax.f32 %v702_v60, 0.0  ;;  %v641_v23 = vadd.f32 %v640_v21, %v1487_v61  ;;  %v705_v24 = vadd.f32 %v704_v0, %v1511_v13  ;;  %v441_v57 = vpop.permute.xlu1 %440  ;;  %v436_v58 = vpop.permute.xlu0 %435 }
 0x112   : > { %v1099_v62 = vpack.c.bf16 %v754_v11, %v754_v11  ;;  %v1115_v14 = vpack.c.bf16 %v770_v12, %v770_v12  ;;  %v755_v25 = vmax.f32 %v649_v19, 0.0  ;;  %v771_v26 = vmax.f32 %v713_v20, 0.0 }
 0x113   : > { %v1097_v27 = vpack.c.bf16 %v752_v16, %v752_v16  ;;  %v1113_v63 = vpack.c.bf16 %v768_v22, %v768_v22  ;;  %v753_v15 = vmax.f32 %v641_v23, 0.0  ;;  %v769_v28 = vmax.f32 %v705_v24, 0.0 }
 0x114   : > { %915 = vst.msk [vmem:[%s1521_s27 + $0x18] sm:$0xf] %vm908_vm0, %v1099_v62  ;;  %931 = vst.msk [vmem:[%s1521_s27 + $0x58] sm:$0xf] %vm908_vm0, %v1115_v14  ;;  %v1100_v61 = vpack.c.bf16 %v755_v25, %v755_v25  ;;  %v1116_v13 = vpack.c.bf16 %v771_v26, %v771_v26 }
 0x115   : > { %913 = vst.msk [vmem:[%s1521_s27 + $0x10] sm:$0xf] %vm908_vm0, %v1097_v27  ;;  %929 = vst.msk [vmem:[%s1521_s27 + $0x50] sm:$0xf] %vm908_vm0, %v1113_v63  ;;  %v1098_v31 = vpack.c.bf16 %v753_v15, %v753_v15  ;;  %v1114_v32 = vpack.c.bf16 %v769_v28, %v769_v28  ;;  %v1175_v33 = vpop.f32.mrb[8].mxu0  ;;  %v1191_v34 = vpop.f32.mrb[8].mxu1 }
 0x116   : > { %916 = vst.msk [vmem:[%s1521_s27 + $0x1c] sm:$0xf] %vm908_vm0, %v1100_v61  ;;  %932 = vst.msk [vmem:[%s1521_s27 + $0x5c] sm:$0xf] %vm908_vm0, %v1116_v13  ;;  %v662_v35 = vadd.f32 %v1175_v33, %v1501_v4  ;;  %v726_v36 = vadd.f32 %v1191_v34, %v416_v48  ;;  %v653_v37 = vpop.f32.mrb[9].mxu0  ;;  %v717_v38 = vpop.f32.mrb[9].mxu1 }
 0x117   : > { %914 = vst.msk [vmem:[%s1521_s27 + $0x14] sm:$0xf] %vm908_vm0, %v1098_v31  ;;  %930 = vst.msk [vmem:[%s1521_s27 + $0x54] sm:$0xf] %vm908_vm0, %v1114_v32  ;;  %v654_v39 = vadd.f32 %v653_v37, %v1497_v2  ;;  %v718_v40 = vadd.f32 %v717_v38, %v1515_v18  ;;  %v1176_v41 = vpop.f32.mrb[10].mxu0  ;;  %v1192_v42 = vpop.f32.mrb[10].mxu1 }
 0x118   : > { %v758_v43 = vmax.f32 %v662_v35, 0.0  ;;  %v774_v44 = vmax.f32 %v726_v36, 0.0  ;;  %v665_v45 = vadd.f32 %v1176_v41, %v1499_v3  ;;  %v729_v46 = vadd.f32 %v1192_v42, %v1523_v47  ;;  %v656_v4 = vpop.f32.mrb[11].mxu0  ;;  %v720_v48 = vpop.f32.mrb[11].mxu1 }
 0x119   : > { %v756_v49 = vmax.f32 %v654_v39, 0.0  ;;  %v772_v50 = vmax.f32 %v718_v40, 0.0  ;;  %v657_v51 = vadd.f32 %v656_v4, %v1495_v1  ;;  %v721_v2 = vadd.f32 %v720_v48, %v1513_v17 }
 0x11a   : > { %v1103_v18 = vpack.c.bf16 %v758_v43, %v758_v43  ;;  %v1119_v52 = vpack.c.bf16 %v774_v44, %v774_v44  ;;  %v759_v53 = vmax.f32 %v665_v45, 0.0  ;;  %v775_v54 = vmax.f32 %v729_v46, 0.0 }
 0x11b   : > { %v1101_v55 = vpack.c.bf16 %v756_v49, %v756_v49  ;;  %v1117_v3 = vpack.c.bf16 %v772_v50, %v772_v50  ;;  %v757_v47 = vmax.f32 %v657_v51, 0.0  ;;  %v773_v56 = vmax.f32 %v721_v2, 0.0 }
 0x11c   : > { %919 = vst.msk [vmem:[%s1521_s27 + $0x28] sm:$0xf] %vm908_vm0, %v1103_v18  ;;  %935 = vst.msk [vmem:[%s1521_s27 + $0x68] sm:$0xf] %vm908_vm0, %v1119_v52  ;;  %v1104_v1 = vpack.c.bf16 %v759_v53, %v759_v53  ;;  %v1120_v17 = vpack.c.bf16 %v775_v54, %v775_v54 }
 0x11d   : > { %917 = vst.msk [vmem:[%s1521_s27 + $0x20] sm:$0xf] %vm908_vm0, %v1101_v55  ;;  %933 = vst.msk [vmem:[%s1521_s27 + $0x60] sm:$0xf] %vm908_vm0, %v1117_v3  ;;  %v1102_v59 = vpack.c.bf16 %v757_v47, %v757_v47  ;;  %v1118_v60 = vpack.c.bf16 %v773_v56, %v773_v56  ;;  %v1179_v9 = vpop.f32.mrb[12].mxu0  ;;  %v1195_v10 = vpop.f32.mrb[12].mxu1 }
 0x11e   : > { %920 = vst.msk [vmem:[%s1521_s27 + $0x2c] sm:$0xf] %vm908_vm0, %v1104_v1  ;;  %936 = vst.msk [vmem:[%s1521_s27 + $0x6c] sm:$0xf] %vm908_vm0, %v1120_v17  ;;  %v678_v11 = vadd.f32 %v1179_v9, %v1509_v8  ;;  %v742_v12 = vadd.f32 %v1195_v10, %v436_v58  ;;  %v669_v19 = vpop.f32.mrb[13].mxu0  ;;  %v733_v20 = vpop.f32.mrb[13].mxu1 }
 0x11f   : > { %918 = vst.msk [vmem:[%s1521_s27 + $0x24] sm:$0xf] %vm908_vm0, %v1102_v59  ;;  %934 = vst.msk [vmem:[%s1521_s27 + $0x64] sm:$0xf] %vm908_vm0, %v1118_v60  ;;  %v670_v21 = vadd.f32 %v669_v19, %v1505_v6  ;;  %v734_v0 = vadd.f32 %v733_v20, %v426_v30  ;;  %v1180_v16 = vpop.f32.mrb[14].mxu0  ;;  %v1196_v22 = vpop.f32.mrb[14].mxu1 }
 0x120   : > { %v762_v23 = vmax.f32 %v678_v11, 0.0  ;;  %v778_v24 = vmax.f32 %v742_v12, 0.0  ;;  %v681_v62 = vadd.f32 %v1180_v16, %v1507_v7  ;;  %v745_v14 = vadd.f32 %v1196_v22, %v441_v57  ;;  %v672_v8 = vpop.f32.mrb[15].mxu0  ;;  %v736_v25 = vpop.f32.mrb[15].mxu1 }
 0x121   : > { %v760_v26 = vmax.f32 %v670_v21, 0.0  ;;  %v776_v27 = vmax.f32 %v734_v0, 0.0  ;;  %v673_v63 = vadd.f32 %v672_v8, %v1503_v5  ;;  %v737_v6 = vadd.f32 %v736_v25, %v1546_v29 }
 0x122   : > { %v1107_v15 = vpack.c.bf16 %v762_v23, %v762_v23  ;;  %v1123_v28 = vpack.c.bf16 %v778_v24, %v778_v24  ;;  %v763_v30 = vmax.f32 %v681_v62, 0.0  ;;  %v779_v7 = vmax.f32 %v745_v14, 0.0 }
 0x123   : > { %v1105_v61 = vpack.c.bf16 %v760_v26, %v760_v26  ;;  %v1121_v13 = vpack.c.bf16 %v776_v27, %v776_v27  ;;  %v761_v31 = vmax.f32 %v673_v63, 0.0  ;;  %v777_v32 = vmax.f32 %v737_v6, 0.0 }
 0x124   : > { %923 = vst.msk [vmem:[%s1521_s27 + $0x38] sm:$0xf] %vm908_vm0, %v1107_v15  ;;  %939 = vst.msk [vmem:[%s1521_s27 + $0x78] sm:$0xf] %vm908_vm0, %v1123_v28  ;;  %v1108_v33 = vpack.c.bf16 %v763_v30, %v763_v30  ;;  %v1124_v5 = vpack.c.bf16 %v779_v7, %v779_v7 }
 0x125   : > { %921 = vst.msk [vmem:[%s1521_s27 + $0x30] sm:$0xf] %vm908_vm0, %v1105_v61  ;;  %937 = vst.msk [vmem:[%s1521_s27 + $0x70] sm:$0xf] %vm908_vm0, %v1121_v13  ;;  %v1106_v29 = vpack.c.bf16 %v761_v31, %v761_v31  ;;  %v1122_v34 = vpack.c.bf16 %v777_v32, %v777_v32 }
 0x126   : > { %924 = vst.msk [vmem:[%s1521_s27 + $0x3c] sm:$0xf] %vm908_vm0, %v1108_v33  ;;  %940 = vst.msk [vmem:[%s1521_s27 + $0x7c] sm:$0xf] %vm908_vm0, %v1124_v5 }
 0x127   : > { %922 = vst.msk [vmem:[%s1521_s27 + $0x34] sm:$0xf] %vm908_vm0, %v1106_v29  ;;  %938 = vst.msk [vmem:[%s1521_s27 + $0x74] sm:$0xf] %vm908_vm0, %v1122_v34 }
 0x128 PF: > { %s13_s14 = sadd.s32 1, %s1286_s14   ;;  %s1621_s12 = smov %s1282_s13 }
 0x129   : > { %p10_p5 = scmp.ge.s32.totalorder %s13_s14, 4   ;;  %s1622_s13 = smov %s1624_s15 }
 0x12b   :  { %12 = sbr.rel (!%p10_p5) target bundleno = 2 (0x2), region = 62 }

// kernel: efficient_gcn_forward.12
= control target key start
LH: loop header
LB: loop body
LE: loop exit
PB: predicated region body
PF: predicated region fallthrough
CT: control target
= control target key end

     0   :  { %s654_s15 = smov 0   ;;  %s702_s0 = inlined_call_operand.vmem [shape: bf16[2,16,144], index: 0, kind: input, shape index: {}]   ;;  %s703_s1 = inlined_call_operand.vmem [shape: bf16[2,16,144], index: 1, kind: input, shape index: {}]   ;;  %s704_s2 = inlined_call_operand.vmem [shape: bf16[3,16,16], index: 2, kind: input, shape index: {}]   ;;  %s705_s3 = inlined_call_operand.vmem [shape: f32[16,1], index: 3, kind: input, shape index: {}]   ;;  %s706_s4 = inlined_call_operand.vmem [shape: bf16[2,16,128], index: 4, kind: output, shape index: {}]  }
   0x1 LB: > { %s525_s16 = sadd.s32 4294967295, %s623_s15   ;;  %p529_p0 = scmp.ge.s32.totalorder %s623_s15, 1  ;;  %s623_s15 = sphi %s654_s15, %s14_s15  }
   0x2   : > { %p172_p1 = scmp.lt.s32.totalorder %s623_s15, 3 }
   0x4   : > { %p173_p2 = pnand %p529_p0, %p172_p1 }
   0x5   : > { %p203_p3 = scmp.lt.s32.totalorder (!%p173_p2), %s525_s16, 1  ;;  %v625_v0 = vmov (!%p173_p2), 0.0   ;;  %vm626_vm0 = vmmov (!%p173_p2), 0   ;;  %v430_v1 = vld [vmem:[%s705_s3] sm:$0xff] (!%p173_p2)  ;;  %v627_v2 = vmov (!%p173_p2), 0   ;;  %v431_v8 = vld [vmem:[%s705_s3 + $0x8] sm:$0xff] (!%p173_p2) }
   0x6   : > { %176 = sbr.rel (%p173_p2) target bundleno = 367 (0x16f), region = 36  ;;  %569 = vmatprep.subr.bf16.mxu0 (!%p173_p2), %v625_v0  ;;  %571 = vmatprep.mubr.msk.bf16.mxu0 (!%p173_p2), %vm626_vm0, %v625_v0  ;;  %vm239_vm1 = vcmask (!%p173_p2), 130048   ;;  %v615_v10 = vld [vmem:[%s704_s2] sm:$0xff] (!%p173_p2)   ;;  %s628_s30 = smov (!%p173_p2), 112   ;;  %v614_v13 = vld [vmem:[%s704_s2 + $0x8] sm:$0xff] (!%p173_p2)   ;;  %vm354_vm2 = vcmask (!%p173_p2), 916480  }
   0x7   : > { %575 = vmatprep.subr.bf16.mxu1 (!%p173_p2), %v625_v0  ;;  %577 = vmatprep.mubr.msk.bf16.mxu1 (!%p173_p2), %vm626_vm0, %v625_v0  ;;  %v616_v22 = vld [vmem:[%s704_s2 + $0x10] sm:$0xff] (!%p173_p2)  }
   0x8   : > { %599 = vset.pattern.permute.xlu1 (!%p173_p2), %v627_v2  ;;  %610 = vset.pattern.permute.xlu0 (!%p173_p2), %v627_v2 }
   0x9   : > { %434 = vperm.xlu1 (!%p173_p2), %599, %v430_v1  }
   0xd   : > { %s708_s16 = smov (!%p203_p3, %s525_s16), 1  ;;  %439 = vperm.xlu1 %599, %v431_v8  }
   0xe   : > { %s553_s17 = sshll.u32 %s708_s16, 4  ;;  %s555_s9 = sshll.u32 %s708_s16, 3 }
   0xf   : > { %s207_s22 = scalar_lea.vmem %s702_s0, %s553_s17  ;;  %s212_s25 = scalar_lea.vmem %s703_s1, %s553_s17 }
  0x10   : > { %v219_v3 = vld [vmem:[%s207_s22] sm:$0xff]  ;;  %v220_v4 = vld [vmem:[%s207_s22 + $0x8] sm:$0xff]  ;;  %s217_s12 = scalar_lea.vmem %s706_s4, %s555_s9 }
  0x11   : > { %v221_v5 = vld [vmem:[%s212_s25] sm:$0xff]  ;;  %v542_v6 = vcombine.low %v219_v3, %v220_v4  ;;  %v222_v7 = vld [vmem:[%s212_s25 + $0x8] sm:$0xff]  ;;  %v407_v11 = vunpack.c.l.bf16 %v220_v4  ;;  %v547_v12 = vcombine.high %v219_v3, %v220_v4  ;;  %v405_v14 = vunpack.c.l.bf16 %v219_v3 }
  0x12   : > { %v539_v9 = vcombine.low %v221_v5, %v222_v7  ;;  %v406_v15 = vunpack.c.h.bf16 %v219_v3  ;;  %v408_v16 = vunpack.c.h.bf16 %v220_v4  ;;  %v403_v23 = vunpack.c.l.bf16 %v221_v5 }
  0x13   : > { %350 = vrot.lane.b32.xlu0 %v542_v6, %s628_s30  ;;  %576 = vmatpush3.bf16.msra.mxu1 %v542_v6  ;;  %v404_v31 = vunpack.c.l.bf16 %v222_v7 }
  0x14   : > { %570 = vmatpush3.bf16.msra.mxu0 %v539_v9  ;;  %v605_v17 = vpack.i.bf16 %v408_v16, %v407_v11  ;;  %v600_v18 = vpack.i.bf16 %v406_v15, %v405_v14 }
  0x15   : > { %581 = vmatprep.subr.bf16.mxu0 %v625_v0 }
  0x16   : > { %578 = vmatmul.mubr.msk.bf16.vlgmr.msra.gmra.mrb[0].mxu1 %vm239_vm1, %v615_v10  ;;  %606 = vrot.lane.b32.xlu1 %v605_v17, %s628_s30 }
  0x17   : > { %352 = vrot.lane.b32.xlu0 %v547_v12, %s628_s30  ;;  %572 = vmatmul.mubr.msk.bf16.vlgmr.msra.gmra.mrb[0].mxu0 %vm239_vm1, %v614_v13 }
  0x18   : > { %583 = vmatprep.mubr.msk.bf16.mxu0 %vm626_vm0, %v625_v0 }
  0x1b   : > { %601 = vrot.lane.b32.xlu0 %v600_v18, %s628_s30 }
  0x85   : > { %v351_v19 = vpop.permute.xlu0 %350 }
  0x88   : > { %v435_v27 = vpop.permute.xlu1 %434 }
  0x89   : > { %v353_v20 = vpop.permute.xlu0 %352 }
  0x8a   : > { %v355_v21 = vsel %vm354_vm2, %v351_v19, %v353_v20 }
  0x8b   : > { %582 = vmatpush3.bf16.msra.mxu0 %v355_v21 }
  0x8c   : > { %v440_v30 = vpop.permute.xlu1 %439 }
  0x8d   : > { %v602_v24 = vpop.permute.xlu0 %601 }
  0x8e   : > { %584 = vmatmul.mubr.msk.bf16.vlgmr.msra.gmra.mrb[4].mxu0 %vm239_vm1, %v616_v22  ;;  %v604_v25 = vunpack.i.h.bf16 %v602_v24  ;;  %v603_v26 = vunpack.i.l.bf16 %v602_v24 }
  0x90   : > { %v422_v28 = vsel %vm354_vm2, %v603_v26, %v604_v25  ;;  %v607_v32 = vpop.permute.xlu1 %606 }
  0x91   : > { %v426_v29 = vadd.f32 %v422_v28, %v403_v23  ;;  %v609_v33 = vunpack.i.h.bf16 %v607_v32  ;;  %v608_v34 = vunpack.i.l.bf16 %v607_v32 }
  0x93   : > { %v423_v35 = vsel %vm354_vm2, %v608_v34, %v609_v33  ;;  %v428_v49 = vmul.f32 0.5, %v426_v29 }
  0x94   : > { %v427_v36 = vadd.f32 %v423_v35, %v404_v31 }
  0x96   : > { %v429_v54 = vmul.f32 0.5, %v427_v36 }
  0xe9   : > { %v332_v37 = vpop.f32.mrb[0].mxu1 }
  0xea   : > { %v277_v38 = vpop.f32.mrb[0].mxu0  ;;  %v579_v39 = vpop.f32.mrb[1].mxu1 }
  0xeb   : > { %v573_v40 = vpop.f32.mrb[1].mxu0  ;;  %v333_v41 = vadd.f32 %v332_v37, %v277_v38  ;;  %v335_v42 = vpop.f32.mrb[2].mxu1 }
  0xec   : > { %v280_v43 = vpop.f32.mrb[2].mxu0  ;;  %v580_v44 = vpop.f32.mrb[3].mxu1 }
  0xed   : > { %v574_v45 = vpop.f32.mrb[3].mxu0  ;;  %v336_v46 = vadd.f32 %v335_v42, %v280_v43 }
 0x161   : > { %v394_v47 = vpop.f32.mrb[4].mxu0 }
 0x162   : > { %v401_v48 = vadd.f32 %v394_v47, %v333_v41  ;;  %v585_v50 = vpop.f32.mrb[5].mxu0 }
 0x163   : > { %v397_v51 = vpop.f32.mrb[6].mxu0 }
 0x164   : > { %v442_v52 = vadd.f32 %v435_v27, %v401_v48  ;;  %v402_v53 = vadd.f32 %v397_v51, %v336_v46  ;;  %v586_v55 = vpop.f32.mrb[7].mxu0 }
 0x166   : > { %v444_v56 = vadd.f32 %v442_v52, %v428_v49  ;;  %v443_v57 = vadd.f32 %v440_v30, %v402_v53 }
 0x168   : > { %v445_v58 = vadd.f32 %v443_v57, %v429_v54  ;;  %v446_v59 = vmax.f32 %v444_v56, 0.0 }
 0x16a   : > { %v447_v60 = vmax.f32 %v445_v58, 0.0 }
 0x16c   : > { %v561_v61 = vpack.c.bf16 %v447_v60, %v446_v59 }
 0x16e   : > { %562 = vst [vmem:[%s217_s12] sm:$0xff] %v561_v61  }
 0x16f PF: > { %s14_s15 = sadd.s32 1, %s623_s15  }
 0x170   : > { %p11_p4 = scmp.ge.s32.totalorder %s14_s15, 4  }
 0x172   :  { %13 = sbr.rel (!%p11_p4) target bundleno = 1 (0x1), region = 71 }

// kernel: efficient_gcn_forward.13
= control target key start
LH: loop header
LB: loop body
LE: loop exit
PB: predicated region body
PF: predicated region fallthrough
CT: control target
= control target key end

     0   :  { %s580_s12 = smov 0   ;;  %s625_s0 = inlined_call_operand.vmem [shape: bf16[2,16,160], index: 0, kind: input, shape index: {}]   ;;  %s626_s1 = inlined_call_operand.vmem [shape: bf16[3,16,16], index: 1, kind: input, shape index: {}]   ;;  %s627_s2 = inlined_call_operand.vmem [shape: f32[16,1], index: 2, kind: input, shape index: {}]   ;;  %s628_s3 = inlined_call_operand.vmem [shape: bf16[2,16,128], index: 3, kind: output, shape index: {}]  }
   0x1 LB: > { %s459_s13 = sadd.s32 4294967295, %s553_s12   ;;  %p463_p0 = scmp.ge.s32.totalorder %s553_s12, 1  ;;  %s553_s12 = sphi %s580_s12, %s13_s12  }
   0x2   : > { %p137_p1 = scmp.lt.s32.totalorder %s553_s12, 3 }
   0x4   : > { %p138_p2 = pnand %p463_p0, %p137_p1 }
   0x5   : > { %p161_p3 = scmp.lt.s32.totalorder (!%p138_p2), %s459_s13, 1  ;;  %v555_v0 = vmov (!%p138_p2), 0.0   ;;  %vm556_vm0 = vmmov (!%p138_p2), 0   ;;  %s557_s18 = smov (!%p138_p2), 96   ;;  %v545_v5 = vld [vmem:[%s626_s1] sm:$0xff] (!%p138_p2)   ;;  %vm199_vm1 = vcmask (!%p138_p2), 130048  }
   0x6   : > { %141 = sbr.rel (%p138_p2) target bundleno = 375 (0x177), region = 32  ;;  %499 = vmatprep.subr.bf16.mxu0 (!%p138_p2), %v555_v0  ;;  %505 = vmatprep.subr.bf16.mxu1 (!%p138_p2), %v555_v0  ;;  %s558_s19 = smov (!%p138_p2), 112   ;;  %v559_v10 = vmov (!%p138_p2), 0   ;;  %v360_v11 = vld [vmem:[%s627_s2 + $0x8] sm:$0xff] (!%p138_p2)  ;;  %v359_v12 = vld [vmem:[%s627_s2] sm:$0xff] (!%p138_p2)  ;;  %vm196_vm2 = vcmask (!%p138_p2), 916480  }
   0x7   : > { %501 = vmatprep.mubr.msk.bf16.mxu0 (!%p138_p2), %vm556_vm0, %v555_v0  ;;  %507 = vmatprep.mubr.msk.bf16.mxu1 (!%p138_p2), %vm556_vm0, %v555_v0  ;;  %vm306_vm3 = vcmask (!%p138_p2), 785408   ;;  %v544_v20 = vld [vmem:[%s626_s1 + $0x8] sm:$0xff] (!%p138_p2)   ;;  %v546_v22 = vld [vmem:[%s626_s1 + $0x10] sm:$0xff] (!%p138_p2)  }
   0x8   : > { %531 = vset.pattern.permute.xlu1 (!%p138_p2), %v559_v10  ;;  %530 = vset.pattern.permute.xlu0 (!%p138_p2), %v559_v10 }
   0xd   : > { %s630_s13 = smov (!%p161_p3, %s459_s13), 1 }
   0xe   : > { %s484_s14 = sshll.u32 %s630_s13, 4  ;;  %s485_s30 = sshll.u32 %s630_s13, 3 }
   0xf   : > { %s165_s17 = scalar_lea.vmem %s625_s0, %s484_s14  ;;  %s170_s6 = scalar_lea.vmem %s628_s3, %s485_s30 }
  0x10   : > { %v172_v1 = vld [vmem:[%s165_s17] sm:$0xff]  ;;  %v173_v2 = vld [vmem:[%s165_s17 + $0x8] sm:$0xff] }
  0x11   : > { %v471_v3 = vcombine.low %v172_v1, %v173_v2  ;;  %v472_v4 = vcombine.high %v172_v1, %v173_v2  ;;  %v355_v6 = vunpack.c.l.bf16 %v172_v1  ;;  %v356_v7 = vunpack.c.h.bf16 %v172_v1 }
  0x12   : > { %v357_v8 = vunpack.c.l.bf16 %v173_v2  ;;  %v358_v9 = vunpack.c.h.bf16 %v173_v2 }
  0x13   : > { %302 = vrot.lane.b32.xlu1 %v471_v3, %s557_s18  ;;  %192 = vrot.lane.b32.xlu0 %v471_v3, %s558_s19  ;;  %v532_v13 = vpack.i.bf16 %v356_v7, %v355_v6 }
  0x14   : > { %506 = vmatpush3.bf16.msra.mxu1 %v471_v3  ;;  %v537_v14 = vpack.i.bf16 %v358_v9, %v357_v8 }
  0x17   : > { %304 = vrot.lane.b32.xlu1 %v472_v4, %s557_s18  ;;  %194 = vrot.lane.b32.xlu0 %v472_v4, %s558_s19 }
  0x18   : > { %508 = vmatmul.mubr.msk.bf16.vlgmr.msra.gmra.mrb[0].mxu1 %vm199_vm1, %v545_v5 }
  0x1b   : > { %368 = vperm.xlu1 %531, %v360_v11   ;;  %363 = vperm.xlu0 %530, %v359_v12  }
  0x1f   : > { %533 = vrot.lane.b32.xlu1 %v532_v13, %s558_s19  ;;  %538 = vrot.lane.b32.xlu0 %v537_v14, %s558_s19 }
  0x85   : > { %v303_v15 = vpop.permute.xlu1 %302  ;;  %v193_v16 = vpop.permute.xlu0 %192 }
  0x89   : > { %v305_v17 = vpop.permute.xlu1 %304  ;;  %v195_v18 = vpop.permute.xlu0 %194 }
  0x8a   : > { %v197_v19 = vsel %vm196_vm2, %v193_v16, %v195_v18  ;;  %v307_v21 = vsel %vm306_vm3, %v303_v15, %v305_v17 }
  0x8b   : > { %500 = vmatpush3.bf16.msra.mxu0 %v197_v19 }
  0x8c   : > { %511 = vmatprep.subr.bf16.mxu0 %v555_v0 }
  0x8e   : > { %502 = vmatmul.mubr.msk.bf16.vlgmr.msra.gmra.mrb[0].mxu0 %vm199_vm1, %v544_v20 }
  0x8f   : > { %512 = vmatpush3.bf16.msra.mxu0 %v307_v21  ;;  %513 = vmatprep.mubr.msk.bf16.mxu0 %vm556_vm0, %v555_v0 }
  0x96   : > { %514 = vmatmul.mubr.msk.bf16.vlgmr.msra.gmra.mrb[4].mxu0 %vm199_vm1, %v546_v22 }
  0x9a   : > { %v369_v27 = vpop.permute.xlu1 %368  ;;  %v364_v28 = vpop.permute.xlu0 %363 }
  0x9e   : > { %v534_v35 = vpop.permute.xlu1 %533  ;;  %v539_v36 = vpop.permute.xlu0 %538 }
  0x9f   : > { %v536_v37 = vunpack.i.h.bf16 %v534_v35  ;;  %v535_v38 = vunpack.i.l.bf16 %v534_v35  ;;  %v541_v40 = vunpack.i.h.bf16 %v539_v36  ;;  %v540_v41 = vunpack.i.l.bf16 %v539_v36 }
  0xa1   : > { %v386_v44 = vsel %vm196_vm2, %v535_v38, %v536_v37  ;;  %v387_v49 = vsel %vm196_vm2, %v540_v41, %v541_v40 }
  0xeb   : > { %v287_v23 = vpop.f32.mrb[0].mxu1 }
  0xec   : > { %v509_v24 = vpop.f32.mrb[1].mxu1 }
  0xed   : > { %v290_v25 = vpop.f32.mrb[2].mxu1 }
  0xee   : > { %v510_v26 = vpop.f32.mrb[3].mxu1 }
 0x161   : > { %v237_v29 = vpop.f32.mrb[0].mxu0 }
 0x162   : > { %v288_v30 = vadd.f32 %v287_v23, %v237_v29  ;;  %v503_v31 = vpop.f32.mrb[1].mxu0 }
 0x163   : > { %v240_v32 = vpop.f32.mrb[2].mxu0 }
 0x164   : > { %v291_v33 = vadd.f32 %v290_v25, %v240_v32  ;;  %v504_v34 = vpop.f32.mrb[3].mxu0 }
 0x169   : > { %v346_v39 = vpop.f32.mrb[4].mxu0 }
 0x16a   : > { %v353_v42 = vadd.f32 %v346_v39, %v288_v30  ;;  %v515_v43 = vpop.f32.mrb[5].mxu0 }
 0x16b   : > { %v349_v45 = vpop.f32.mrb[6].mxu0 }
 0x16c   : > { %v371_v46 = vadd.f32 %v364_v28, %v353_v42  ;;  %v354_v47 = vadd.f32 %v349_v45, %v291_v33  ;;  %v516_v48 = vpop.f32.mrb[7].mxu0 }
 0x16e   : > { %v390_v50 = vadd.f32 %v386_v44, %v371_v46  ;;  %v372_v51 = vadd.f32 %v369_v27, %v354_v47 }
 0x170   : > { %v391_v52 = vadd.f32 %v387_v49, %v372_v51  ;;  %v392_v53 = vmax.f32 %v390_v50, 0.0 }
 0x172   : > { %v393_v54 = vmax.f32 %v391_v52, 0.0 }
 0x174   : > { %v491_v55 = vpack.c.bf16 %v393_v54, %v392_v53 }
 0x176   : > { %492 = vst [vmem:[%s170_s6] sm:$0xff] %v491_v55  }
 0x177 PF: > { %s13_s12 = sadd.s32 1, %s553_s12  }
 0x178   : > { %p10_p4 = scmp.ge.s32.totalorder %s13_s12, 4  }
 0x17a   :  { %12 = sbr.rel (!%p10_p4) target bundleno = 1 (0x1), region = 64 }

// kernel: efficient_gcn_forward.14
= control target key start
LH: loop header
LB: loop body
LE: loop exit
PB: predicated region body
PF: predicated region fallthrough
CT: control target
= control target key end

     0   :  { %s2194_s30 = smov 0   ;;  %s2710_s0 = inlined_call_operand.vmem [shape: bf16[2,16,8,16], index: 0, kind: input, shape index: {}]   ;;  %s2711_s1 = inlined_call_operand.vmem [shape: f32[8,16], index: 1, kind: input, shape index: {}]   ;;  %s2712_s2 = inlined_call_operand.vmem [shape: f32[8,1], index: 2, kind: input, shape index: {}]   ;;  %s2713_s3 = inlined_call_operand.vmem [shape: f32[16,8], index: 3, kind: input, shape index: {}]   ;;  %s2714_s4 = inlined_call_operand.vmem [shape: f32[16,1], index: 4, kind: input, shape index: {}]   ;;  %s2715_s5 = inlined_call_operand.vmem [shape: f32[16,8], index: 5, kind: input, shape index: {}]   ;;  %s2716_s6 = inlined_call_operand.vmem [shape: f32[16,1], index: 6, kind: input, shape index: {}]   ;;  %s2717_s7 = inlined_call_operand.vmem [shape: f32[16,1], index: 7, kind: input, shape index: {}]   ;;  %s2718_s8 = inlined_call_operand.vmem [shape: f32[16,1], index: 8, kind: input, shape index: {}]   ;;  %s2719_s9 = inlined_call_operand.vmem [shape: bf16[2,16,8,16], index: 9, kind: output, shape index: {}]  }
   0x1 LB: > { %s1992_s10 = sadd.s32 4294967295, %s2137_s30   ;;  %p1996_p0 = scmp.ge.s32.totalorder %s2137_s30, 1  ;;  %s2137_s30 = sphi %s2194_s30, %s19_s30  }
   0x2   : > { %p287_p1 = scmp.lt.s32.totalorder %s2137_s30, 3 }
   0x4   : > { %p288_p2 = pnand %p1996_p0, %p287_p1 }
   0x6   : > { %291 = sbr.rel (%p288_p2) target bundleno = 848 (0x350), region = 56 }
   0xd   : > { %p323_p3 = scmp.lt.s32.totalorder %s1992_s10, 1  ;;  %vm365_vm0 = vcmask 130048   ;;  %vm633_vm1 = vcmask 1041409   ;;  %vm635_vm2 = vcmask 1042434   ;;  %vm637_vm3 = vcmask 1043459  }
   0xe   : > { %vm639_vm4 = vcmask 1044484   ;;  %vm641_vm5 = vcmask 1045509   ;;  %vm643_vm6 = vcmask 1046534   ;;  %vm645_vm7 = vcmask 1047559  }
   0xf   : > { %s2739_s10 = smov (!%p323_p3, %s1992_s10), 1  ;;  %vm2141_vm8 = vmmov 0   ;;  %vm855_vm9 = vcmask 64512   ;;  %vm1920_vm10 = vcmask 125952  }
  0x10   : > { %s2013_s11 = sshll.u32 %s2739_s10, 6 }
  0x11   : > { %s2210_s14 = scalar_lea.vmem %s2710_s0, %s2013_s11  ;;  %s2602_s27 = scalar_lea.vmem %s2719_s9, %s2013_s11 }
  0x12   : > { %v2050_v0 = vld [vmem:[%s2210_s14 + $0x20] sm:$0xff]   ;;  %v2051_v2 = vld [vmem:[%s2210_s14 + $0x28] sm:$0xff]   ;;  %v2052_v61 = vld [vmem:[%s2210_s14 + $0x30] sm:$0xff]  }
  0x13   : > { %v2016_v1 = vld [vmem:[%s2210_s14] sm:$0xff]   ;;  %v2215_v3 = vunpack.c.l.bf16 %v2050_v0  ;;  %v2219_v5 = vunpack.c.h.bf16 %v2050_v0  ;;  %v2047_v7 = vld [vmem:[%s2210_s14 + $0x8] sm:$0xff]   ;;  %v2224_v8 = vunpack.c.l.bf16 %v2051_v2  ;;  %v2228_v10 = vunpack.c.h.bf16 %v2051_v2  ;;  %v2048_v62 = vld [vmem:[%s2210_s14 + $0x10] sm:$0xff]  }
  0x14   : > { %v2217_v4 = vunpack.c.l.bf16 %v2016_v1  ;;  %v2221_v6 = vunpack.c.h.bf16 %v2016_v1  ;;  %v2226_v9 = vunpack.c.l.bf16 %v2047_v7  ;;  %v2230_v11 = vunpack.c.h.bf16 %v2047_v7 }
  0x15   : > { %v390_v12 = vsel %vm365_vm0, %v2215_v3, 0.0  ;;  %v393_v14 = vsel %vm365_vm0, %v2219_v5, 0.0  ;;  %v396_v20 = vsel %vm365_vm0, %v2224_v8, 0.0  ;;  %v399_v22 = vsel %vm365_vm0, %v2228_v10, 0.0 }
  0x16   : > { %v366_v13 = vsel %vm365_vm0, %v2217_v4, 0.0  ;;  %v369_v15 = vsel %vm365_vm0, %v2221_v6, 0.0  ;;  %391 = vadd.xlane.f32.xlu1 %v390_v12  ;;  %v479_v16 = vrot.slane %v390_v12, 4  ;;  %v485_v18 = vrot.slane %v393_v14, 4 }
  0x17   : > { %367 = vadd.xlane.f32.xlu0 %v366_v13  ;;  %v431_v17 = vrot.slane %v366_v13, 4  ;;  %v437_v19 = vrot.slane %v369_v15, 4  ;;  %v372_v21 = vsel %vm365_vm0, %v2226_v9, 0.0  ;;  %v375_v23 = vsel %vm365_vm0, %v2230_v11, 0.0 }
  0x18   : > { %v480_v24 = vadd.f32 %v479_v16, %v390_v12  ;;  %v486_v26 = vadd.f32 %v485_v18, %v393_v14  ;;  %v491_v28 = vrot.slane %v396_v20, 4  ;;  %v443_v29 = vrot.slane %v372_v21, 4 }
  0x19   : > { %v432_v25 = vadd.f32 %v431_v17, %v366_v13  ;;  %v438_v27 = vadd.f32 %v437_v19, %v369_v15  ;;  %v497_v30 = vrot.slane %v399_v22, 4  ;;  %v449_v31 = vrot.slane %v375_v23, 4  ;;  %v2053_v19 = vld [vmem:[%s2210_s14 + $0x38] sm:$0xff]  }
  0x1a   : > { %v481_v32 = vrot.slane %v480_v24, 2  ;;  %v487_v34 = vrot.slane %v486_v26, 2  ;;  %394 = vadd.xlane.f32.xlu1 %v393_v14  ;;  %v492_v36 = vadd.f32 %v491_v28, %v396_v20  ;;  %v444_v37 = vadd.f32 %v443_v29, %v372_v21 }
  0x1b   : > { %v433_v33 = vrot.slane %v432_v25, 2  ;;  %v439_v35 = vrot.slane %v438_v27, 2  ;;  %370 = vadd.xlane.f32.xlu0 %v369_v15  ;;  %v498_v38 = vadd.f32 %v497_v30, %v399_v22  ;;  %v450_v39 = vadd.f32 %v449_v31, %v375_v23 }
  0x1c   : > { %v482_v40 = vadd.f32 %v481_v32, %v480_v24  ;;  %v488_v42 = vadd.f32 %v487_v34, %v486_v26  ;;  %v493_v44 = vrot.slane %v492_v36, 2  ;;  %v445_v45 = vrot.slane %v444_v37, 2 }
  0x1d   : > { %v434_v41 = vadd.f32 %v433_v33, %v432_v25  ;;  %v440_v43 = vadd.f32 %v439_v35, %v438_v27  ;;  %v499_v46 = vrot.slane %v498_v38, 2  ;;  %v451_v47 = vrot.slane %v450_v39, 2 }
  0x1e   : > { %v483_v48 = vrot.slane %v482_v40, 1  ;;  %v489_v50 = vrot.slane %v488_v42, 1  ;;  %397 = vadd.xlane.f32.xlu1 %v396_v20  ;;  %v494_v52 = vadd.f32 %v493_v44, %v492_v36  ;;  %v446_v53 = vadd.f32 %v445_v45, %v444_v37  ;;  %v2049_v20 = vld [vmem:[%s2210_s14 + $0x18] sm:$0xff]  }
  0x1f   : > { %v435_v49 = vrot.slane %v434_v41, 1  ;;  %v441_v51 = vrot.slane %v440_v43, 1  ;;  %373 = vadd.xlane.f32.xlu0 %v372_v21  ;;  %v500_v54 = vadd.f32 %v499_v46, %v498_v38  ;;  %v2248_v55 = vadd.f32 %v451_v47, %v450_v39 }
  0x20   : > { %v484_v56 = vadd.f32 %v483_v48, %v482_v40  ;;  %v495_v58 = vrot.slane %v494_v52, 1  ;;  %v447_v59 = vrot.slane %v446_v53, 1  ;;  %v490_v0 = vadd.f32 %v489_v50, %v488_v42 }
  0x21   : > { %v436_v57 = vadd.f32 %v435_v49, %v434_v41  ;;  %v501_v60 = vrot.slane %v500_v54, 1  ;;  %v442_v1 = vadd.f32 %v441_v51, %v440_v43  ;;  %v453_v2 = vrot.slane %v2248_v55, 1 }
  0x22   : > { %400 = vadd.xlane.f32.xlu1 %v399_v22  ;;  %v2252_v63 = vmul.f32 0.125, %v484_v56  ;;  %v2255_v7 = vunpack.c.l.bf16 %v2052_v61  ;;  %v2257_v12 = vunpack.c.l.bf16 %v2048_v62  ;;  %v2259_v13 = vunpack.c.h.bf16 %v2052_v61 }
  0x23   : > { %376 = vadd.xlane.f32.xlu0 %v375_v23  ;;  %v2261_v14 = vunpack.c.h.bf16 %v2048_v62  ;;  %v2263_v15 = vmul.f32 0.125, %v436_v57  ;;  %v496_v16 = vadd.f32 %v495_v58, %v494_v52  ;;  %v448_v17 = vadd.f32 %v447_v59, %v446_v53 }
  0x24   : > { %v2265_v18 = vadd.f32 %v501_v60, %v500_v54  ;;  %v402_v21 = vsel %vm365_vm0, %v2255_v7, 0.0  ;;  %v378_v22 = vsel %vm365_vm0, %v2257_v12, 0.0  ;;  %v405_v23 = vsel %vm365_vm0, %v2259_v13, 0.0 }
  0x25   : > { %v381_v24 = vsel %vm365_vm0, %v2261_v14, 0.0  ;;  %v503_v25 = vrot.slane %v402_v21, 4  ;;  %v455_v26 = vrot.slane %v378_v22, 4  ;;  %v509_v27 = vrot.slane %v405_v23, 4 }
  0x26   : > { %403 = vadd.xlane.f32.xlu1 %v402_v21  ;;  %v461_v28 = vrot.slane %v381_v24, 4  ;;  %v2277_v29 = vunpack.c.l.bf16 %v2053_v19  ;;  %v2279_v30 = vunpack.c.l.bf16 %v2049_v20  ;;  %v2281_v31 = vunpack.c.h.bf16 %v2053_v19 }
  0x27   : > { %379 = vadd.xlane.f32.xlu0 %v378_v22  ;;  %v2283_v32 = vunpack.c.h.bf16 %v2049_v20  ;;  %v504_v33 = vadd.f32 %v503_v25, %v402_v21  ;;  %v456_v34 = vadd.f32 %v455_v26, %v378_v22  ;;  %v510_v35 = vadd.f32 %v509_v27, %v405_v23 }
  0x28   : > { %2724 = vst [vmem:[#allocation2_spill] sm:$0xff] %v2281_v31  ;;  %v462_v36 = vadd.f32 %v461_v28, %v381_v24  ;;  %v408_v37 = vsel %vm365_vm0, %v2277_v29, 0.0  ;;  %v384_v38 = vsel %vm365_vm0, %v2279_v30, 0.0  ;;  %v411_v39 = vsel %vm365_vm0, %v2281_v31, 0.0 }
  0x29   : > { %2725 = vst [vmem:[#allocation3_spill] sm:$0xff] %v2283_v32  ;;  %v387_v40 = vsel %vm365_vm0, %v2283_v32, 0.0  ;;  %v505_v41 = vrot.slane %v504_v33, 2  ;;  %v457_v42 = vrot.slane %v456_v34, 2  ;;  %v511_v43 = vrot.slane %v510_v35, 2 }
  0x2a   : > { %406 = vadd.xlane.f32.xlu1 %v405_v23  ;;  %v463_v44 = vrot.slane %v462_v36, 2  ;;  %v515_v45 = vrot.slane %v408_v37, 4  ;;  %v467_v46 = vrot.slane %v384_v38, 4  ;;  %v521_v47 = vrot.slane %v411_v39, 4 }
  0x2b   : > { %382 = vadd.xlane.f32.xlu0 %v381_v24  ;;  %v473_v48 = vrot.slane %v387_v40, 4  ;;  %v506_v49 = vadd.f32 %v505_v41, %v504_v33  ;;  %v458_v50 = vadd.f32 %v457_v42, %v456_v34  ;;  %v512_v51 = vadd.f32 %v511_v43, %v510_v35 }
  0x2c   : > { %v464_v52 = vadd.f32 %v463_v44, %v462_v36  ;;  %v516_v53 = vadd.f32 %v515_v45, %v408_v37  ;;  %v468_v54 = vadd.f32 %v467_v46, %v384_v38  ;;  %v522_v56 = vadd.f32 %v521_v47, %v411_v39 }
  0x2d   : > { %v474_v57 = vadd.f32 %v473_v48, %v387_v40  ;;  %v507_v58 = vrot.slane %v506_v49, 1  ;;  %v459_v59 = vrot.slane %v458_v50, 1  ;;  %v513_v60 = vrot.slane %v512_v51, 1 }
  0x2e   : > { %v465_v61 = vrot.slane %v464_v52, 1  ;;  %409 = vadd.xlane.f32.xlu1 %v408_v37  ;;  %v517_v62 = vrot.slane %v516_v53, 2  ;;  %v469_v19 = vrot.slane %v468_v54, 2  ;;  %v523_v20 = vrot.slane %v522_v56, 2 }
  0x2f   : > { %385 = vadd.xlane.f32.xlu0 %v384_v38  ;;  %v475_v21 = vrot.slane %v474_v57, 2  ;;  %v537_v22 = vmul.f32 0.125, %v490_v0  ;;  %v529_v23 = vmul.f32 0.125, %v442_v1  ;;  %v538_v24 = vmul.f32 0.125, %v496_v16 }
  0x30   : > { %v454_v25 = vadd.f32 %v453_v2, %v2248_v55  ;;  %v518_v26 = vadd.f32 %v517_v62, %v516_v53  ;;  %v470_v27 = vadd.f32 %v469_v19, %v468_v54  ;;  %v524_v28 = vadd.f32 %v523_v20, %v522_v56 }
  0x31   : > { %v476_v33 = vadd.f32 %v475_v21, %v474_v57  ;;  %v530_v34 = vmul.f32 0.125, %v448_v17  ;;  %v508_v35 = vadd.f32 %v507_v58, %v506_v49  ;;  %v460_v36 = vadd.f32 %v459_v59, %v458_v50 }
  0x32   : > { %v514_v37 = vadd.f32 %v513_v60, %v512_v51  ;;  %412 = vadd.xlane.f32.xlu1 %v411_v39  ;;  %v539_v38 = vmul.f32 0.125, %v2265_v18  ;;  %v466_v41 = vadd.f32 %v465_v61, %v464_v52  ;;  %v519_v0 = vrot.slane %v518_v26, 1 }
  0x33   : > { %388 = vadd.xlane.f32.xlu0 %v387_v40  ;;  %v471_v1 = vrot.slane %v470_v27, 1  ;;  %v531_v16 = vmul.f32 0.125, %v454_v25  ;;  %v525_v42 = vrot.slane %v524_v28, 1  ;;  %v477_v43 = vrot.slane %v476_v33, 1  ;;  %v2316_v25 = vld [vmem:[%s2711_s1] sm:$0xff] }
  0x34   : > { %v520_v55 = vadd.f32 %v519_v0, %v518_v26  ;;  %v750_v44 = vsel %vm633_vm1, %v529_v23, %v2263_v15  ;;  %v757_v17 = vsel %vm633_vm1, %v537_v22, %v2252_v63  ;;  %v540_v45 = vmul.f32 0.125, %v508_v35 }
  0x35   : > { %v472_v2 = vadd.f32 %v471_v1, %v470_v27  ;;  %v532_v39 = vmul.f32 0.125, %v460_v36  ;;  %v541_v40 = vmul.f32 0.125, %v514_v37  ;;  %v533_v46 = vmul.f32 0.125, %v466_v41 }
  0x36   : > { %v542_v18 = vmul.f32 0.125, %v520_v55  ;;  %v751_v48 = vsel %vm635_vm2, %v530_v34, %v750_v44  ;;  %v758_v49 = vsel %vm635_vm2, %v538_v24, %v757_v17  ;;  %v478_v50 = vadd.f32 %v477_v43, %v476_v33  ;;  %v545_v33 = vld [vmem:[%s2712_s2] sm:$0xff]  ;;  %v1381_v55 = vld [vmem:[%s2717_s7 + $0x8] sm:$0xff] }
  0x37   : > { %v534_v47 = vmul.f32 0.125, %v472_v2  ;;  %v526_v51 = vadd.f32 %v525_v42, %v524_v28  ;;  %v752_v15 = vsel %vm637_vm3, %v531_v16, %v751_v48  ;;  %v759_v52 = vsel %vm637_vm3, %v539_v38, %v758_v49  ;;  %v1380_v34 = vld [vmem:[%s2717_s7] sm:$0xff] }
  0x38   : > { %v753_v63 = vsel %vm639_vm4, %v532_v39, %v752_v15  ;;  %v760_v53 = vsel %vm639_vm4, %v540_v45, %v759_v52  ;;  %v535_v54 = vmul.f32 0.125, %v478_v50  ;;  %v2139_v19 = vmov 1966171168   ;;  %v1626_v50 = vld [vmem:[%s2718_s8] sm:$0xff] }
  0x39   : > { %v543_v56 = vmul.f32 0.125, %v526_v51  ;;  %v754_v57 = vsel %vm641_vm5, %v533_v46, %v753_v63  ;;  %v761_v59 = vsel %vm641_vm5, %v541_v40, %v760_v53  ;;  %v1188_v20 = vunpack.c.l.s4 %v2139_v19 }
  0x3a   : > { %v755_v58 = vsel %vm643_vm6, %v534_v47, %v754_v57  ;;  %v762_v61 = vsel %vm643_vm6, %v542_v18, %v761_v59  ;;  %v2140_v21 = vmov 0.0|0.0   ;;  %v567_v23 = vlaneseq }
  0x3b   : > { %v756_v60 = vsel %vm645_vm7, %v535_v54, %v755_v58  ;;  %v763_v62 = vsel %vm645_vm7, %v543_v56, %v762_v61  ;;  %2093 = vmatprep.subr.bf16.mxu1 %v2140_v21  ;;  %2090 = vmatprep.subr.bf16.mxu0 %v2140_v21  ;;  %v2142_v24 = vmov 0.0   ;;  %v1189_v26 = vunpack.c.0.s8 %v1188_v20  ;;  %v1627_v61 = vld [vmem:[%s2718_s8 + $0x8] sm:$0xff] }
  0x3c   : > { %v2094_v22 = vpack.c.bf16 %v763_v62, %v756_v60  ;;  %2077 = vmatprep.mubr.msk.f32.mxu1 %vm2141_vm8, %v2142_v24  ;;  %2070 = vmatprep.mubr.msk.f32.mxu0 %vm2141_vm8, %v2142_v24  ;;  %v2321_v27 = vshrl.u32 %v567_v23, 7  ;;  %v2143_v36 = vmov 0   ;;  %v1384_v38 = vcombine.high %v1380_v34, %v1380_v34 }
  0x3d   : > { %2109 = vset.pattern.permute.xlu0 %v2143_v36  ;;  %2110 = vset.pattern.permute.xlu1 %v2143_v36  ;;  %v1433_v40 = vcombine.high %v1381_v55, %v1381_v55  ;;  %v1630_v54 = vcombine.high %v1626_v50, %v1626_v50  ;;  %v1679_v24 = vcombine.high %v1627_v61, %v1627_v61 }
  0x3e   : > { %2095 = vmatpush3.bf16.msra.mxu1 %v2094_v22  ;;  %v2324_v28 = vsub.s32 %v1189_v26, %v2321_v27  ;;  %v2333_v35 = vsub.s32 0, %v2321_v27 }
  0x40   : > { %v2336_v37 = vrot.slane %v1380_v34, %v2324_v28  ;;  %v2341_v0 = vrot.slane %v1384_v38, %v2324_v28  ;;  %v2352_v17 = vrot.slane %v1381_v55, %v2324_v28  ;;  %v2359_v47 = vrot.slane %v1433_v40, %v2324_v28 }
  0x41   : > { %2078 = vmatmul.mubr.msk.f32.vlgmr.msra.gmra.mrb[0].mxu1 %vm365_vm0, %v2316_v25  ;;  %v2369_v52 = vrot.slane %v1626_v50, %v2324_v28  ;;  %v2376_v58 = vrot.slane %v1630_v54, %v2324_v28  ;;  %v2386_v20 = vrot.slane %v1627_v61, %v2324_v28  ;;  %v2393_v34 = vrot.slane %v1679_v24, %v2324_v28 }
  0x42   : > { %v1407_v41 = vrot.slane %v2336_v37, %v2324_v28  ;;  %v1414_v43 = vrot.slane %v2341_v0, %v2324_v28  ;;  %v1456_v39 = vrot.slane %v2352_v17, %v2324_v28  ;;  %v1463_v49 = vrot.slane %v2359_v47, %v2324_v28 }
  0x43   : > { %v1653_v53 = vrot.slane %v2369_v52, %v2324_v28  ;;  %v1660_v60 = vrot.slane %v2376_v58, %v2324_v28  ;;  %v1702_v22 = vrot.slane %v2386_v20, %v2324_v28  ;;  %v2398_v38 = vrot.slane %v2393_v34, %v2324_v28 }
  0x44   : > { %v1485_v1 = vrot.slane %v1407_v41, %v2333_v35  ;;  %v1429_v16 = vcombine.high %v1407_v41, %v1407_v41  ;;  %v1501_v2 = vrot.slane %v1414_v43, %v2333_v35  ;;  %v1430_v44 = vcombine.high %v1414_v43, %v1414_v43 }
  0x45   : > { %v1517_v46 = vrot.slane %v1456_v39, %v2333_v35  ;;  %v1478_v18 = vcombine.high %v1456_v39, %v1456_v39  ;;  %v1533_v51 = vrot.slane %v1463_v49, %v2333_v35  ;;  %v1479_v15 = vcombine.high %v1463_v49, %v1463_v49 }
  0x46   : > { %v1493_v42 = vrot.slane %v1429_v16, %v2333_v35  ;;  %v1509_v45 = vrot.slane %v1430_v44, %v2333_v35  ;;  %v1731_v56 = vrot.slane %v1653_v53, %v2333_v35  ;;  %v1675_v57 = vcombine.high %v1653_v53, %v1653_v53 }
  0x47   : > { %v1525_v48 = vrot.slane %v1478_v18, %v2333_v35  ;;  %v1541_v63 = vrot.slane %v1479_v15, %v2333_v35  ;;  %v1747_v62 = vrot.slane %v1660_v60, %v2333_v35  ;;  %v1676_v19 = vcombine.high %v1660_v60, %v1660_v60 }
  0x48   : > { %v1739_v59 = vrot.slane %v1675_v57, %v2333_v35  ;;  %v1763_v26 = vrot.slane %v1702_v22, %v2333_v35  ;;  %v1779_v41 = vrot.slane %v2398_v38, %v2333_v35  ;;  %v568_v39 = vand.u32 127, %v567_v23 }
  0x49   : > { %548 = vperm.xlu0 %2109, %v545_v33   ;;  %v1755_v21 = vrot.slane %v1676_v19, %v2333_v35  ;;  %v1724_v33 = vcombine.high %v1702_v22, %v1702_v22 }
  0x4a   : > { %v571_v18 = vsub.s32 %v568_v39, %v2321_v27 }
  0x4b   : > { %v1771_v36 = vrot.slane %v1724_v33, %v2333_v35 }
  0x4d   : > { %1547 = vperm.xlu0 %2109, %v1485_v1  }
  0x51   : > { %1555 = vperm.xlu0 %2109, %v1493_v42  }
  0x55   : > { %1563 = vperm.xlu0 %2109, %v1501_v2  }
  0x59   : > { %1571 = vperm.xlu0 %2109, %v1509_v45  }
  0x5d   : > { %1579 = vperm.xlu0 %2109, %v1517_v46  }
  0x61   : > { %1587 = vperm.xlu0 %2109, %v1525_v48  }
  0x65   : > { %1595 = vperm.xlu0 %2109, %v1533_v51  }
  0x69   : > { %1603 = vperm.xlu0 %2109, %v1541_v63  }
  0x6d   : > { %1793 = vperm.xlu0 %2109, %v1731_v56  }
  0x71   : > { %1801 = vperm.xlu0 %2109, %v1739_v59  }
  0x75   : > { %1809 = vperm.xlu0 %2109, %v1747_v62  }
  0x79   : > { %1817 = vperm.xlu0 %2109, %v1755_v21  }
  0x7d   : > { %1825 = vperm.xlu0 %2109, %v1763_v26  }
  0x81   : > { %1833 = vperm.xlu0 %2109, %v1771_v36  }
  0x85   : > { %1841 = vperm.xlu0 %2109, %v1779_v41  }
  0xa3   : > { %v392_v1 = vpop.xlane.xlu1 %391 }
  0xa4   : > { %v368_v16 = vpop.xlane.xlu0 %367  ;;  %v423_v50 = vmul.f32 0.0625, %v392_v1 }
  0xa5   : > { %v415_v51 = vmul.f32 0.0625, %v368_v16 }
  0xa6   : > { %v604_v21 = vrot.slane %v423_v50, %v571_v18 }
  0xa7   : > { %v395_v42 = vpop.xlane.xlu1 %394  ;;  %v572_v22 = vrot.slane %v415_v51, %v571_v18 }
  0xa8   : > { %v371_v43 = vpop.xlane.xlu0 %370  ;;  %v424_v48 = vmul.f32 0.0625, %v395_v42 }
  0xa9   : > { %v416_v49 = vmul.f32 0.0625, %v371_v43 }
  0xaa   : > { %v608_v61 = vrot.slane %v424_v48, %v571_v18 }
  0xab   : > { %v398_v55 = vpop.xlane.xlu1 %397  ;;  %v576_v62 = vrot.slane %v416_v49, %v571_v18 }
  0xac   : > { %v374_v2 = vpop.xlane.xlu0 %373  ;;  %v425_v15 = vmul.f32 0.0625, %v398_v55 }
  0xad   : > { %v417_v63 = vmul.f32 0.0625, %v374_v2  ;;  %v647_v2 = vsel %vm633_vm1, %v608_v61, %v604_v21 }
  0xae   : > { %v612_v24 = vrot.slane %v425_v15, %v571_v18 }
  0xaf   : > { %v401_v44 = vpop.xlane.xlu1 %400  ;;  %v580_v26 = vrot.slane %v417_v63, %v571_v18 }
  0xb0   : > { %v377_v45 = vpop.xlane.xlu0 %376  ;;  %v426_v56 = vmul.f32 0.0625, %v401_v44  ;;  %v634_v44 = vsel %vm633_vm1, %v576_v62, %v572_v22 }
  0xb1   : > { %v418_v57 = vmul.f32 0.0625, %v377_v45 }
  0xb2   : > { %v616_v41 = vrot.slane %v426_v56, %v571_v18 }
  0xb3   : > { %v404_v40 = vpop.xlane.xlu1 %403  ;;  %v584_v1 = vrot.slane %v418_v57, %v571_v18 }
  0xb4   : > { %v380_v46 = vpop.xlane.xlu0 %379  ;;  %v427_v59 = vmul.f32 0.0625, %v404_v40  ;;  %v648_v40 = vsel %vm635_vm2, %v612_v24, %v647_v2  ;;  %v841_v2 = vld [vmem:[%s2713_s3] sm:$0xff] }
  0xb5   : > { %v419_v60 = vmul.f32 0.0625, %v380_v46  ;;  %v636_v46 = vsel %vm635_vm2, %v580_v26, %v634_v44  ;;  %v649_v15 = vsel %vm637_vm3, %v616_v41, %v648_v40  ;;  %v843_v44 = vld [vmem:[%s2714_s4] sm:$0xff] }
  0xb6   : > { %v620_v43 = vrot.slane %v427_v59, %v571_v18  ;;  %v638_v63 = vsel %vm637_vm3, %v584_v1, %v636_v46  ;;  %847 = vperm.xlu1 %2110, %v843_v44   ;;  %v951_v40 = vld [vmem:[%s2716_s6] sm:$0xff] }
  0xb7   : > { %v407_v53 = vpop.xlane.xlu1 %406  ;;  %v588_v55 = vrot.slane %v419_v60, %v571_v18 }
  0xb8   : > { %v383_v54 = vpop.xlane.xlu0 %382  ;;  %v428_v19 = vmul.f32 0.0625, %v407_v53  ;;  %v650_v56 = vsel %vm639_vm4, %v620_v43, %v649_v15 }
  0xb9   : > { %v420_v23 = vmul.f32 0.0625, %v383_v54  ;;  %v640_v57 = vsel %vm639_vm4, %v588_v55, %v638_v63  ;;  %v949_v55 = vld [vmem:[%s2715_s5] sm:$0xff] }
  0xba   : > { %v624_v45 = vrot.slane %v428_v19, %v571_v18  ;;  %2087 = vmatprep.mubr.msk.f32.mxu1 %vm855_vm9, %v949_v55  ;;  %v1695_v55 = vcombine.high %v2393_v34, %v2393_v34 }
  0xbb   : > { %v410_v33 = vpop.xlane.xlu1 %409  ;;  %v592_v39 = vrot.slane %v420_v23, %v571_v18 }
  0xbc   : > { %v386_v36 = vpop.xlane.xlu0 %385  ;;  %v429_v16 = vmul.f32 0.0625, %v410_v33  ;;  %v651_v62 = vsel %vm641_vm5, %v624_v45, %v650_v56  ;;  %v844_v45 = vld [vmem:[%s2714_s4 + $0x8] sm:$0xff] }
  0xbd   : > { %v421_v42 = vmul.f32 0.0625, %v386_v36  ;;  %v642_v61 = vsel %vm641_vm5, %v592_v39, %v640_v57  ;;  %852 = vperm.xlu1 %2110, %v844_v45   ;;  %v1399_v39 = vcombine.high %v2336_v37, %v2336_v37 }
  0xbe   : > { %v628_v48 = vrot.slane %v429_v16, %v571_v18 }
  0xbf   : > { %v596_v49 = vrot.slane %v421_v42, %v571_v18  ;;  %v413_v50 = vpop.xlane.xlu1 %412  ;;  %v1421_v46 = vrot.slane %v1399_v39, %v2324_v28 }
  0xc0   : > { %v389_v51 = vpop.xlane.xlu0 %388  ;;  %v430_v53 = vmul.f32 0.0625, %v413_v50  ;;  %v652_v23 = vsel %vm643_vm6, %v628_v48, %v651_v62  ;;  %v952_v48 = vld [vmem:[%s2716_s6 + $0x8] sm:$0xff] }
  0xc1   : > { %v422_v54 = vmul.f32 0.0625, %v389_v51  ;;  %v644_v19 = vsel %vm643_vm6, %v596_v49, %v642_v61  ;;  %955 = vperm.xlu1 %2110, %v951_v40   ;;  %v1489_v49 = vrot.slane %v1421_v46, %v2333_v35  ;;  %v1431_v50 = vcombine.high %v1421_v46, %v1421_v46 }
  0xc2   : > { %v632_v59 = vrot.slane %v430_v53, %v571_v18  ;;  %v1400_v51 = vcombine.high %v2341_v0, %v2341_v0 }
  0xc3   : > { %v600_v60 = vrot.slane %v422_v54, %v571_v18  ;;  %v1497_v37 = vrot.slane %v1431_v50, %v2333_v35  ;;  %v1448_v54 = vcombine.high %v2352_v17, %v2352_v17  ;;  %v842_v50 = vld [vmem:[%s2713_s3 + $0x8] sm:$0xff] }
  0xc4   : > { %v653_v22 = vsel %vm645_vm7, %v632_v59, %v652_v23  ;;  %v1428_v15 = vrot.slane %v1400_v51, %v2324_v28  ;;  %v1645_v23 = vcombine.high %v2369_v52, %v2369_v52 }
  0xc5   : > { %v646_v21 = vsel %vm645_vm7, %v600_v60, %v644_v19  ;;  %960 = vperm.xlu1 %2110, %v952_v48   ;;  %v1470_v57 = vrot.slane %v1448_v54, %v2324_v28  ;;  %v1449_v60 = vcombine.high %v2359_v47, %v2359_v47 }
  0xc6   : > { %v2091_v24 = vpack.c.bf16 %v653_v22, %v646_v21  ;;  %v1505_v63 = vrot.slane %v1428_v15, %v2333_v35  ;;  %v1432_v53 = vcombine.high %v1428_v15, %v1428_v15  ;;  %v1667_v22 = vrot.slane %v1645_v23, %v2324_v28 }
  0xc7   : > { %v1521_v0 = vrot.slane %v1470_v57, %v2333_v35  ;;  %v1480_v59 = vcombine.high %v1470_v57, %v1470_v57  ;;  %v1477_v62 = vrot.slane %v1449_v60, %v2324_v28 }
  0xc8   : > { %2092 = vmatpush3.bf16.msra.mxu0 %v2091_v24  ;;  %v2420_v26 = vpop.permute.xlu0 %548  ;;  %v1513_v56 = vrot.slane %v1432_v53, %v2333_v35  ;;  %v1735_v47 = vrot.slane %v1667_v22, %v2333_v35  ;;  %v1677_v24 = vcombine.high %v1667_v22, %v1667_v22  ;;  %v1079_v22 = vsub.s32 3, %v2321_v27 }
  0xc9   : > { %1551 = vperm.xlu1 %2110, %v1489_v49   ;;  %v1529_v61 = vrot.slane %v1480_v59, %v2333_v35  ;;  %v1537_v17 = vrot.slane %v1477_v62, %v2333_v35  ;;  %v1481_v19 = vcombine.high %v1477_v62, %v1477_v62  ;;  %v1065_v62 = vsub.s32 1, %v2321_v27 }
  0xcb   : > { %2071 = vmatmul.mubr.msk.f32.vlgmr.msra.gmra.mrb[0].mxu0 %vm365_vm0, %v2316_v25  ;;  %v950_v25 = vld [vmem:[%s2715_s5 + $0x8] sm:$0xff]  ;;  %v1545_v21 = vrot.slane %v1481_v19, %v2333_v35 }
  0xcc   : > { %2082 = vmatprep.mubr.msk.f32.mxu0 %vm855_vm9, %v841_v2  ;;  %v2485_v2 = vrot.slane %v1695_v55, %v2324_v28 }
  0xcd   : > { %1559 = vperm.xlu1 %2110, %v1497_v37  }
  0xd1   : > { %1567 = vperm.xlu1 %2110, %v1505_v63  }
  0xd5   : > { %1575 = vperm.xlu1 %2110, %v1513_v56  }
  0xd9   : > { %1583 = vperm.xlu1 %2110, %v1521_v0  }
  0xdd   : > { %1591 = vperm.xlu1 %2110, %v1529_v61  }
  0xe1   : > { %1599 = vperm.xlu1 %2110, %v1537_v17  }
  0xe5   : > { %1607 = vperm.xlu1 %2110, %v1545_v21  }
  0xe9   : > { %1797 = vperm.xlu1 %2110, %v1735_v47   ;;  %v1072_v47 = vsub.s32 2, %v2321_v27 }
 0x114   : > { %v832_v18 = vpop.f32.mrb[0].mxu1 }
 0x115   : > { %v833_v33 = vadd.f32 %v832_v18, %v2420_v26  ;;  %v2079_v36 = vpop.f32.mrb[1].mxu1  ;;  %v1646_v18 = vcombine.high %v2376_v58, %v2376_v58 }
 0x117   : > { %v836_v41 = vadd.f32 3.0, %v833_v33  ;;  %v1674_v36 = vrot.slane %v1646_v18, %v2324_v28 }
 0x119   : > { %v837_v1 = vmax.f32 %v836_v41, 0.0  ;;  %v1751_v52 = vrot.slane %v1674_v36, %v2333_v35  ;;  %v1678_v41 = vcombine.high %v1674_v36, %v1674_v36  ;;  %v1086_v36 = vsub.s32 4, %v2321_v27 }
 0x11b   : > { %v838_v16 = vmin.f32 %v837_v1, 6.0  ;;  %v1694_v1 = vcombine.high %v2386_v20, %v2386_v20  ;;  %v1783_v20 = vrot.slane %v2485_v2, %v2333_v35 }
 0x11d   : > { %v839_v42 = vmul.f32 %v838_v16, %v833_v33  ;;  %v1743_v33 = vrot.slane %v1677_v24, %v2333_v35  ;;  %v1759_v16 = vrot.slane %v1678_v41, %v2333_v35 }
 0x11f   : > { %v840_v43 = vmul.f32 0.16666667, %v839_v42  ;;  %1805 = vperm.xlu1 %2110, %v1743_v33   ;;  %v1716_v42 = vrot.slane %v1694_v1, %v2324_v28  ;;  %v1093_v33 = vsub.s32 5, %v2321_v27  ;;  %v1107_v1 = vsub.s32 7, %v2321_v27 }
 0x121   : > { %2085 = vmatprep.subr.mxu1 %v840_v43  ;;  %v1767_v58 = vrot.slane %v1716_v42, %v2333_v35 }
 0x122   : > { %2086 = vmatpush3.msra.mxu1 %v840_v43  ;;  %v1726_v43 = vcombine.high %v1716_v42, %v1716_v42 }
 0x123   : > { %2088 = vmatmul.mubr.msk.f32.vlgmr.msra.gmra.mrb[2].mxu1 %vm855_vm9, %v950_v25  ;;  %1813 = vperm.xlu1 %2110, %v1751_v52  }
 0x124   : > { %v1775_v25 = vrot.slane %v1726_v43, %v2333_v35 }
 0x127   : > { %1821 = vperm.xlu1 %2110, %v1759_v16   ;;  %v1100_v16 = vsub.s32 6, %v2321_v27 }
 0x12b   : > { %1829 = vperm.xlu1 %2110, %v1767_v58  }
 0x12f   : > { %1837 = vperm.xlu1 %2110, %v1775_v25  }
 0x133   : > { %1845 = vperm.xlu1 %2110, %v1783_v20  }
 0x135   : > { %v848_v15 = vpop.permute.xlu1 %847 }
 0x19e   : > { %v725_v44 = vpop.f32.mrb[0].mxu0 }
 0x19f   : > { %v726_v45 = vadd.f32 %v725_v44, %v2420_v26  ;;  %v2072_v39 = vpop.f32.mrb[1].mxu0  ;;  %v853_v26 = vpop.permute.xlu1 %852  ;;  %v1725_v44 = vcombine.high %v2398_v38, %v2398_v38 }
 0x1a1   : > { %v729_v40 = vadd.f32 3.0, %v726_v45  ;;  %v1787_v27 = vrot.slane %v1725_v44, %v2333_v35 }
 0x1a3   : > { %v730_v46 = vmax.f32 %v729_v40, 0.0  ;;  %v956_v55 = vpop.permute.xlu1 %955 }
 0x1a5   : > { %v731_v48 = vmin.f32 %v730_v46, 6.0 }
 0x1a7   : > { %v732_v49 = vmul.f32 %v731_v48, %v726_v45  ;;  %v961_v40 = vpop.permute.xlu1 %960  ;;  %v2510_v48 = vpop.permute.xlu0 %1547 }
 0x1a9   : > { %v733_v34 = vmul.f32 0.16666667, %v732_v49 }
 0x1ab   : > { %2080 = vmatprep.subr.mxu0 %v733_v34  ;;  %v2512_v49 = vpop.permute.xlu1 %1551 }
 0x1ac   : > { %2081 = vmatpush3.msra.mxu0 %v733_v34 }
 0x1ad   : > { %2083 = vmatmul.mubr.msk.f32.vlgmr.msra.gmra.mrb[2].mxu0 %vm855_vm9, %v842_v50 }
 0x1af   : > { %v2516_v38 = vpop.permute.xlu1 %1559 }
 0x1f6   : > { %v2494_v51 = vpop.f32.mrb[2].mxu1 }
 0x1f7   : > { %v2496_v37 = vpop.f32.mrb[3].mxu1 }
 0x280   : > { %v2084_v63 = vpop.f32.mrb[2].mxu0 }
 0x281   : > { %v934_v53 = vadd.f32 %v2084_v63, %v853_v26  ;;  %v928_v54 = vpop.f32.mrb[3].mxu0  ;;  %v1727_v26 = vcombine.high %v2485_v2, %v2485_v2 }
 0x282   : > { %v929_v57 = vadd.f32 %v928_v54, %v848_v15  ;;  %v2514_v15 = vpop.permute.xlu0 %1555 }
 0x283   : > { %v2006_v56 = vmul.f32 -1.442695, %v934_v53  ;;  %v1791_v53 = vrot.slane %v1727_v26, %v2333_v35 }
 0x284   : > { %v2005_v0 = vmul.f32 -1.442695, %v929_v57 }
 0x285   : > { %2115 = vpow2.f32 %v2006_v56  ;;  %v2523_v56 = vpop.permute.xlu1 %1567 }
 0x286   : > { %2117 = vpow2.f32 %v2005_v0  ;;  %v2521_v54 = vpop.permute.xlu0 %1563  ;;  %2726 = vst [vmem:[#allocation4_spill] sm:$0xff] %v2523_v56 }
 0x289   : > { %v2527_v0 = vpop.permute.xlu1 %1575 }
 0x28a   : > { %v2525_v57 = vpop.permute.xlu0 %1571  ;;  %2727 = vst [vmem:[#allocation5_spill] sm:$0xff] %v2527_v0 }
 0x28f   : > { %v2116_v59 = vpop.eup %2115 }
 0x290   : > { %v944_v60 = vadd.f32 1.0, %v2116_v59  ;;  %v2118_v61 = vpop.eup %2117  ;;  %v1580_v59 = vpop.permute.xlu0 %1579 }
 0x291   : > { %v943_v19 = vadd.f32 1.0, %v2118_v61 }
 0x292   : > { %2119 = vrcp.f32 %v944_v60  ;;  %v1584_v60 = vpop.permute.xlu1 %1583 }
 0x293   : > { %2121 = vrcp.f32 %v943_v19  ;;  %v1041_v19 = vadd.f32 %v2494_v51, %v961_v40 }
 0x294   : > { %v2529_v61 = vpop.permute.xlu0 %1587 }
 0x298   : > { %v2533_v2 = vpop.permute.xlu0 %1595 }
 0x29c   : > { %v2120_v17 = vpop.eup %2119 }
 0x29d   : > { %v1122_v23 = vrot.slane %v2120_v17, %v1065_v62  ;;  %v1115_v21 = vrot.slane %v2120_v17, %v2333_v35  ;;  %v1136_v24 = vrot.slane %v2120_v17, %v1079_v22  ;;  %v1129_v18 = vrot.slane %v2120_v17, %v1072_v47  ;;  %v2122_v43 = vpop.eup %2121 }
 0x29e   : > { %v1150_v52 = vrot.slane %v2120_v17, %v1093_v33  ;;  %v1143_v41 = vrot.slane %v2120_v17, %v1086_v36  ;;  %v1164_v42 = vrot.slane %v2120_v17, %v1107_v1  ;;  %v1157_v58 = vrot.slane %v2120_v17, %v1100_v16 }
 0x29f   : > { %1124 = vbcast.lane.b32.xlu1 %v1122_v23, 256  ;;  %1117 = vbcast.lane.b32.xlu0 %v1115_v21, 256  ;;  %v1087_v25 = vrot.slane %v2122_v43, %v1086_v36  ;;  %v1059_v20 = vrot.slane %v2122_v43, %v2333_v35  ;;  %v1101_v45 = vrot.slane %v2122_v43, %v1100_v16  ;;  %v2538_v23 = vpop.permute.xlu0 %1603 }
 0x2a0   : > { %v1066_v39 = vrot.slane %v2122_v43, %v1065_v62  ;;  %v1073_v46 = vrot.slane %v2122_v43, %v1072_v47  ;;  %v1080_v34 = vrot.slane %v2122_v43, %v1079_v22  ;;  %v1094_v50 = vrot.slane %v2122_v43, %v1093_v33  ;;  %v2531_v62 = vpop.permute.xlu1 %1591 }
 0x2a1   : > { %v1108_v63 = vrot.slane %v2122_v43, %v1107_v1  ;;  %v2010_v22 = vmul.f32 -1.442695, %v1041_v19 }
 0x2a3   : > { %1138 = vbcast.lane.b32.xlu1 %v1136_v24, 256  ;;  %1131 = vbcast.lane.b32.xlu0 %v1129_v18, 256  ;;  %2123 = vpow2.f32 %v2010_v22  ;;  %v2542_v47 = vpop.permute.xlu0 %1793  ;;  %v1036_v18 = vadd.f32 %v2496_v37, %v956_v55 }
 0x2a4   : > { %v2535_v17 = vpop.permute.xlu1 %1599 }
 0x2a7   : > { %1152 = vbcast.lane.b32.xlu1 %v1150_v52, 256  ;;  %1145 = vbcast.lane.b32.xlu0 %v1143_v41, 256  ;;  %v2547_v33 = vpop.permute.xlu0 %1801  ;;  %v2009_v52 = vmul.f32 -1.442695, %v1036_v18 }
 0x2a8   : > { %v2540_v21 = vpop.permute.xlu1 %1607 }
 0x2a9   : > { %2728 = vst [vmem:[#allocation6_spill] sm:$0xff] %v2540_v21  ;;  %2125 = vpow2.f32 %v2009_v52 }
 0x2ab   : > { %1166 = vbcast.lane.b32.xlu1 %v1164_v42, 256  ;;  %1159 = vbcast.lane.b32.xlu0 %v1157_v58, 256  ;;  %v2551_v1 = vpop.permute.xlu0 %1809 }
 0x2ac   : > { %v2544_v24 = vpop.permute.xlu1 %1797 }
 0x2ad   : > { %v2124_v41 = vpop.eup %2123 }
 0x2ae   : > { %v1051_v51 = vadd.f32 1.0, %v2124_v41 }
 0x2af   : > { %1089 = vbcast.lane.b32.xlu0 %v1087_v25, 256  ;;  %1061 = vbcast.lane.b32.xlu1 %v1059_v20, 256  ;;  %v2555_v42 = vpop.permute.xlu0 %1817 }
 0x2b0   : > { %v2549_v36 = vpop.permute.xlu1 %1805  ;;  %2127 = vrcp.f32 %v1051_v51 }
 0x2b3   : > { %1103 = vbcast.lane.b32.xlu0 %v1101_v45, 256  ;;  %1068 = vbcast.lane.b32.xlu1 %v1066_v39, 256  ;;  %v2126_v43 = vpop.eup %2125  ;;  %v1826_v37 = vpop.permute.xlu0 %1825 }
 0x2b4   : > { %v2553_v16 = vpop.permute.xlu1 %1813  ;;  %v1050_v25 = vadd.f32 1.0, %v2126_v43 }
 0x2b5   : > { %2729 = vst [vmem:[#allocation7_spill] sm:$0xff] %v2553_v16 }
 0x2b6   : > { %2129 = vrcp.f32 %v1050_v25 }
 0x2b7   : > { %1849 = vperm.xlu0 %2109, %v1787_v27   ;;  %1075 = vbcast.lane.b32.xlu1 %v1073_v46, 256  ;;  %v1834_v45 = vpop.permute.xlu0 %1833 }
 0x2b8   : > { %v2557_v58 = vpop.permute.xlu1 %1821 }
 0x2b9   : > { %2730 = vst [vmem:[#allocation8_spill] sm:$0xff] %v2557_v58 }
 0x2ba   : > { %v2128_v20 = vpop.eup %2127 }
 0x2bb   : > { %1082 = vbcast.lane.b32.xlu1 %v1080_v34, 256  ;;  %v1242_v44 = vrot.slane %v2128_v20, %v2324_v28  ;;  %v1235_v27 = vcombine.high %v2128_v20, %v2128_v20  ;;  %v2560_v46 = vpop.permute.xlu0 %1841 }
 0x2bc   : > { %v1830_v55 = vpop.permute.xlu1 %1829 }
 0x2bd   : > { %v1250_v40 = vcombine.high %v1242_v44, %v1242_v44  ;;  %v1258_v26 = vrot.slane %v1242_v44, %v2324_v28 }
 0x2bf   : > { %1096 = vbcast.lane.b32.xlu1 %v1094_v50, 256  ;;  %v1272_v50 = vrot.slane %v1250_v40, %v2324_v28  ;;  %v1280_v52 = vcombine.high %v1258_v26, %v1258_v26  ;;  %v1319_v20 = vrot.slane %v1258_v26, %v2333_v35 }
 0x2c0   : > { %v1838_v39 = vpop.permute.xlu1 %1837 }
 0x2c1   : > { %v1282_v18 = vcombine.high %v1272_v50, %v1272_v50  ;;  %v1323_v43 = vrot.slane %v1272_v50, %v2333_v35  ;;  %v1327_v16 = vrot.slane %v1280_v52, %v2333_v35 }
 0x2c3   : > { %1110 = vbcast.lane.b32.xlu1 %v1108_v63, 256  ;;  %v2130_v63 = vpop.eup %2129 }
 0x2c4   : > { %v2562_v34 = vpop.permute.xlu1 %1845  ;;  %v1186_v41 = vcombine.high %v2130_v63, %v2130_v63  ;;  %v1193_v44 = vrot.slane %v2130_v63, %v2324_v28 }
 0x2c7   : > { %1853 = vperm.xlu1 %2110, %v1791_v53   ;;  %v1249_v53 = vrot.slane %v1235_v27, %v2324_v28  ;;  %v1331_v27 = vrot.slane %v1282_v18, %v2333_v35 }
 0x2c9   : > { %v1251_v21 = vcombine.high %v1249_v53, %v1249_v53  ;;  %v1265_v32 = vrot.slane %v1249_v53, %v2324_v28 }
 0x2cb   : > { %v1335_v53 = vrot.slane %v1265_v32, %v2333_v35 }
 0x311   : > { %v1125_v19 = vpop.permute.xlu1 %1124  ;;  %v1118_v22 = vpop.permute.xlu0 %1117 }
 0x312   : > { %v1177_v51 = vmul.f32 %v2219_v5, %v1125_v19  ;;  %v1176_v25 = vmul.f32 %v2215_v3, %v1118_v22  ;;  %v2576_v19 = vrot.slane %v1186_v41, %v2324_v28  ;;  %v2585_v41 = vrot.slane %v1193_v44, %v2324_v28 }
 0x314   : > { %v1373_v40 = vmul.f32 %v1323_v43, %v1177_v51  ;;  %v1372_v31 = vmul.f32 %v1319_v20, %v1176_v25  ;;  %v2581_v43 = vrot.slane %v1251_v21, %v2324_v28 }
 0x315   : > { %v1139_v58 = vpop.permute.xlu1 %1138  ;;  %v1132_v0 = vpop.permute.xlu0 %1131 }
 0x316   : > { %v1619_v50 = vmul.f32 %v1584_v60, %v1373_v40  ;;  %v1618_v22 = vmul.f32 %v1580_v59, %v1372_v31  ;;  %v1179_v26 = vmul.f32 %v2228_v10, %v1139_v58  ;;  %v1178_v51 = vmul.f32 %v2224_v8, %v1132_v0 }
 0x317   : > { %v1216_v31 = vrot.slane %v2576_v19, %v2324_v28  ;;  %v1201_v59 = vcombine.high %v1193_v44, %v1193_v44  ;;  %v1281_v40 = vcombine.high %v1265_v32, %v1265_v32  ;;  %v1287_v32 = vrot.slane %v2585_v41, %v2333_v35 }
 0x318   : > { %v1865_v63 = vadd.f32 %v1830_v55, %v1619_v50  ;;  %v1864_v25 = vadd.f32 %v1826_v37, %v1618_v22  ;;  %v1375_v18 = vmul.f32 %v1331_v27, %v1179_v26  ;;  %v1374_v20 = vmul.f32 %v1327_v16, %v1178_v51 }
 0x319   : > { %v1153_v56 = vpop.permute.xlu1 %1152  ;;  %v1146_v52 = vpop.permute.xlu0 %1145  ;;  %v1339_v37 = vrot.slane %v2581_v43, %v2333_v35 }
 0x31a   : > { %v1881_v0 = vadd.f32 %v2219_v5, %v1865_v63  ;;  %v1880_v60 = vadd.f32 %v2215_v3, %v1864_v25  ;;  %v1621_v21 = vmul.f32 %v2531_v62, %v1375_v18  ;;  %v1620_v16 = vmul.f32 %v2529_v61, %v1374_v20 }
 0x31b   : > { %v1181_v58 = vmul.f32 %v2259_v13, %v1153_v56  ;;  %v1180_v55 = vmul.f32 %v2255_v7, %v1146_v52  ;;  %v1343_v18 = vrot.slane %v1281_v40, %v2333_v35 }
 0x31c   : > { %v1897_v27 = vmax.f32 %v1881_v0, 0.0  ;;  %v1896_v50 = vmax.f32 %v1880_v60, 0.0  ;;  %v1867_v22 = vadd.f32 %v1838_v39, %v1621_v21  ;;  %v1866_v44 = vadd.f32 %v1834_v45, %v1620_v16 }
 0x31d   : > { %v1377_v3 = vmul.f32 %v1339_v37, %v1181_v58  ;;  %v1376_v5 = vmul.f32 %v1335_v53, %v1180_v55  ;;  %v2604_v56 = vpop.permute.xlu1 %1166  ;;  %v1160_v61 = vpop.permute.xlu0 %1159  ;;  %v1303_v53 = vrot.slane %v1216_v31, %v2333_v35  ;;  %v1232_v21 = vcombine.high %v1216_v31, %v1216_v31 }
 0x31e   : > { %v1913_v62 = vpack.c.bf16 %v1897_v27, %v1897_v27  ;;  %v1912_v39 = vpack.c.bf16 %v1896_v50, %v1896_v50  ;;  %v1883_v45 = vadd.f32 %v2228_v10, %v1867_v22  ;;  %v1882_v26 = vadd.f32 %v2224_v8, %v1866_v44 }
 0x31f   : > { %v1623_v51 = vmul.f32 %v2535_v17, %v1377_v3  ;;  %v1622_v63 = vmul.f32 %v2533_v2, %v1376_v5  ;;  %v1182_v25 = vmul.f32 %v2277_v29, %v1160_v61  ;;  %v1223_v8 = vrot.slane %v1201_v59, %v2324_v28 }
 0x320   : > { %1930 = vst.msk [vmem:[%s2602_s27 + $0x24] sm:$0xf] %vm1920_vm10, %v1913_v62  ;;  %1929 = vst.msk [vmem:[%s2602_s27 + $0x20] sm:$0xf] %vm1920_vm10, %v1912_v39  ;;  %v1899_v20 = vmax.f32 %v1883_v45, 0.0  ;;  %v1898_v52 = vmax.f32 %v1882_v26, 0.0  ;;  %v1231_v39 = vcombine.high %v2585_v41, %v2585_v41 }
 0x321   : > { %v1869_v10 = vadd.f32 %v2562_v34, %v1623_v51  ;;  %v1868_v2 = vadd.f32 %v2560_v46, %v1622_v63  ;;  %v1378_v17 = vmul.f32 %v1343_v18, %v1182_v25  ;;  %v1062_v0 = vpop.permute.xlu1 %1061  ;;  %v1090_v60 = vpop.permute.xlu0 %1089  ;;  %v1291_v44 = vrot.slane %v1223_v8, %v2333_v35 }
 0x322   : > { %v1915_v16 = vpack.c.bf16 %v1899_v20, %v1899_v20  ;;  %v1914_v58 = vpack.c.bf16 %v1898_v52, %v1898_v52  ;;  %v1168_v37 = vmul.f32 %v2217_v4, %v1062_v0  ;;  %v1172_v55 = vmul.f32 %v2257_v12, %v1090_v60 }
 0x323   : > { %v1885_v40 = vadd.f32 %v2259_v13, %v1869_v10  ;;  %v1884_v27 = vadd.f32 %v2255_v7, %v1868_v2  ;;  %v2627_v59 = vmul.f32 %v2538_v23, %v1378_v17  ;;  %v1311_v13 = vrot.slane %v1232_v21, %v2333_v35 }
 0x324   : > { %1932 = vst.msk [vmem:[%s2602_s27 + $0x2c] sm:$0xf] %vm1920_vm10, %v1915_v16  ;;  %1931 = vst.msk [vmem:[%s2602_s27 + $0x28] sm:$0xf] %vm1920_vm10, %v1914_v58  ;;  %v1364_v46 = vmul.f32 %v1287_v32, %v1168_v37  ;;  %v1368_v34 = vmul.f32 %v1303_v53, %v1172_v55  ;;  %v1295_v20 = vrot.slane %v1231_v39, %v2333_v35 }
 0x325   : > { %v1901_v31 = vmax.f32 %v1885_v40, 0.0  ;;  %v1900_v50 = vmax.f32 %v1884_v27, 0.0  ;;  %v1069_v22 = vpop.permute.xlu1 %1068  ;;  %v1104_v3 = vpop.permute.xlu0 %1103  ;;  %v1233_v52 = vcombine.high %v1223_v8, %v1223_v8 }
 0x326   : > { %v1610_v7 = vmul.f32 %v2510_v48, %v1364_v46  ;;  %v1614_v23 = vmul.f32 %v2521_v54, %v1368_v34  ;;  %v1169_v5 = vmul.f32 %v2221_v6, %v1069_v22  ;;  %v1174_v61 = vmul.f32 %v2279_v30, %v1104_v3  ;;  %v2731_v22 = vld [vmem:[#allocation4_spill] sm:$0xff]  ;;  %v2732_v3 = vld [vmem:[#allocation3_spill] sm:$0xff] }
 0x327   : > { %v1917_v32 = vpack.c.bf16 %v1901_v31, %v1901_v31  ;;  %v1916_v62 = vpack.c.bf16 %v1900_v50, %v1900_v50  ;;  %v1202_v54 = vcombine.high %v2576_v19, %v2576_v19  ;;  %v1299_v16 = vrot.slane %v1233_v52, %v2333_v35 }
 0x328   : > { %v1856_v45 = vadd.f32 %v2542_v47, %v1610_v7  ;;  %v1860_v26 = vadd.f32 %v2551_v1, %v1614_v23  ;;  %v1365_v51 = vmul.f32 %v1291_v44, %v1169_v5  ;;  %v1370_v63 = vmul.f32 %v1311_v13, %v1174_v61  ;;  %v2733_v61 = vld [vmem:[#allocation7_spill] sm:$0xff] }
 0x329   : > { %1934 = vst.msk [vmem:[%s2602_s27 + $0x34] sm:$0xf] %vm1920_vm10, %v1917_v32  ;;  %1933 = vst.msk [vmem:[%s2602_s27 + $0x30] sm:$0xf] %vm1920_vm10, %v1916_v62  ;;  %v1076_v48 = vpop.permute.xlu1 %1075 }
 0x32a   : > { %v1872_v25 = vadd.f32 %v2217_v4, %v1856_v45  ;;  %v1876_v18 = vadd.f32 %v2257_v12, %v1860_v26  ;;  %v1611_v41 = vmul.f32 %v2512_v49, %v1365_v51  ;;  %v1616_v47 = vmul.f32 %v2525_v57, %v1370_v63  ;;  %v2734_v26 = vld [vmem:[#allocation5_spill] sm:$0xff] }
 0x32b   : > { %v1170_v1 = vmul.f32 %v2226_v9, %v1076_v48  ;;  %v1230_v12 = vrot.slane %v1202_v54, %v2324_v28  ;;  %v1283_v63 = vcombine.high %v2581_v43, %v2581_v43  ;;  %v2735_v54 = vld [vmem:[#allocation8_spill] sm:$0xff] }
 0x32c   : > { %v1888_v53 = vmax.f32 %v1872_v25, 0.0  ;;  %v1892_v10 = vmax.f32 %v1876_v18, 0.0  ;;  %v1857_v2 = vadd.f32 %v2544_v24, %v1611_v41  ;;  %v1862_v19 = vadd.f32 %v2555_v42, %v1616_v47  ;;  %v2736_v18 = vld [vmem:[#allocation2_spill] sm:$0xff] }
 0x32d   : > { %v1366_v4 = vmul.f32 %v1295_v20, %v1170_v1  ;;  %v1083_v17 = vpop.permute.xlu1 %1082  ;;  %v1234_v40 = vcombine.high %v1230_v12, %v1230_v12  ;;  %v1183_v41 = vmul.f32 %v2736_v18, %v2604_v56  ;;  %v1347_v1 = vrot.slane %v1283_v63, %v2333_v35 }
 0x32e   : > { %v1904_v49 = vpack.c.bf16 %v1888_v53, %v1888_v53  ;;  %v1908_v0 = vpack.c.bf16 %v1892_v10, %v1892_v10  ;;  %v1873_v57 = vadd.f32 %v2221_v6, %v1857_v2  ;;  %v1878_v60 = vadd.f32 %v2279_v30, %v1862_v19  ;;  %v2737_v53 = vld [vmem:[#allocation6_spill] sm:$0xff] }
 0x32f   : > { %v1612_v21 = vmul.f32 %v2514_v15, %v1366_v4  ;;  %v1171_v8 = vmul.f32 %v2230_v11, %v1083_v17  ;;  %v1307_v30 = vrot.slane %v1230_v12, %v2333_v35  ;;  %v1315_v7 = vrot.slane %v1234_v40, %v2333_v35 }
 0x330   : > { %1921 = vst.msk [vmem:[%s2602_s27] sm:$0xf] %vm1920_vm10, %v1904_v49  ;;  %1925 = vst.msk [vmem:[%s2602_s27 + $0x10] sm:$0xf] %vm1920_vm10, %v1908_v0  ;;  %v1889_v24 = vmax.f32 %v1873_v57, 0.0  ;;  %v1894_v28 = vmax.f32 %v1878_v60, 0.0  ;;  %v1379_v20 = vmul.f32 %v1347_v1, %v1183_v41 }
 0x331   : > { %v1858_v42 = vadd.f32 %v2547_v33, %v1612_v21  ;;  %v1367_v58 = vmul.f32 %v1299_v16, %v1171_v8  ;;  %v1097_v6 = vpop.permute.xlu1 %1096 }
 0x332   : > { %v1905_v37 = vpack.c.bf16 %v1889_v24, %v1889_v24  ;;  %v1910_v15 = vpack.c.bf16 %v1894_v28, %v1894_v28  ;;  %v1173_v55 = vmul.f32 %v2261_v14, %v1097_v6  ;;  %v1625_v56 = vmul.f32 %v2737_v53, %v1379_v20 }
 0x333   : > { %v1874_v27 = vadd.f32 %v2226_v9, %v1858_v42  ;;  %v1613_v46 = vmul.f32 %v2516_v38, %v1367_v58 }
 0x334   : > { %1922 = vst.msk [vmem:[%s2602_s27 + $0x4] sm:$0xf] %vm1920_vm10, %v1905_v37  ;;  %1927 = vst.msk [vmem:[%s2602_s27 + $0x18] sm:$0xf] %vm1920_vm10, %v1910_v15  ;;  %v1369_v34 = vmul.f32 %v1307_v30, %v1173_v55 }
 0x335   : > { %v1890_v33 = vmax.f32 %v1874_v27, 0.0  ;;  %v1859_v31 = vadd.f32 %v2549_v36, %v1613_v46  ;;  %v1111_v50 = vpop.permute.xlu1 %1110 }
 0x336   : > { %v1615_v44 = vmul.f32 %v2731_v22, %v1369_v34  ;;  %v1175_v13 = vmul.f32 %v2732_v3, %v1111_v50  ;;  %v1850_v23 = vpop.permute.xlu0 %1849 }
 0x337   : > { %v1906_v9 = vpack.c.bf16 %v1890_v33, %v1890_v33  ;;  %v1875_v38 = vadd.f32 %v2230_v11, %v1859_v31  ;;  %v1870_v5 = vadd.f32 %v1850_v23, %v2627_v59 }
 0x338   : > { %v1861_v32 = vadd.f32 %v2733_v61, %v1615_v44  ;;  %v1371_v62 = vmul.f32 %v1315_v7, %v1175_v13 }
 0x339   : > { %1923 = vst.msk [vmem:[%s2602_s27 + $0x8] sm:$0xf] %vm1920_vm10, %v1906_v9  ;;  %v1891_v36 = vmax.f32 %v1875_v38, 0.0  ;;  %v1886_v39 = vadd.f32 %v2277_v29, %v1870_v5 }
 0x33a   : > { %v1877_v45 = vadd.f32 %v2261_v14, %v1861_v32  ;;  %v1617_v51 = vmul.f32 %v2734_v26, %v1371_v62 }
 0x33b   : > { %v1907_v11 = vpack.c.bf16 %v1891_v36, %v1891_v36  ;;  %v1902_v59 = vmax.f32 %v1886_v39, 0.0 }
 0x33c   : > { %v1893_v48 = vmax.f32 %v1877_v45, 0.0  ;;  %v1863_v25 = vadd.f32 %v2735_v54, %v1617_v51 }
 0x33d   : > { %1924 = vst.msk [vmem:[%s2602_s27 + $0xc] sm:$0xf] %vm1920_vm10, %v1907_v11  ;;  %v1918_v47 = vpack.c.bf16 %v1902_v59, %v1902_v59 }
 0x33e   : > { %v1909_v29 = vpack.c.bf16 %v1893_v48, %v1893_v48  ;;  %v1879_v14 = vadd.f32 %v2732_v3, %v1863_v25 }
 0x33f   : > { %1935 = vst.msk [vmem:[%s2602_s27 + $0x38] sm:$0xf] %vm1920_vm10, %v1918_v47 }
 0x340   : > { %1926 = vst.msk [vmem:[%s2602_s27 + $0x14] sm:$0xf] %vm1920_vm10, %v1909_v29  ;;  %v1895_v43 = vmax.f32 %v1879_v14, 0.0 }
 0x342   : > { %v1911_v52 = vpack.c.bf16 %v1895_v43, %v1895_v43 }
 0x344   : > { %1928 = vst.msk [vmem:[%s2602_s27 + $0x1c] sm:$0xf] %vm1920_vm10, %v1911_v52 }
 0x346   : > { %v1854_v10 = vpop.permute.xlu1 %1853 }
 0x347   : > { %v1871_v2 = vadd.f32 %v1854_v10, %v1625_v56 }
 0x349   : > { %v1887_v19 = vadd.f32 %v2736_v18, %v1871_v2 }
 0x34b   : > { %v1903_v4 = vmax.f32 %v1887_v19, 0.0 }
 0x34d   : > { %v1919_v17 = vpack.c.bf16 %v1903_v4, %v1903_v4 }
 0x34f   : > { %1936 = vst.msk [vmem:[%s2602_s27 + $0x3c] sm:$0xf] %vm1920_vm10, %v1919_v17 }
 0x350 PF: > { %s19_s30 = sadd.s32 1, %s2137_s30  }
 0x351   : > { %p16_p4 = scmp.ge.s32.totalorder %s19_s30, 4  }
 0x353   :  { %18 = sbr.rel (!%p16_p4) target bundleno = 1 (0x1), region = 86 }

// kernel: efficient_gcn_forward.15
= control target key start
LH: loop header
LB: loop body
LE: loop exit
PB: predicated region body
PF: predicated region fallthrough
CT: control target
= control target key end

     0   :  { %s265_s0 = inlined_call_operand.vmem [shape: bf16[2,16,128], index: 0, kind: input, shape index: {}]   ;;  %s266_s1 = inlined_call_operand.vmem [shape: f32[16,32], index: 1, kind: input, shape index: {}]   ;;  %s267_s2 = inlined_call_operand.vmem [shape: f32[1,32], index: 2, kind: input, shape index: {}]   ;;  %s268_s3 = inlined_call_operand.hbm [shape: f32[2,32], index: 3, kind: output, shape index: {}]  }
   0x1   :  { %v172_v0 = vld [vmem:[%s265_s0 + $0x8] sm:$0xff]   ;;  %v165_v1 = vld [vmem:[%s265_s0] sm:$0xff]  }
   0x2   :  { %8 = vsyncpa [#allocation3], 0  ;;  %v170_v2 = vunpack.c.l.bf16 %v172_v0  ;;  %v166_v3 = vunpack.c.l.bf16 %v165_v1  ;;  %v171_v4 = vunpack.c.h.bf16 %v172_v0  ;;  %v167_v5 = vunpack.c.h.bf16 %v165_v1  ;;  %v36_v6 = vld [vmem:[%s266_s1] sm:$0xff]  ;;  %v37_v7 = vld [vmem:[%s266_s1 + $0x8] sm:$0xff]  ;;  %s217_s20 = smov [#allocation2]  }
   0x3   :  { %v184_v8 = vpack.c.bf16 %v37_v7, %v36_v6  ;;  %v214_v9 = vmov 0.0|0.0   ;;  %vm215_vm0 = vmmov 0   ;;  %v216_v10 = vmov 0.0   ;;  %v162_v32 = vld [vmem:[%s267_s2] ss:$0 sm:$0xff]  ;;  %s154_s21 = sshll.u32 %s217_s20, 4  ;;  %s155_s21 = int_to_ptr.vmem [resolvable:$true] %s154_s21 }
   0x4   :  { %27 = vadd.xlane.f32.xlu1 %v170_v2  ;;  %23 = vadd.xlane.f32.xlu0 %v166_v3  ;;  %v49_v11 = vlaneseq  ;;  %vm60_vm1 = vcmask 130112   ;;  %vm71_vm2 = vcmask 1041409   ;;  %vm73_vm3 = vcmask 130048   ;;  %s190_s22 = scalar_lea.vmem %s155_s21, 32  ;;  %p195_p1 = scmp.lt.s32.totalorder %s155_s21, %s155_s21 }
   0x5   :  { %183 = vmatprep.subr.bf16.mxu0 %v214_v9  ;;  %180 = vmatprep.mubr.msk.f32.mxu0 %vm215_vm0, %v216_v10  ;;  %vm146_vm4 = vcmask 254976   ;;  %p191_p0 = scmp.ne.s32.totalorder %s155_s21, %s190_s22  ;;  %p196_p2 = scmp.lt.s32.totalorder %s190_s22, %s190_s22 }
   0x6   :  { %185 = vmatpush3.bf16.msra.mxu0 %v184_v8  ;;  %v50_v12 = vand.u32 127, %v49_v11  ;;  %v52_v13 = vshrl.u32 %v49_v11, 7 }
   0x7   :  { %p197_p3 = por %p196_p2, %p195_p1 }
   0x8   :  { %29 = vadd.xlane.f32.xlu1 %v171_v4  ;;  %25 = vadd.xlane.f32.xlu0 %v167_v5  ;;  %v55_v14 = vadd.s32 4294967288, %v50_v12  ;;  %v53_v17 = vsub.s32 %v50_v12, %v52_v13 }
   0x9   :  { %p198_p4 = pnand %p197_p3, %p191_p0 }
   0xa   :  { %v58_v20 = vsub.s32 %v55_v14, %v52_v13 }
  0x91   :  { %v28_v15 = vpop.xlane.xlu1 %27  ;;  %v24_v16 = vpop.xlane.xlu0 %23 }
  0x92   :  { %v34_v18 = vmul.f32 0.0078125, %v28_v15  ;;  %v32_v19 = vmul.f32 0.0078125, %v24_v16 }
  0x94   :  { %v65_v25 = vrot.slane %v34_v18, %v53_v17  ;;  %v54_v26 = vrot.slane %v32_v19, %v53_v17 }
  0x95   :  { %v30_v21 = vpop.xlane.xlu1 %29  ;;  %v26_v22 = vpop.xlane.xlu0 %25 }
  0x96   :  { %v35_v23 = vmul.f32 0.0078125, %v30_v21  ;;  %v33_v24 = vmul.f32 0.0078125, %v26_v22 }
  0x98   :  { %v69_v27 = vrot.slane %v35_v23, %v58_v20  ;;  %v59_v28 = vrot.slane %v33_v24, %v58_v20 }
  0x9a   :  { %v61_v29 = vsel %vm60_vm1, %v59_v28, %v54_v26  ;;  %v70_v30 = vsel %vm60_vm1, %v69_v27, %v65_v25 }
  0x9b   :  { %v72_v31 = vsel %vm71_vm2, %v70_v30, %v61_v29 }
  0x9c   :  { %181 = vmatmul.mubr.msk.f32.vlgmr.msra.gmra.mrb[0].mxu0 %vm73_vm3, %v72_v31 }
 0x16f   :  { %v142_v33 = vpop.f32.mrb[0].mxu0 }
 0x170   :  { %v143_v34 = vadd.f32 %v162_v32, %v142_v33  ;;  %v182_v35 = vpop.f32.mrb[1].mxu0 }
 0x172   :  { %147 = vst.msk [vmem:[#allocation2] sm:$0x3] %vm146_vm4, %v143_v34 }
 0x173   :  { %201 = shalt.err (!%p198_p4)
}
 0x174   :  { %s202_s25 = scalar_lea.hbm %s268_s3, 32 }
 0x175   :  { %p203_p5 = scmp.ne.s32.totalorder %s268_s3, %s202_s25  ;;  %p206_p6 = scmp.lt.u32.totalorder %s202_s25, %s268_s3 }
 0x177   :  { %p208_p7 = pnand %p206_p6, %p203_p5 }
 0x179   :  { %211 = shalt.err (!%p208_p7)
}
 0x17a   :  { %157 = dma.vmem_to_hbm [thread:$0]  %s155_s21, 32, %s268_s3, [#allocation3]  }
 0x17b   :  { %212 = dma.done.wait [#allocation3], 32  }
 0x17c   :  { %213 = vsyncadd [#allocation3], 4294967264 }
 0x17d   :  { %161 = vsyncpa [#allocation3], 1 }

</bundles_post_ra>
